<compile_context>
chip_gen: v7x
topology: tpu7x:2x2x1
jax: 0.10.0
libtpu: 0.0.40
codegen_flags: <defaults>
</compile_context>

<pallas_src>
import functools

import jax
import jax.numpy as jnp
import numpy as np
from jax.experimental import pallas as pl
from jax.experimental.pallas import tpu as pltpu

EPS = 1e-5  # PyTorch InstanceNorm2d default eps


# ---------------------------------------------------------------------------
# In-kernel 3x3 conv helper (reflect along W; vertical context is in `win`).
# ---------------------------------------------------------------------------
def _conv3x3_reflect_w(win, w_stk, bias):
    """win: (R+2, W, C) bf16; w_stk: (3, C, 3C) bf16; bias: (1, C) f32.

    Returns f32 (R, W, C).  Each vertical tap dh is ONE bf16 MXU matmul against
    the dw-stacked (C, 3C) weights; the horizontal taps + W reflect are applied
    once on the f32 accumulators via XLU rolls + an iota/where boundary fix.
    """
    R = win.shape[0] - 2
    _, W, C = win.shape

    acc = None
    for dh in range(3):
        patch = win[dh:dh + R].reshape(R * W, C)     # leading-axis slice: free
        y = jnp.dot(patch, w_stk[dh], preferred_element_type=jnp.float32)
        acc = y if acc is None else acc + y          # (R*W, 3C) f32

    s0 = acc[:, 0 * C:1 * C]   # dw = -1 accumulator
    s1 = acc[:, 1 * C:2 * C]   # dw =  0
    s2 = acc[:, 2 * C:3 * C]   # dw = +1

    # Shift along W by rotating the flat (R*W, C) arrays one sublane; the rows
    # that wrap land in column 0 / W-1, which the reflect fix overwrites.
    left = pltpu.roll(s0, 1, axis=0).reshape(R, W, C)             # s0[:, j-1]
    right = pltpu.roll(s2, R * W - 1, axis=0).reshape(R, W, C)    # s2[:, j+1]
    s0 = s0.reshape(R, W, C)
    s1 = s1.reshape(R, W, C)
    s2 = s2.reshape(R, W, C)

    col = jax.lax.broadcasted_iota(jnp.int32, (R, W, C), 1)
    left = jnp.where(col == 0, s0[:, 1:2, :], left)               # out[:,0] uses s0[:,1]
    right = jnp.where(col == W - 1, s2[:, W - 2:W - 1, :], right)  # out[:,W-1] uses s2[:,W-2]
    return left + s1 + right + bias


# ---------------------------------------------------------------------------
# Phase 1: per-strip conv1 -> Swish -> conv2 + InstanceNorm partial stats.
# ---------------------------------------------------------------------------
def _phase1_kernel(x0_ref, x1_ref, w1_ref, b1_ref, w2_ref, b2_ref,
                   h_ref, stats_ref, z_ref):
    SH, W, C = x0_ref.shape
    s = pl.program_id(1)
    ns = pl.num_programs(1)

    # Halo'd window: rows [a, a+SH+4) of the reflect-padded image, stitched
    # from two consecutive SH-row blocks (aligned leading-axis concat).
    win = jnp.concatenate([x0_ref[...], x1_ref[0:4]], axis=0)   # (SH+4, W, C) bf16

    b1 = b1_ref[...].astype(jnp.float32)
    b2 = b2_ref[...].astype(jnp.float32)

    # conv1 over formal output rows [a-1, a+SH+1).  Rows 0 / SH+1 are junk
    # when this strip touches the top / bottom of the image; they are replaced
    # below by the rows conv2's reflect padding actually needs.
    h1 = _conv3x3_reflect_w(win, w1_ref[...], b1)               # (SH+2, W, C) f32

    # Swish in bf16 (conv2 consumes bf16 anyway).  TODO(synk): f32 on v5e.
    a = h1.astype(jnp.bfloat16)
    z_ref[...] = a * jax.nn.sigmoid(a)

    @pl.when(s == 0)
    def _():                      # row "above" image row 0 is image row 1
        z_ref[0, :, :] = z_ref[2, :, :]

    @pl.when(s == ns - 1)
    def _():                      # row "below" image row H-1 is image row H-2
        z_ref[SH + 1, :, :] = z_ref[SH - 1, :, :]

    h2 = _conv3x3_reflect_w(z_ref[...], w2_ref[...], b2)        # (SH, W, C) f32
    h_ref[...] = h2

    # Single-pass InstanceNorm partials: per-channel sum and sum-of-squares.
    h2f = h2.reshape(SH * W, C)
    s_sum = jnp.sum(h2f, axis=0, keepdims=True)                 # (1, C)
    s_sq = jnp.sum(h2f * h2f, axis=0, keepdims=True)            # (1, C)
    stats_ref[...] = jnp.concatenate([s_sum, s_sq], axis=0)     # (2, C)


# ---------------------------------------------------------------------------
# Phase 2: cross-strip stats -> normalize + residual.
# ---------------------------------------------------------------------------
def _phase2_kernel(x_ref, h_ref, stats_ref, o_ref):
    SH, W, C = h_ref.shape
    ns = stats_ref.shape[0]
    n_pix = ns * SH * W                                   # = H * W

    tot = jnp.sum(stats_ref[...], axis=0)                 # (2, C) f32
    mean = tot[0:1, :] / n_pix                            # (1, C)
    var = jnp.maximum(tot[1:2, :] / n_pix - mean * mean, 0.0)
    inv_std = jax.lax.rsqrt(var + EPS)                    # (1, C)

    o_ref[...] = (x_ref[...] +
                  (h_ref[...] - mean) * inv_std).astype(o_ref.dtype)


# ---------------------------------------------------------------------------
# Wrapper: strip sizing, padding, the two pallas_calls.
# ---------------------------------------------------------------------------
def _pick_strip_h(H, W, C, budget_bytes=40 * 2**20):
    """Largest divisor of H (>= 4) whose per-strip live set fits the budget."""
    divs = [d for d in range(4, H + 1) if H % d == 0]
    if not divs:
        raise ValueError("H needs a divisor >= 4 for strip tiling")
    weight_bytes = 2 * 9 * C * C * 2              # both convs, bf16, single-buffered
    per_row = W * C * 72                          # bf16 windows + f32 accumulators (rough)
    budget = max(budget_bytes - weight_bytes, 4 * per_row)
    fitting = [d for d in divs if (d + 4) * per_row <= budget]
    return max(fitting) if fitting else min(divs)


def resnet_block_pallas(x_nhwc, w1_stk, b1, w2_stk, b2, *, strip_h=None):
    N, H, W, C = x_nhwc.shape
    if H < 3 or W < 2:
        raise ValueError("reflect padding here needs H >= 3 and W >= 2")
    SH = _pick_strip_h(H, W, C) if strip_h is None else strip_h
    if H % SH or SH < 4:
        raise ValueError("strip_h must divide H and be >= 4")
    ns = H // SH

    # Reflect-pad along H by 2 once (bf16): rows 1..H+2 are exactly conv1's
    # reflect-1 padded input; rows 0 / H+3 only feed discarded "formal" rows.
    x_bf = x_nhwc.astype(jnp.bfloat16)
    x_pad = jnp.pad(x_bf, ((0, 0), (2, 2), (0, 0), (0, 0)), mode="reflect")
    # Bottom-pad so the H axis holds ns+1 strips of SH rows: the halo window of
    # strip s is (block s) + first 4 rows of (block s+1) -- two plain,
    # auto-pipelined BlockSpec blocks, no overlapping specs / manual DMA.
    x_pad = jnp.pad(x_pad, ((0, 0), (0, (ns + 1) * SH - (H + 4)), (0, 0), (0, 0)))

    flops1 = N * 9 * 2 * C * C * W * (2 * H + 2 * ns)
    bytes1 = (2 * N * (H + 4 * ns) * W * C * 2 + N * H * W * C * 4
              + 2 * 3 * C * 3 * C * 2 + N * ns * 2 * C * 4)

    h, stats = pl.pallas_call(
        _phase1_kernel,
        out_shape=(jax.ShapeDtypeStruct((N, H, W, C), jnp.float32),
                   jax.ShapeDtypeStruct((N, ns, 2, C), jnp.float32)),
        grid=(N, ns),
        in_specs=[
            pl.BlockSpec((None, SH, W, C), lambda n, s: (n, s, 0, 0)),
            pl.BlockSpec((None, SH, W, C), lambda n, s: (n, s + 1, 0, 0)),
            pl.BlockSpec((3, C, 3 * C), lambda n, s: (0, 0, 0),
                         pipeline_mode=pl.Buffered(1)),
            pl.BlockSpec((1, C), lambda n, s: (0, 0),
                         pipeline_mode=pl.Buffered(1)),
            pl.BlockSpec((3, C, 3 * C), lambda n, s: (0, 0, 0),
                         pipeline_mode=pl.Buffered(1)),
            pl.BlockSpec((1, C), lambda n, s: (0, 0),
                         pipeline_mode=pl.Buffered(1)),
        ],
        out_specs=(
            pl.BlockSpec((None, SH, W, C), lambda n, s: (n, s, 0, 0)),
            pl.BlockSpec((None, None, 2, C), lambda n, s: (n, s, 0, 0)),
        ),
        scratch_shapes=[pltpu.VMEM((SH + 2, W, C), jnp.bfloat16)],
        compiler_params=pltpu.CompilerParams(
            dimension_semantics=("parallel", "parallel"),
            vmem_limit_bytes=64 * 1024 * 1024),
        cost_estimate=pl.CostEstimate(
            flops=flops1, transcendentals=N * (H + 2 * ns) * W * C,
            bytes_accessed=bytes1),
    )(x_pad, x_pad, w1_stk, b1, w2_stk, b2)

    out = pl.pallas_call(
        _phase2_kernel,
        out_shape=jax.ShapeDtypeStruct((N, H, W, C), x_nhwc.dtype),
        grid=(N, ns),
        in_specs=[
            pl.BlockSpec((None, SH, W, C), lambda n, s: (n, s, 0, 0)),
            pl.BlockSpec((None, SH, W, C), lambda n, s: (n, s, 0, 0)),
            pl.BlockSpec((None, ns, 2, C), lambda n, s: (n, 0, 0, 0)),
        ],
        out_specs=pl.BlockSpec((None, SH, W, C), lambda n, s: (n, s, 0, 0)),
        compiler_params=pltpu.CompilerParams(
            dimension_semantics=("parallel", "parallel"),
            vmem_limit_bytes=64 * 1024 * 1024),
        cost_estimate=pl.CostEstimate(
            flops=4 * N * H * W * C, transcendentals=N * ns * C,
            bytes_accessed=3 * N * H * W * C * 4),
    )(x_nhwc, h, stats)
    return out


# ---------------------------------------------------------------------------
# Parameter setup (runs ONCE): spectral norm, tap-fused layout, bf16 cast.
# ---------------------------------------------------------------------------
def spectral_normalize(w_oihw):
    # sigma_max of weight viewed as (Cout, Cin*Kh*Kw), as spectral_norm does
    # (converged value of PyTorch's power iteration).
    m = w_oihw.reshape(w_oihw.shape[0], -1)
    sigma = jnp.linalg.svd(m, compute_uv=False)[0]
    return w_oihw / sigma


def torch_weight_to_stacked(w_oihw):
    """(Cout, Cin, 3, 3) -> (3, Cin, 3*Cout) with [dh][cin, dw*Cout + cout]."""
    c_out, c_in = w_oihw.shape[0], w_oihw.shape[1]
    w = jnp.transpose(w_oihw, (2, 1, 3, 0))          # (dh, cin, dw, cout)
    return w.reshape(3, c_in, 3 * c_out)


def prepare_params(w1_oihw, b1, w2_oihw, b2):
    w1_sn = spectral_normalize(w1_oihw)
    w2_sn = spectral_normalize(w2_oihw)
    kernel_params = (
        torch_weight_to_stacked(w1_sn).astype(jnp.bfloat16),
        b1.reshape(1, -1).astype(jnp.float32),
        torch_weight_to_stacked(w2_sn).astype(jnp.bfloat16),
        b2.reshape(1, -1).astype(jnp.float32),
    )
    return kernel_params, (w1_sn, w2_sn)


@functools.partial(jax.jit, static_argnames=("strip_h",))
def resnet_block_forward(x_nchw, w1k, b1k, w2k, b2k, *, strip_h=None):
    x_nhwc = jnp.transpose(x_nchw, (0, 2, 3, 1))
    out_nhwc = resnet_block_pallas(x_nhwc, w1k, b1k, w2k, b2k, strip_h=strip_h)
    return jnp.transpose(out_nhwc, (0, 3, 1, 2))


# ---------------------------------------------------------------------------
# Pure-JAX reference (verification only), matching the kernel's numerics:
# bf16 conv operands, bf16 Swish, f32 accumulation / InstanceNorm / residual.
# ---------------------------------------------------------------------------
def resnet_block_ref(x_nchw, w1_sn, b1, w2_sn, b2):
    def conv(a_bf16, w, b):
        a = jnp.pad(a_bf16, ((0, 0), (0, 0), (1, 1), (1, 1)), mode="reflect")
        y = jax.lax.conv_general_dilated(
            a, w.astype(jnp.bfloat16), (1, 1), "VALID",
            dimension_numbers=("NCHW", "OIHW", "NCHW"),
            preferred_element_type=jnp.float32)
        return y + b.reshape(1, -1, 1, 1)

    h = conv(x_nchw.astype(jnp.bfloat16), w1_sn, b1)
    a = h.astype(jnp.bfloat16)
    h = conv(a * jax.nn.sigmoid(a), w2_sn, b2)
    mean = jnp.mean(h, axis=(2, 3), keepdims=True)
    var = jnp.mean((h - mean) ** 2, axis=(2, 3), keepdims=True)
    return x_nchw + (h - mean) * jax.lax.rsqrt(var + EPS)


if __name__ == "__main__":
    key = jax.random.PRNGKey(0)
    k_x, k_w1, k_b1, k_w2, k_b2 = jax.random.split(key, 5)

    # dim=4 toy config (production C should be a multiple of 128 for lane-dense
    # vregs / MXU utilization).
    N, C, H, W = 2, 4, 16, 16
    x = jax.random.normal(k_x, (N, C, H, W), jnp.float32)

    w1 = jax.random.normal(k_w1, (C, C, 3, 3), jnp.float32) * 0.2
    b1 = jax.random.normal(k_b1, (C,), jnp.float32) * 0.1
    w2 = jax.random.normal(k_w2, (C, C, 3, 3), jnp.float32) * 0.2
    b2 = jax.random.normal(k_b2, (C,), jnp.float32) * 0.1

    kparams, (w1_sn, w2_sn) = prepare_params(w1, b1, w2, b2)

    # strip_h=8 -> two H-strips per image: exercises the halo windows, the
    # boundary-row fixes at both image edges, and the cross-strip InstanceNorm.
    out = resnet_block_forward(x, *kparams, strip_h=8)
    jax.block_until_ready(out)

    ref = resnet_block_ref(x, w1_sn, b1, w2_sn, b2)
    np.testing.assert_allclose(np.asarray(out), np.asarray(ref),
                               rtol=1e-2, atol=1e-2)

    print("KERNEL_OK")
</pallas_src>

<mosaic_0001>
module attributes {stable_mosaic.version = 11 : i64} {
  func.func @_phase1_kernel(%arg0: i32, %arg1: i32, %arg2: memref<1x8x16x4xbf16, #tpu.memory_space<vmem>>, %arg3: memref<1x8x16x4xbf16, #tpu.memory_space<vmem>>, %arg4: memref<3x4x12xbf16, #tpu.memory_space<vmem>>, %arg5: memref<1x4xf32, #tpu.memory_space<vmem>>, %arg6: memref<3x4x12xbf16, #tpu.memory_space<vmem>>, %arg7: memref<1x4xf32, #tpu.memory_space<vmem>>, %arg8: memref<1x8x16x4xf32, #tpu.memory_space<vmem>>, %arg9: memref<1x1x2x4xf32, #tpu.memory_space<vmem>>, %arg10: memref<10x16x4xbf16, #tpu.memory_space<vmem>>) attributes {dimension_semantics = [#tpu.dimension_semantics<parallel>, #tpu.dimension_semantics<parallel>], iteration_bounds = array<i64: 2, 2>, scalar_prefetch = 0 : i64, scratch_operands = 1 : i64, tpu.core_type = #tpu.core_type<tc>, window_params = [{transform_indices = @transform_0, window_bounds = array<i64: 1, 8, 16, 4>}, {transform_indices = @transform_1, window_bounds = array<i64: 1, 8, 16, 4>}, {pipeline_mode = #tpu.pipeline_mode<synchronous>, transform_indices = @transform_2, window_bounds = array<i64: 3, 4, 12>}, {pipeline_mode = #tpu.pipeline_mode<synchronous>, transform_indices = @transform_3, window_bounds = array<i64: 1, 4>}, {pipeline_mode = #tpu.pipeline_mode<synchronous>, transform_indices = @transform_4, window_bounds = array<i64: 3, 4, 12>}, {pipeline_mode = #tpu.pipeline_mode<synchronous>, transform_indices = @transform_5, window_bounds = array<i64: 1, 4>}, {transform_indices = @transform_6, window_bounds = array<i64: 1, 8, 16, 4>}, {transform_indices = @transform_7, window_bounds = array<i64: 1, 1, 2, 4>}]} {
    %c0 = arith.constant 0 : index
    %c0_0 = arith.constant 0 : index
    %c0_1 = arith.constant 0 : index
    %c0_2 = arith.constant 0 : index
    %0 = vector.load %arg2[%c0, %c0_0, %c0_1, %c0_2] : memref<1x8x16x4xbf16, #tpu.memory_space<vmem>>, vector<1x8x16x4xbf16>
    %1 = vector.shape_cast %0 : vector<1x8x16x4xbf16> to vector<8x16x4xbf16>
    %c0_3 = arith.constant 0 : index
    %c0_4 = arith.constant 0 : index
    %c0_5 = arith.constant 0 : index
    %c0_6 = arith.constant 0 : index
    %2 = vector.load %arg3[%c0_3, %c0_4, %c0_5, %c0_6] : memref<1x8x16x4xbf16, #tpu.memory_space<vmem>>, vector<1x4x16x4xbf16>
    %3 = vector.shape_cast %2 : vector<1x4x16x4xbf16> to vector<4x16x4xbf16>
    %4 = tpu.concatenate %1, %3 in 0 : vector<8x16x4xbf16>, vector<4x16x4xbf16> -> vector<12x16x4xbf16>
    %c0_7 = arith.constant 0 : index
    %c0_8 = arith.constant 0 : index
    %5 = vector.load %arg5[%c0_7, %c0_8] : memref<1x4xf32, #tpu.memory_space<vmem>>, vector<1x4xf32>
    %c0_9 = arith.constant 0 : index
    %c0_10 = arith.constant 0 : index
    %6 = vector.load %arg7[%c0_9, %c0_10] : memref<1x4xf32, #tpu.memory_space<vmem>>, vector<1x4xf32>
    %c0_11 = arith.constant 0 : index
    %c0_12 = arith.constant 0 : index
    %c0_13 = arith.constant 0 : index
    %7 = vector.load %arg4[%c0_11, %c0_12, %c0_13] : memref<3x4x12xbf16, #tpu.memory_space<vmem>>, vector<3x4x12xbf16>
    %8 = vector.extract_strided_slice %4 {offsets = [0, 0, 0], sizes = [10, 16, 4], strides = [1, 1, 1]} : vector<12x16x4xbf16> to vector<10x16x4xbf16>
    %9 = vector.shape_cast %8 : vector<10x16x4xbf16> to vector<160x4xbf16>
    %10 = vector.extract_strided_slice %7 {offsets = [0, 0, 0], sizes = [1, 4, 12], strides = [1, 1, 1]} : vector<3x4x12xbf16> to vector<1x4x12xbf16>
    %11 = vector.shape_cast %10 : vector<1x4x12xbf16> to vector<4x12xbf16>
    %cst = arith.constant dense<0.000000e+00> : vector<160x12xf32>
    %12 = tpu.matmul %9, %11, %cst {dimension_numbers = #tpu.dot_dimension_numbers<[1], [0], [0], [1], [0, 0, 1, 1], [], []>} : vector<160x4xbf16>, vector<4x12xbf16>, vector<160x12xf32> -> vector<160x12xf32>
    %13 = vector.extract_strided_slice %4 {offsets = [1, 0, 0], sizes = [10, 16, 4], strides = [1, 1, 1]} : vector<12x16x4xbf16> to vector<10x16x4xbf16>
    %14 = vector.shape_cast %13 : vector<10x16x4xbf16> to vector<160x4xbf16>
    %15 = vector.extract_strided_slice %7 {offsets = [1, 0, 0], sizes = [1, 4, 12], strides = [1, 1, 1]} : vector<3x4x12xbf16> to vector<1x4x12xbf16>
    %16 = vector.shape_cast %15 : vector<1x4x12xbf16> to vector<4x12xbf16>
    %cst_14 = arith.constant dense<0.000000e+00> : vector<160x12xf32>
    %17 = tpu.matmul %14, %16, %cst_14 {dimension_numbers = #tpu.dot_dimension_numbers<[1], [0], [0], [1], [0, 0, 1, 1], [], []>} : vector<160x4xbf16>, vector<4x12xbf16>, vector<160x12xf32> -> vector<160x12xf32>
    %18 = arith.addf %12, %17 : vector<160x12xf32>
    %19 = vector.extract_strided_slice %4 {offsets = [2, 0, 0], sizes = [10, 16, 4], strides = [1, 1, 1]} : vector<12x16x4xbf16> to vector<10x16x4xbf16>
    %20 = vector.shape_cast %19 : vector<10x16x4xbf16> to vector<160x4xbf16>
    %21 = vector.extract_strided_slice %7 {offsets = [2, 0, 0], sizes = [1, 4, 12], strides = [1, 1, 1]} : vector<3x4x12xbf16> to vector<1x4x12xbf16>
    %22 = vector.shape_cast %21 : vector<1x4x12xbf16> to vector<4x12xbf16>
    %cst_15 = arith.constant dense<0.000000e+00> : vector<160x12xf32>
    %23 = tpu.matmul %20, %22, %cst_15 {dimension_numbers = #tpu.dot_dimension_numbers<[1], [0], [0], [1], [0, 0, 1, 1], [], []>} : vector<160x4xbf16>, vector<4x12xbf16>, vector<160x12xf32> -> vector<160x12xf32>
    %24 = arith.addf %18, %23 : vector<160x12xf32>
    %25 = vector.extract_strided_slice %24 {offsets = [0, 0], sizes = [160, 4], strides = [1, 1]} : vector<160x12xf32> to vector<160x4xf32>
    %26 = vector.extract_strided_slice %24 {offsets = [0, 4], sizes = [160, 4], strides = [1, 1]} : vector<160x12xf32> to vector<160x4xf32>
    %27 = vector.extract_strided_slice %24 {offsets = [0, 8], sizes = [160, 4], strides = [1, 1]} : vector<160x12xf32> to vector<160x4xf32>
    %c1_i32 = arith.constant 1 : i32
    %28 = tpu.dynamic_rotate %25 by %c1_i32 dim 0 : vector<160x4xf32>, i32 -> vector<160x4xf32>
    %29 = vector.shape_cast %28 : vector<160x4xf32> to vector<10x16x4xf32>
    %c159_i32 = arith.constant 159 : i32
    %30 = tpu.dynamic_rotate %27 by %c159_i32 dim 0 : vector<160x4xf32>, i32 -> vector<160x4xf32>
    %31 = vector.shape_cast %30 : vector<160x4xf32> to vector<10x16x4xf32>
    %32 = vector.shape_cast %25 : vector<160x4xf32> to vector<10x16x4xf32>
    %33 = vector.shape_cast %26 : vector<160x4xf32> to vector<10x16x4xf32>
    %34 = vector.shape_cast %27 : vector<160x4xf32> to vector<10x16x4xf32>
    %35 = tpu.iota {dimensions = array<i32: 1>} : vector<10x16x4xi32>
    %c0_i32 = arith.constant 0 : i32
    %36 = vector.broadcast %c0_i32 : i32 to vector<10x16x4xi32>
    %37 = arith.cmpi eq, %35, %36 : vector<10x16x4xi32>
    %38 = vector.extract_strided_slice %32 {offsets = [0, 1, 0], sizes = [10, 1, 4], strides = [1, 1, 1]} : vector<10x16x4xf32> to vector<10x1x4xf32>
    %39 = vector.shape_cast %38 : vector<10x1x4xf32> to vector<10x1x4xf32>
    %40 = vector.broadcast %39 : vector<10x1x4xf32> to vector<10x16x4xf32>
    %41 = arith.select %37, %40, %29 : vector<10x16x4xi1>, vector<10x16x4xf32>
    %c15_i32 = arith.constant 15 : i32
    %42 = vector.broadcast %c15_i32 : i32 to vector<10x16x4xi32>
    %43 = arith.cmpi eq, %35, %42 : vector<10x16x4xi32>
    %44 = vector.extract_strided_slice %34 {offsets = [0, 14, 0], sizes = [10, 1, 4], strides = [1, 1, 1]} : vector<10x16x4xf32> to vector<10x1x4xf32>
    %45 = vector.shape_cast %44 : vector<10x1x4xf32> to vector<10x1x4xf32>
    %46 = vector.broadcast %45 : vector<10x1x4xf32> to vector<10x16x4xf32>
    %47 = arith.select %43, %46, %31 : vector<10x16x4xi1>, vector<10x16x4xf32>
    %48 = arith.addf %41, %33 : vector<10x16x4xf32>
    %49 = arith.addf %48, %47 : vector<10x16x4xf32>
    %50 = vector.shape_cast %5 : vector<1x4xf32> to vector<1x1x4xf32>
    %51 = vector.broadcast %50 : vector<1x1x4xf32> to vector<10x16x4xf32>
    %52 = arith.addf %49, %51 : vector<10x16x4xf32>
    %53 = arith.truncf %52 : vector<10x16x4xf32> to vector<10x16x4xbf16>
    %54 = arith.negf %53 : vector<10x16x4xbf16>
    %55 = math.exp %54 : vector<10x16x4xbf16>
    %cst_16 = arith.constant 1.000000e+00 : bf16
    %56 = vector.broadcast %cst_16 : bf16 to vector<10x16x4xbf16>
    %57 = arith.addf %56, %55 : vector<10x16x4xbf16>
    %58 = arith.divf %56, %57 : vector<10x16x4xbf16>
    %59 = arith.mulf %53, %58 : vector<10x16x4xbf16>
    %c0_17 = arith.constant 0 : index
    %c0_18 = arith.constant 0 : index
    %c0_19 = arith.constant 0 : index
    %60 = vector.load %arg10[%c0_17, %c0_18, %c0_19] : memref<10x16x4xbf16, #tpu.memory_space<vmem>>, vector<10x16x4xbf16>
    tpu.vector_store %arg10[%c0_17, %c0_18, %c0_19], %59 {strides = array<i32>} : memref<10x16x4xbf16, #tpu.memory_space<vmem>>, vector<10x16x4xbf16>,
    %c0_i32_20 = arith.constant 0 : i32
    %61 = arith.cmpi eq, %arg1, %c0_i32_20 : i32
    %62 = arith.extui %61 : i1 to i32
    %c0_i32_21 = arith.constant 0 : i32
    %63 = arith.cmpi ne, %62, %c0_i32_21 : i32
    scf.if %63 {
      %c2 = arith.constant 2 : index
      %c0_46 = arith.constant 0 : index
      %c0_47 = arith.constant 0 : index
      %127 = vector.load %arg10[%c2, %c0_46, %c0_47] : memref<10x16x4xbf16, #tpu.memory_space<vmem>>, vector<1x16x4xbf16>
      %128 = vector.shape_cast %127 : vector<1x16x4xbf16> to vector<16x4xbf16>
      %c0_48 = arith.constant 0 : index
      %c0_49 = arith.constant 0 : index
      %c0_50 = arith.constant 0 : index
      %129 = vector.load %arg10[%c0_48, %c0_49, %c0_50] : memref<10x16x4xbf16, #tpu.memory_space<vmem>>, vector<1x16x4xbf16>
      %130 = vector.shape_cast %129 : vector<1x16x4xbf16> to vector<16x4xbf16>
      %131 = vector.shape_cast %128 : vector<16x4xbf16> to vector<1x16x4xbf16>
      tpu.vector_store %arg10[%c0_48, %c0_49, %c0_50], %131 {strides = array<i32>} : memref<10x16x4xbf16, #tpu.memory_space<vmem>>, vector<1x16x4xbf16>,
    } else {
    }
    %c1_i32_22 = arith.constant 1 : i32
    %64 = arith.cmpi eq, %arg1, %c1_i32_22 : i32
    %65 = arith.extui %64 : i1 to i32
    %c0_i32_23 = arith.constant 0 : i32
    %66 = arith.cmpi ne, %65, %c0_i32_23 : i32
    scf.if %66 {
      %c7 = arith.constant 7 : index
      %c0_46 = arith.constant 0 : index
      %c0_47 = arith.constant 0 : index
      %127 = vector.load %arg10[%c7, %c0_46, %c0_47] : memref<10x16x4xbf16, #tpu.memory_space<vmem>>, vector<1x16x4xbf16>
      %128 = vector.shape_cast %127 : vector<1x16x4xbf16> to vector<16x4xbf16>
      %c9 = arith.constant 9 : index
      %c0_48 = arith.constant 0 : index
      %c0_49 = arith.constant 0 : index
      %129 = vector.load %arg10[%c9, %c0_48, %c0_49] : memref<10x16x4xbf16, #tpu.memory_space<vmem>>, vector<1x16x4xbf16>
      %130 = vector.shape_cast %129 : vector<1x16x4xbf16> to vector<16x4xbf16>
      %131 = vector.shape_cast %128 : vector<16x4xbf16> to vector<1x16x4xbf16>
      tpu.vector_store %arg10[%c9, %c0_48, %c0_49], %131 {strides = array<i32>} : memref<10x16x4xbf16, #tpu.memory_space<vmem>>, vector<1x16x4xbf16>,
    } else {
    }
    %c0_24 = arith.constant 0 : index
    %c0_25 = arith.constant 0 : index
    %c0_26 = arith.constant 0 : index
    %67 = vector.load %arg10[%c0_24, %c0_25, %c0_26] : memref<10x16x4xbf16, #tpu.memory_space<vmem>>, vector<10x16x4xbf16>
    %c0_27 = arith.constant 0 : index
    %c0_28 = arith.constant 0 : index
    %c0_29 = arith.constant 0 : index
    %68 = vector.load %arg6[%c0_27, %c0_28, %c0_29] : memref<3x4x12xbf16, #tpu.memory_space<vmem>>, vector<3x4x12xbf16>
    %69 = vector.extract_strided_slice %67 {offsets = [0, 0, 0], sizes = [8, 16, 4], strides = [1, 1, 1]} : vector<10x16x4xbf16> to vector<8x16x4xbf16>
    %70 = vector.shape_cast %69 : vector<8x16x4xbf16> to vector<128x4xbf16>
    %71 = vector.extract_strided_slice %68 {offsets = [0, 0, 0], sizes = [1, 4, 12], strides = [1, 1, 1]} : vector<3x4x12xbf16> to vector<1x4x12xbf16>
    %72 = vector.shape_cast %71 : vector<1x4x12xbf16> to vector<4x12xbf16>
    %cst_30 = arith.constant dense<0.000000e+00> : vector<128x12xf32>
    %73 = tpu.matmul %70, %72, %cst_30 {dimension_numbers = #tpu.dot_dimension_numbers<[1], [0], [0], [1], [0, 0, 1, 1], [], []>} : vector<128x4xbf16>, vector<4x12xbf16>, vector<128x12xf32> -> vector<128x12xf32>
    %74 = vector.extract_strided_slice %67 {offsets = [1, 0, 0], sizes = [8, 16, 4], strides = [1, 1, 1]} : vector<10x16x4xbf16> to vector<8x16x4xbf16>
    %75 = vector.shape_cast %74 : vector<8x16x4xbf16> to vector<128x4xbf16>
    %76 = vector.extract_strided_slice %68 {offsets = [1, 0, 0], sizes = [1, 4, 12], strides = [1, 1, 1]} : vector<3x4x12xbf16> to vector<1x4x12xbf16>
    %77 = vector.shape_cast %76 : vector<1x4x12xbf16> to vector<4x12xbf16>
    %cst_31 = arith.constant dense<0.000000e+00> : vector<128x12xf32>
    %78 = tpu.matmul %75, %77, %cst_31 {dimension_numbers = #tpu.dot_dimension_numbers<[1], [0], [0], [1], [0, 0, 1, 1], [], []>} : vector<128x4xbf16>, vector<4x12xbf16>, vector<128x12xf32> -> vector<128x12xf32>
    %79 = arith.addf %73, %78 : vector<128x12xf32>
    %80 = vector.extract_strided_slice %67 {offsets = [2, 0, 0], sizes = [8, 16, 4], strides = [1, 1, 1]} : vector<10x16x4xbf16> to vector<8x16x4xbf16>
    %81 = vector.shape_cast %80 : vector<8x16x4xbf16> to vector<128x4xbf16>
    %82 = vector.extract_strided_slice %68 {offsets = [2, 0, 0], sizes = [1, 4, 12], strides = [1, 1, 1]} : vector<3x4x12xbf16> to vector<1x4x12xbf16>
    %83 = vector.shape_cast %82 : vector<1x4x12xbf16> to vector<4x12xbf16>
    %cst_32 = arith.constant dense<0.000000e+00> : vector<128x12xf32>
    %84 = tpu.matmul %81, %83, %cst_32 {dimension_numbers = #tpu.dot_dimension_numbers<[1], [0], [0], [1], [0, 0, 1, 1], [], []>} : vector<128x4xbf16>, vector<4x12xbf16>, vector<128x12xf32> -> vector<128x12xf32>
    %85 = arith.addf %79, %84 : vector<128x12xf32>
    %86 = vector.extract_strided_slice %85 {offsets = [0, 0], sizes = [128, 4], strides = [1, 1]} : vector<128x12xf32> to vector<128x4xf32>
    %87 = vector.extract_strided_slice %85 {offsets = [0, 4], sizes = [128, 4], strides = [1, 1]} : vector<128x12xf32> to vector<128x4xf32>
    %88 = vector.extract_strided_slice %85 {offsets = [0, 8], sizes = [128, 4], strides = [1, 1]} : vector<128x12xf32> to vector<128x4xf32>
    %c1_i32_33 = arith.constant 1 : i32
    %89 = tpu.dynamic_rotate %86 by %c1_i32_33 dim 0 : vector<128x4xf32>, i32 -> vector<128x4xf32>
    %90 = vector.shape_cast %89 : vector<128x4xf32> to vector<8x16x4xf32>
    %c127_i32 = arith.constant 127 : i32
    %91 = tpu.dynamic_rotate %88 by %c127_i32 dim 0 : vector<128x4xf32>, i32 -> vector<128x4xf32>
    %92 = vector.shape_cast %91 : vector<128x4xf32> to vector<8x16x4xf32>
    %93 = vector.shape_cast %86 : vector<128x4xf32> to vector<8x16x4xf32>
    %94 = vector.shape_cast %87 : vector<128x4xf32> to vector<8x16x4xf32>
    %95 = vector.shape_cast %88 : vector<128x4xf32> to vector<8x16x4xf32>
    %96 = tpu.iota {dimensions = array<i32: 1>} : vector<8x16x4xi32>
    %c0_i32_34 = arith.constant 0 : i32
    %97 = vector.broadcast %c0_i32_34 : i32 to vector<8x16x4xi32>
    %98 = arith.cmpi eq, %96, %97 : vector<8x16x4xi32>
    %99 = vector.extract_strided_slice %93 {offsets = [0, 1, 0], sizes = [8, 1, 4], strides = [1, 1, 1]} : vector<8x16x4xf32> to vector<8x1x4xf32>
    %100 = vector.shape_cast %99 : vector<8x1x4xf32> to vector<8x1x4xf32>
    %101 = vector.broadcast %100 : vector<8x1x4xf32> to vector<8x16x4xf32>
    %102 = arith.select %98, %101, %90 : vector<8x16x4xi1>, vector<8x16x4xf32>
    %c15_i32_35 = arith.constant 15 : i32
    %103 = vector.broadcast %c15_i32_35 : i32 to vector<8x16x4xi32>
    %104 = arith.cmpi eq, %96, %103 : vector<8x16x4xi32>
    %105 = vector.extract_strided_slice %95 {offsets = [0, 14, 0], sizes = [8, 1, 4], strides = [1, 1, 1]} : vector<8x16x4xf32> to vector<8x1x4xf32>
    %106 = vector.shape_cast %105 : vector<8x1x4xf32> to vector<8x1x4xf32>
    %107 = vector.broadcast %106 : vector<8x1x4xf32> to vector<8x16x4xf32>
    %108 = arith.select %104, %107, %92 : vector<8x16x4xi1>, vector<8x16x4xf32>
    %109 = arith.addf %102, %94 : vector<8x16x4xf32>
    %110 = arith.addf %109, %108 : vector<8x16x4xf32>
    %111 = vector.shape_cast %6 : vector<1x4xf32> to vector<1x1x4xf32>
    %112 = vector.broadcast %111 : vector<1x1x4xf32> to vector<8x16x4xf32>
    %113 = arith.addf %110, %112 : vector<8x16x4xf32>
    %c0_36 = arith.constant 0 : index
    %c0_37 = arith.constant 0 : index
    %c0_38 = arith.constant 0 : index
    %c0_39 = arith.constant 0 : index
    %114 = vector.load %arg8[%c0_36, %c0_37, %c0_38, %c0_39] : memref<1x8x16x4xf32, #tpu.memory_space<vmem>>, vector<1x8x16x4xf32>
    %115 = vector.shape_cast %114 : vector<1x8x16x4xf32> to vector<8x16x4xf32>
    %116 = vector.shape_cast %113 : vector<8x16x4xf32> to vector<1x8x16x4xf32>
    tpu.vector_store %arg8[%c0_36, %c0_37, %c0_38, %c0_39], %116 {strides = array<i32>} : memref<1x8x16x4xf32, #tpu.memory_space<vmem>>, vector<1x8x16x4xf32>,
    %117 = vector.shape_cast %113 : vector<8x16x4xf32> to vector<128x4xf32>
    %cst_40 = arith.constant dense<0.000000e+00> : vector<4xf32>
    %118 = vector.multi_reduction <add>, %117, %cst_40 [0] : vector<128x4xf32> to vector<4xf32>
    %119 = vector.shape_cast %118 : vector<4xf32> to vector<1x4xf32>
    %120 = arith.mulf %117, %117 : vector<128x4xf32>
    %cst_41 = arith.constant dense<0.000000e+00> : vector<4xf32>
    %121 = vector.multi_reduction <add>, %120, %cst_41 [0] : vector<128x4xf32> to vector<4xf32>
    %122 = vector.shape_cast %121 : vector<4xf32> to vector<1x4xf32>
    %123 = tpu.concatenate %119, %122 in 0 : vector<1x4xf32>, vector<1x4xf32> -> vector<2x4xf32>
    %c0_42 = arith.constant 0 : index
    %c0_43 = arith.constant 0 : index
    %c0_44 = arith.constant 0 : index
    %c0_45 = arith.constant 0 : index
    %124 = vector.load %arg9[%c0_42, %c0_43, %c0_44, %c0_45] : memref<1x1x2x4xf32, #tpu.memory_space<vmem>>, vector<1x1x2x4xf32>
    %125 = vector.shape_cast %124 : vector<1x1x2x4xf32> to vector<2x4xf32>
    %126 = vector.shape_cast %123 : vector<2x4xf32> to vector<1x1x2x4xf32>
    tpu.vector_store %arg9[%c0_42, %c0_43, %c0_44, %c0_45], %126 {strides = array<i32>} : memref<1x1x2x4xf32, #tpu.memory_space<vmem>>, vector<1x1x2x4xf32>,
    return
  }
  func.func @transform_0(%arg0: i32, %arg1: i32) -> (i32, i32, i32, i32) {
    %c0_i32 = arith.constant 0 : i32
    %c0_i32_0 = arith.constant 0 : i32
    %c0_i32_1 = arith.constant 0 : i32
    return %arg0, %arg1, %c0_i32, %c0_i32_0 : i32, i32, i32, i32
  }
  func.func @transform_1(%arg0: i32, %arg1: i32) -> (i32, i32, i32, i32) {
    %c1_i32 = arith.constant 1 : i32
    %0 = arith.addi %arg1, %c1_i32 : i32
    %c0_i32 = arith.constant 0 : i32
    %c0_i32_0 = arith.constant 0 : i32
    %c0_i32_1 = arith.constant 0 : i32
    return %arg0, %0, %c0_i32, %c0_i32_0 : i32, i32, i32, i32
  }
  func.func @transform_2(%arg0: i32, %arg1: i32) -> (i32, i32, i32) {
    %c0_i32 = arith.constant 0 : i32
    %c0_i32_0 = arith.constant 0 : i32
    %c0_i32_1 = arith.constant 0 : i32
    %c0_i32_2 = arith.constant 0 : i32
    return %c0_i32, %c0_i32_0, %c0_i32_1 : i32, i32, i32
  }
  func.func @transform_3(%arg0: i32, %arg1: i32) -> (i32, i32) {
    %c0_i32 = arith.constant 0 : i32
    %c0_i32_0 = arith.constant 0 : i32
    %c0_i32_1 = arith.constant 0 : i32
    return %c0_i32, %c0_i32_0 : i32, i32
  }
  func.func @transform_4(%arg0: i32, %arg1: i32) -> (i32, i32, i32) {
    %c0_i32 = arith.constant 0 : i32
    %c0_i32_0 = arith.constant 0 : i32
    %c0_i32_1 = arith.constant 0 : i32
    %c0_i32_2 = arith.constant 0 : i32
    return %c0_i32, %c0_i32_0, %c0_i32_1 : i32, i32, i32
  }
  func.func @transform_5(%arg0: i32, %arg1: i32) -> (i32, i32) {
    %c0_i32 = arith.constant 0 : i32
    %c0_i32_0 = arith.constant 0 : i32
    %c0_i32_1 = arith.constant 0 : i32
    return %c0_i32, %c0_i32_0 : i32, i32
  }
  func.func @transform_6(%arg0: i32, %arg1: i32) -> (i32, i32, i32, i32) {
    %c0_i32 = arith.constant 0 : i32
    %c0_i32_0 = arith.constant 0 : i32
    %c0_i32_1 = arith.constant 0 : i32
    return %arg0, %arg1, %c0_i32, %c0_i32_0 : i32, i32, i32, i32
  }
  func.func @transform_7(%arg0: i32, %arg1: i32) -> (i32, i32, i32, i32) {
    %c0_i32 = arith.constant 0 : i32
    %c0_i32_0 = arith.constant 0 : i32
    %c0_i32_1 = arith.constant 0 : i32
    return %arg0, %arg1, %c0_i32, %c0_i32_0 : i32, i32, i32, i32
  }
}

module attributes {stable_mosaic.version = 11 : i64} {
  func.func @_phase2_kernel(%arg0: i32, %arg1: i32, %arg2: memref<1x8x16x4xf32, #tpu.memory_space<vmem>>, %arg3: memref<1x8x16x4xf32, #tpu.memory_space<vmem>>, %arg4: memref<1x2x2x4xf32, #tpu.memory_space<vmem>>, %arg5: memref<1x8x16x4xf32, #tpu.memory_space<vmem>>) attributes {dimension_semantics = [#tpu.dimension_semantics<parallel>, #tpu.dimension_semantics<parallel>], iteration_bounds = array<i64: 2, 2>, scalar_prefetch = 0 : i64, scratch_operands = 0 : i64, tpu.core_type = #tpu.core_type<tc>, window_params = [{transform_indices = @transform_0, window_bounds = array<i64: 1, 8, 16, 4>}, {transform_indices = @transform_1, window_bounds = array<i64: 1, 8, 16, 4>}, {transform_indices = @transform_2, window_bounds = array<i64: 1, 2, 2, 4>}, {transform_indices = @transform_3, window_bounds = array<i64: 1, 8, 16, 4>}]} {
    %c0 = arith.constant 0 : index
    %c0_0 = arith.constant 0 : index
    %c0_1 = arith.constant 0 : index
    %c0_2 = arith.constant 0 : index
    %0 = vector.load %arg4[%c0, %c0_0, %c0_1, %c0_2] : memref<1x2x2x4xf32, #tpu.memory_space<vmem>>, vector<1x2x2x4xf32>
    %1 = vector.shape_cast %0 : vector<1x2x2x4xf32> to vector<2x2x4xf32>
    %cst = arith.constant dense<0.000000e+00> : vector<2x4xf32>
    %2 = vector.multi_reduction <add>, %1, %cst [0] : vector<2x2x4xf32> to vector<2x4xf32>
    %3 = vector.extract_strided_slice %2 {offsets = [0, 0], sizes = [1, 4], strides = [1, 1]} : vector<2x4xf32> to vector<1x4xf32>
    %cst_3 = arith.constant 2.560000e+02 : f32
    %4 = vector.broadcast %cst_3 : f32 to vector<1x4xf32>
    %5 = arith.divf %3, %4 : vector<1x4xf32>
    %6 = vector.extract_strided_slice %2 {offsets = [1, 0], sizes = [1, 4], strides = [1, 1]} : vector<2x4xf32> to vector<1x4xf32>
    %cst_4 = arith.constant 2.560000e+02 : f32
    %7 = vector.broadcast %cst_4 : f32 to vector<1x4xf32>
    %8 = arith.divf %6, %7 : vector<1x4xf32>
    %9 = arith.mulf %5, %5 : vector<1x4xf32>
    %10 = arith.subf %8, %9 : vector<1x4xf32>
    %cst_5 = arith.constant 0.000000e+00 : f32
    %11 = vector.broadcast %cst_5 : f32 to vector<1x4xf32>
    %12 = arith.maximumf %10, %11 : vector<1x4xf32>
    %cst_6 = arith.constant 9.99999974E-6 : f32
    %13 = vector.broadcast %cst_6 : f32 to vector<1x4xf32>
    %14 = arith.addf %12, %13 : vector<1x4xf32>
    %15 = math.rsqrt %14 : vector<1x4xf32>
    %c0_7 = arith.constant 0 : index
    %c0_8 = arith.constant 0 : index
    %c0_9 = arith.constant 0 : index
    %c0_10 = arith.constant 0 : index
    %16 = vector.load %arg2[%c0_7, %c0_8, %c0_9, %c0_10] : memref<1x8x16x4xf32, #tpu.memory_space<vmem>>, vector<1x8x16x4xf32>
    %17 = vector.shape_cast %16 : vector<1x8x16x4xf32> to vector<8x16x4xf32>
    %c0_11 = arith.constant 0 : index
    %c0_12 = arith.constant 0 : index
    %c0_13 = arith.constant 0 : index
    %c0_14 = arith.constant 0 : index
    %18 = vector.load %arg3[%c0_11, %c0_12, %c0_13, %c0_14] : memref<1x8x16x4xf32, #tpu.memory_space<vmem>>, vector<1x8x16x4xf32>
    %19 = vector.shape_cast %18 : vector<1x8x16x4xf32> to vector<8x16x4xf32>
    %20 = vector.shape_cast %5 : vector<1x4xf32> to vector<1x1x4xf32>
    %21 = vector.broadcast %20 : vector<1x1x4xf32> to vector<8x16x4xf32>
    %22 = arith.subf %19, %21 : vector<8x16x4xf32>
    %23 = vector.shape_cast %15 : vector<1x4xf32> to vector<1x1x4xf32>
    %24 = vector.broadcast %23 : vector<1x1x4xf32> to vector<8x16x4xf32>
    %25 = arith.mulf %22, %24 : vector<8x16x4xf32>
    %26 = arith.addf %17, %25 : vector<8x16x4xf32>
    %c0_15 = arith.constant 0 : index
    %c0_16 = arith.constant 0 : index
    %c0_17 = arith.constant 0 : index
    %c0_18 = arith.constant 0 : index
    %27 = vector.load %arg5[%c0_15, %c0_16, %c0_17, %c0_18] : memref<1x8x16x4xf32, #tpu.memory_space<vmem>>, vector<1x8x16x4xf32>
    %28 = vector.shape_cast %27 : vector<1x8x16x4xf32> to vector<8x16x4xf32>
    %29 = vector.shape_cast %26 : vector<8x16x4xf32> to vector<1x8x16x4xf32>
    tpu.vector_store %arg5[%c0_15, %c0_16, %c0_17, %c0_18], %29 {strides = array<i32>} : memref<1x8x16x4xf32, #tpu.memory_space<vmem>>, vector<1x8x16x4xf32>,
    return
  }
  func.func @transform_0(%arg0: i32, %arg1: i32) -> (i32, i32, i32, i32) {
    %c0_i32 = arith.constant 0 : i32
    %c0_i32_0 = arith.constant 0 : i32
    %c0_i32_1 = arith.constant 0 : i32
    return %arg0, %arg1, %c0_i32, %c0_i32_0 : i32, i32, i32, i32
  }
  func.func @transform_1(%arg0: i32, %arg1: i32) -> (i32, i32, i32, i32) {
    %c0_i32 = arith.constant 0 : i32
    %c0_i32_0 = arith.constant 0 : i32
    %c0_i32_1 = arith.constant 0 : i32
    return %arg0, %arg1, %c0_i32, %c0_i32_0 : i32, i32, i32, i32
  }
  func.func @transform_2(%arg0: i32, %arg1: i32) -> (i32, i32, i32, i32) {
    %c0_i32 = arith.constant 0 : i32
    %c0_i32_0 = arith.constant 0 : i32
    %c0_i32_1 = arith.constant 0 : i32
    %c0_i32_2 = arith.constant 0 : i32
    return %arg0, %c0_i32, %c0_i32_0, %c0_i32_1 : i32, i32, i32, i32
  }
  func.func @transform_3(%arg0: i32, %arg1: i32) -> (i32, i32, i32, i32) {
    %c0_i32 = arith.constant 0 : i32
    %c0_i32_0 = arith.constant 0 : i32
    %c0_i32_1 = arith.constant 0 : i32
    return %arg0, %arg1, %c0_i32, %c0_i32_0 : i32, i32, i32, i32
  }
}

</mosaic_0001>

<bundles_post_ra>
// kernel: resnet_block_forward.3
= control target key start
LH: loop header
LB: loop body
LE: loop exit
PB: predicated region body
PF: predicated region fallthrough
CT: control target
= control target key end

     0   :  { %s1460_s0 = inlined_call_operand.hbm [shape: f32[2,16,16,4], index: 0, kind: input, shape index: {}]   ;;  %s1461_s1 = inlined_call_operand.hbm [shape: f32[2,16,16,4], index: 1, kind: input, shape index: {}]   ;;  %s1462_s2 = inlined_call_operand.hbm [shape: f32[2,2,2,4], index: 2, kind: input, shape index: {}]   ;;  %s1463_s3 = inlined_call_operand.hbm [shape: f32[2,16,16,4], index: 3, kind: output, shape index: {}]  }
   0x1   :  { %1479 = sst [smem:[#allocation19_spill]] %s1461_s1 }
   0x2   :  { %8 = vsyncpa [#allocation3], 0 }
   0x3   :  { %10 = vsyncpa [#allocation3 + $0x1], 0 }
   0x4   :  { %11 = vsyncpa [#allocation6], 0 }
   0x5   :  { %13 = vsyncpa [#allocation6 + $0x1], 0 }
   0x6   :  { %14 = vsyncpa [#allocation4], 0 }
   0x7   :  { %16 = vsyncpa [#allocation4 + $0x1], 0  ;;  %s972_s12 = smov 0   ;;  %s974_s13 = smov 0  }
   0x8   :  { %s976_s14 = smov 0   ;;  %s978_s15 = smov 0  }
   0x9   :  { %s980_s16 = smov 0   ;;  %s982_s17 = smov 0  }
   0xa   :  { %s984_s18 = smov 0   ;;  %s986_s19 = smov 0  }
   0xb   :  { %s988_s20 = smov 0   ;;  %s990_s21 = smov 0  }
   0xc   :  { %s992_s22 = smov 0  }
   0xd LB: > { %1480 = sst [smem:[#allocation13_spill]] %s912_s15  ;;  %s1028_s23 = sadd.s32 4294967295, %s940_s22   ;;  %s940_s22 = sphi %s992_s22, %s22_s22   ;;  %s936_s21 = sphi %s990_s21, %s1522_s21   ;;  %s932_s20 = sphi %s988_s20, %s1513_s20   ;;  %s928_s19 = sphi %s986_s19, %s1521_s19   ;;  %s924_s18 = sphi %s984_s18, %s1512_s18   ;;  %s920_s17 = sphi %s982_s17, %s1520_s17   ;;  %s916_s16 = sphi %s980_s16, %s1519_s16   ;;  %s912_s15 = sphi %s978_s15, %s1518_s15   ;;  %s908_s14 = sphi %s976_s14, %s1517_s14   ;;  %s904_s13 = sphi %s974_s13, %s1516_s13   ;;  %s900_s12 = sphi %s972_s12, %s1515_s12  }
   0xe   : > { %1481 = sst [smem:[#allocation14_spill]] %s932_s20  ;;  %s568_s24 = sadd.s32 4294967294, %s940_s22  }
   0xf   : > { %s31_s25 = sadd.s32 1, %s932_s20  ;;  %s34_s26 = sadd.s32 1, %s936_s21 }
  0x10   : > { %p32_p0 = scmp.ge.s32.totalorder %s31_s25, 2  ;;  %s43_s27 = sadd.s32 1, %s920_s17 }
  0x11   : > { %p50_p1 = scmp.ne.s32.totalorder %s920_s17, %s916_s16  ;;  %p1472_p2 = scmp.eq.s32.totalorder %s940_s22, 0 }
  0x12   : > { %s1524_s25 = smov (%p32_p0, %s31_s25), 0  ;;  %s1526_s26 = smov (!%p32_p0, %s34_s26), %s936_s21 }
  0x13   : > { %1482 = sst [smem:[#allocation15_spill]] %s1524_s25  ;;  %s39_s28 = ssub.s32 %s932_s20, %s1524_s25 }
  0x14   : > { %p1044_p3 = por %p1472_p2, %p50_p1  ;;  %p36_p4 = scmp.ge.s32.totalorder %s1526_s26, 2 }
  0x15   : > { %p56_p5 = scmp.ne.s32.totalorder %s916_s16, %s912_s15  ;;  %p1471_p6 = scmp.eq.s32.totalorder %s1028_s23, 0 }
  0x16   : > { %p136_p7 = scmp.eq.s32.totalorder %s1028_s23, 3  ;;  %s1528_s26 = smov (%p36_p4, %s1526_s26), 0 }
  0x17   : > { %1484 = sst [smem:[#allocation16_spill]] %s1528_s26  ;;  %p1056_p8 = por %p1471_p6, %p56_p5 }
  0x18   : > { %p1060_p9 = por %p136_p7, %p50_p1  ;;  %s1066_s5 = ssub.s32 %s936_s21, %s1528_s26 }
  0x19   : > { %s1485_s30 = scalar_select %p1056_p8, 1, 0 }
  0x1a   : > { %s1486_s4 = scalar_select %p1060_p9, 1, 0 }
  0x1b   : > { %p142_p10 = scmp.eq.s32.totalorder %s568_s24, 3  ;;  %s40_s6 = sor.u32 %s39_s28, %s1066_s5 }
  0x1c   : > { %p41_p12 = scmp.eq.s32.totalorder %s40_s6, 0  ;;  %p1470_p0 = scmp.lt.s32.totalorder %s940_s22, 4 }
  0x1d   : > { %p1070_p13 = por %p142_p10, %p56_p5  ;;  %s1466_s9 = sand.u32 1, %s920_s17  }
  0x1e   : > { %s1076_s8 = scalar_select %p41_p12, %s920_s17, %s43_s27  }
  0x1f   : > { %s1487_s7 = scalar_select %p1070_p13, 1, 0 }
  0x20   : > { %1489 = sst [smem:[#allocation18_spill]] %s1076_s8  ;;  %s596_s10 = sshll.u32 %s932_s20, 4 }
  0x21   : > { %1488 = sst [smem:[#allocation17_spill]] %s1487_s7  ;;  %s1082_s11 = sshll.u32 %s1466_s9, 7 }
  0x22   : > { %s574_s26 = sshll.u32 %s936_s21, 5  ;;  %p1091_p1 = pnand %p1470_p0, %p1044_p3 }
  0x23   : > { %s1085_s24 = sadd.s32 %s596_s10, %s574_s26  ;;  %s186_s6 = sand.u32 1, %s940_s22  }
  0x24   : > { %s1468_s27 = sshll.u32 %s1085_s24, 7  ;;  %s1491_s1 = sld [smem:[#allocation19_spill]] }
  0x25   : > { %s190_s26 = scalar_lea.vmem [#allocation5], %s1082_s11  ;;  %s1109_s10 = scalar_lea.sflag [#allocation6], %s186_s6 }
  0x26   : > { %s200_s29 = sshll.u32 %s190_s26, 4  ;;  %p722_p7 = pneg %p1091_p1  ;;  %s1106_s29 = int_to_ptr.vmem [resolvable:$true] %s200_s29 }
  0x2a   : > { %s1102_s20 = scalar_lea.hbm %s1491_s1, %s1468_s27  ;;  %s725_s27 = scalar_lea.hbm %s1491_s1, 8192 }
  0x2b   : > { %s720_s8 = scalar_lea.hbm %s1102_s20, 2048  ;;  %p726_p0 = scmp.lt.u32.totalorder %s1102_s20, %s1491_s1 }
  0x2c   : > { %p721_p5 = scmp.ne.s32.totalorder %s1102_s20, %s720_s8  ;;  %p727_p6 = scmp.lt.u32.totalorder %s725_s27, %s720_s8 }
  0x2d   : > { %p729_p11 = scmp.lt.u32.totalorder %s720_s8, %s1102_s20 }
  0x2e   : > { %p723_p10 = pnand %p722_p7, %p721_p5  ;;  %p728_p2 = por %p727_p6, %p726_p0 }
  0x30   : > { %p724_p12 = pneg %p723_p10  ;;  %p730_p3 = por %p729_p11, %p728_p2 }
  0x32   : > { %p731_p4 = pnand %p730_p3, %p724_p12 }
  0x34   : > { %734 = shalt.err (!%p731_p4)
}
  0x35   : > { %s735_s6 = scalar_lea.vmem %s1106_s29, 2048  ;;  %s942_s25 = smov [#allocation5]  }
  0x36   : > { %p736_p5 = scmp.ne.s32.totalorder %s1106_s29, %s735_s6  ;;  %s740_s9 = sshll.u32 %s942_s25, 4  ;;  %s741_s9 = int_to_ptr.vmem [resolvable:$false] %s740_s9 }
  0x37   : > { %s742_s7 = scalar_lea.vmem %s741_s9, 4096  ;;  %p743_p9 = scmp.lt.s32.totalorder %s1106_s29, %s741_s9 }
  0x38   : > { %p738_p10 = pnand %p736_p5, %p722_p7  ;;  %p744_p6 = scmp.lt.s32.totalorder %s742_s7, %s735_s6 }
  0x3a   : > { %p739_p13 = pneg %p738_p10  ;;  %p745_p0 = por %p744_p6, %p743_p9 }
  0x3c   : > { %p746_p2 = pnand %p745_p0, %p739_p13 }
  0x3e   : > { %749 = shalt.err (!%p746_p2)
}
  0x3f   : > { %s1475_s8 = smov 128   ;;  %s1476_s27 = smov 8  }
  0x40   : > { %614 = dma.hbm_to_vmem [thread:$0]  (!%p1091_p1), %s1102_s20, 2048, %s1106_s29, %s1109_s10, %s1475_s8, %s1475_s8, %s1476_s27  }
  0x41   : > { %p1492_p9 = scmp.lt.s32.totalorder %s940_s22, 5  ;;  %p1493_p11 = scmp.ge.s32.totalorder %s940_s22, 1 }
  0x42   : > { %s1495_s6 = sshll.u32 %s1085_s24, 7  ;;  %s166_s1 = scalar_lea.vmem [#allocation2], %s1082_s11 }
  0x43   : > { %p1144_p13 = pnand %p1493_p11, %p1492_p9  ;;  %s1153_s7 = scalar_lea.hbm %s1460_s0, %s1495_s6 }
  0x44   : > { %s176_s15 = sshll.u32 %s166_s1, 4  ;;  %s1496_s20 = sand.u32 1, %s920_s17   ;;  %s1156_s15 = int_to_ptr.vmem [resolvable:$true] %s176_s15 }
  0x45   : > { %s1160_s29 = scalar_lea.sflag [#allocation3], %s1496_s20  ;;  %s750_s8 = scalar_lea.hbm %s1153_s7, 2048 }
  0x46   : > { %p751_p3 = scmp.ne.s32.totalorder %s1153_s7, %s750_s8  ;;  %s755_s25 = scalar_lea.hbm %s1460_s0, 8192 }
  0x47   : > { %p756_p5 = scmp.lt.u32.totalorder %s1153_s7, %s1460_s0  ;;  %p757_p10 = scmp.lt.u32.totalorder %s755_s25, %s750_s8 }
  0x48   : > { %p753_p4 = pnand %p751_p3, %p722_p7  ;;  %p759_p0 = scmp.lt.u32.totalorder %s750_s8, %s1153_s7 }
  0x49   : > { %p758_p6 = por %p757_p10, %p756_p5 }
  0x4a   : > { %p754_p12 = pneg %p753_p4 }
  0x4b   : > { %p760_p2 = por %p759_p0, %p758_p6 }
  0x4d   : > { %p761_p9 = pnand %p760_p2, %p754_p12 }
  0x4f   : > { %764 = shalt.err (!%p761_p9)
}
  0x50   : > { %s765_s1 = scalar_lea.vmem %s1156_s15, 2048  ;;  %s945_s11 = smov [#allocation2]  }
  0x51   : > { %p766_p11 = scmp.ne.s32.totalorder %s1156_s15, %s765_s1  ;;  %s770_s20 = sshll.u32 %s945_s11, 4  ;;  %s771_s20 = int_to_ptr.vmem [resolvable:$false] %s770_s20 }
  0x52   : > { %s772_s27 = scalar_lea.vmem %s771_s20, 4096  ;;  %p773_p8 = scmp.lt.s32.totalorder %s1156_s15, %s771_s20 }
  0x53   : > { %p768_p3 = pnand %p766_p11, %p722_p7  ;;  %p774_p5 = scmp.lt.s32.totalorder %s772_s27, %s765_s1 }
  0x55   : > { %p769_p4 = pneg %p768_p3  ;;  %p775_p10 = por %p774_p5, %p773_p8 }
  0x57   : > { %p776_p6 = pnand %p775_p10, %p769_p4 }
  0x59   : > { %779 = shalt.err (!%p776_p6)
}
  0x5a   : > { %s1497_s8 = smov 8   ;;  %s1498_s24 = smov 128  }
  0x5b   : > { %611 = dma.hbm_to_vmem [thread:$0]  (!%p1091_p1), %s1153_s7, 2048, %s1156_s15, %s1160_s29, %s1498_s24, %s1498_s24, %s1497_s8  }
  0x5c   : > { %s97_s28 = sadd.s32 1, %s908_s14  ;;  %p104_p8 = scmp.ne.s32.totalorder %s908_s14, %s904_s13 }
  0x5d   : > { %p1499_p7 = scmp.eq.s32.totalorder %s1066_s5, 0  ;;  %p1500_p12 = scmp.eq.s32.totalorder %s940_s22, 0 }
  0x5e   : > { %p110_p2 = scmp.ne.s32.totalorder %s904_s13, %s900_s12  ;;  %s212_s25 = sand.u32 1, %s908_s14  }
  0x5f   : > { %s1195_s6 = scalar_select %p1499_p7, %s908_s14, %s97_s28  }
  0x60   : > { %p106_p0 = por %p104_p8, %p1500_p12  ;;  %s598_s9 = sshll.u32 %s936_s21, 6 }
  0x61   : > { %p1501_p9 = scmp.eq.s32.totalorder %s1028_s23, 0  ;;  %s581_s11 = sshll.u32 %s212_s25, 2 }
  0x62   : > { %s1212_s15 = scalar_lea.hbm %s1462_s2, %s598_s9  ;;  %s214_s5 = scalar_lea.vmem [#allocation7], %s581_s11 }
  0x63   : > { %p1205_p11 = por %p110_p2, %p1501_p9  ;;  %s221_s7 = sshll.u32 %s214_s5, 4  ;;  %s1220_s7 = int_to_ptr.vmem [resolvable:$true] %s221_s7 }
  0x64   : > { %p1503_p1 = scmp.lt.s32.totalorder %s940_s22, 4  ;;  %s780_s29 = scalar_lea.hbm %s1212_s15, 64 }
  0x65   : > { %s1502_s1 = scalar_select %p1205_p11, 1, 0 }
  0x66   : > { %p1216_p3 = pnand %p1503_p1, %p106_p0  ;;  %p781_p4 = scmp.ne.s32.totalorder %s1212_s15, %s780_s29 }
  0x67   : > { %s785_s28 = scalar_lea.hbm %s1462_s2, 128  ;;  %p786_p8 = scmp.lt.u32.totalorder %s1212_s15, %s1462_s2 }
  0x68   : > { %p782_p5 = pneg %p1216_p3  ;;  %p787_p7 = scmp.lt.u32.totalorder %s785_s28, %s780_s29 }
  0x69   : > { %p789_p0 = scmp.lt.u32.totalorder %s780_s29, %s1212_s15 }
  0x6a   : > { %p783_p10 = pnand %p782_p5, %p781_p4  ;;  %p788_p12 = por %p787_p7, %p786_p8 }
  0x6c   : > { %p784_p6 = pneg %p783_p10  ;;  %p790_p2 = por %p789_p0, %p788_p12 }
  0x6e   : > { %p791_p9 = pnand %p790_p2, %p784_p6 }
  0x70   : > { %794 = shalt.err (!%p791_p9)
}
  0x71   : > { %s795_s11 = scalar_lea.vmem %s1220_s7, 64  ;;  %s946_s20 = smov [#allocation7]  }
  0x72   : > { %p796_p1 = scmp.ne.s32.totalorder %s1220_s7, %s795_s11  ;;  %s800_s27 = sshll.u32 %s946_s20, 4  ;;  %s801_s27 = int_to_ptr.vmem [resolvable:$false] %s800_s27 }
  0x73   : > { %s802_s5 = scalar_lea.vmem %s801_s27, 128  ;;  %p803_p11 = scmp.lt.s32.totalorder %s1220_s7, %s801_s27 }
  0x74   : > { %p798_p4 = pnand %p796_p1, %p782_p5  ;;  %p804_p8 = scmp.lt.s32.totalorder %s802_s5, %s795_s11 }
  0x76   : > { %p799_p10 = pneg %p798_p4  ;;  %p805_p7 = por %p804_p8, %p803_p11 }
  0x78   : > { %p806_p12 = pnand %p805_p7, %p799_p10 }
  0x7a   : > { %809 = shalt.err (!%p806_p12)
}
  0x7b   : > { %s947_s29 = smov 32   ;;  %s948_s8 = smov 2  }
  0x7c   : > { %617 = dma.hbm_to_vmem [thread:$0]  (!%p1216_p3), %s1212_s15, 64, %s1220_s7, %s1109_s10, %s947_s29, %s947_s29, %s948_s8  }
  0x7d   : > { %233 = sbr.rel (%p1144_p13) target bundleno = 196 (0xc4), region = 32  ;;  %s1251_s24 = sand.u32 (!%p1144_p13), 1, %s916_s16  }
  0x7e   : > { %s1254_s28 = sshll.u32 (!%p1144_p13), %s1251_s24, 7  ;;  %s236_s25 = scalar_lea.sflag (!%p1144_p13), [#allocation3], %s1251_s24 }
  0x7f   : > { %s1258_s9 = scalar_lea.vmem (!%p1144_p13), [#allocation2], %s1254_s28  ;;  %p1505_p11 = scmp.ne.s32.totalorder (!%p1144_p13), %s1485_s30, 0 }
  0x84   : > { %883 = dma.done.wait (%p1505_p11), %s236_s25, 2048  }
  0x85   : > { %885 = vsyncadd (%p1505_p11), %s236_s25, 4294965248  ;;  %s244_s10 = sand.u32 1, %s1028_s23   ;;  %s1266_s15 = scalar_lea.vmem [#allocation5], %s1254_s28 }
  0x86   : > { %s245_s26 = scalar_lea.sflag [#allocation6], %s244_s10 }
  0x87   : > { %887 = dma.done.wait (%p1505_p11), %s245_s26, 2048  }
  0x88   : > { %889 = vsyncadd (%p1505_p11), %s245_s26, 4294965248  ;;  %s255_s7 = sand.u32 1, %s904_s13   ;;  %p1506_p13 = scmp.ne.s32.totalorder %s1502_s1, 0 }
  0x89   : > { %s587_s12 = sshll.u32 %s255_s7, 2 }
  0x8a   : > { %s257_s11 = scalar_lea.vmem [#allocation7], %s587_s12 }
  0x8b   : > { %891 = dma.done.wait (%p1506_p13), %s245_s26, 64  }
  0x8c   : > { %893 = vsyncadd (%p1506_p13), %s245_s26, 4294967232  ;;  %vm295_vm0 = vcmask 25600   ;;  %v293_v0 = vld [vmem:[%s257_s11] sm:$0x3]  ;;  %v294_v1 = vld [vmem:[%s257_s11 + $0x2] sm:$0x3]  ;;  %v341_v8 = vlaneseq }
  0x8d   : > { %v296_v2 = vsel %vm295_vm0, %v293_v0, 0.0  ;;  %v297_v3 = vsel %vm295_vm0, %v294_v1, 0.0  ;;  %v325_v14 = vld [vmem:[%s1266_s15] sm:$0xff]  ;;  %v326_v16 = vld [vmem:[%s1266_s15 + $0x8] sm:$0xff]  ;;  %v327_v17 = vld [vmem:[%s1266_s15 + $0x10] sm:$0xff]  ;;  %vm397_vm1 = vcmask 31744  }
  0x8e   : > { %v298_v4 = vadd.f32 %v297_v3, %v296_v2  ;;  %v342_v11 = vshrl.u32 %v341_v8, 7  ;;  %v328_v18 = vld [vmem:[%s1266_s15 + $0x18] sm:$0xff]  ;;  %v329_v19 = vld [vmem:[%s1266_s15 + $0x20] sm:$0xff]  ;;  %v330_v20 = vld [vmem:[%s1266_s15 + $0x28] sm:$0xff]  ;;  %s599_s23 = sshll.u32 %s924_s18, 4  ;;  %s592_s30 = sshll.u32 %s928_s19, 5 }
  0x8f   : > { %v331_v21 = vld [vmem:[%s1266_s15 + $0x30] sm:$0xff]  ;;  %v332_v23 = vld [vmem:[%s1266_s15 + $0x38] sm:$0xff]  ;;  %v1288_v24 = vld [vmem:[%s1266_s15 + $0x40] sm:$0xff]  ;;  %s1345_s18 = sadd.s32 %s599_s23, %s592_s30  ;;  %s1354_s1 = scalar_lea.vmem [#allocation8], %s1254_s28 }
  0x90   : > { %v300_v5 = vmul.f32 0.00390625, %v298_v4  ;;  %v343_v13 = vsub.s32 0, %v342_v11  ;;  %v363_v22 = vsub.s32 1, %v342_v11  ;;  %v1291_v25 = vld [vmem:[%s1266_s15 + $0x48] sm:$0xff]  ;;  %v1295_v27 = vld [vmem:[%s1266_s15 + $0x50] sm:$0xff]  ;;  %v1298_v28 = vld [vmem:[%s1266_s15 + $0x58] sm:$0xff] }
  0x91   : > { %v1301_v29 = vld [vmem:[%s1266_s15 + $0x60] sm:$0xff]  ;;  %v1308_v34 = vld [vmem:[%s1266_s15 + $0x68] sm:$0xff]  ;;  %v1311_v35 = vld [vmem:[%s1266_s15 + $0x70] sm:$0xff]  ;;  %s593_s19 = sshll.u32 %s1345_s18, 7  ;;  %s431_s20 = sshll.u32 %s1354_s1, 4  ;;  %s1381_s20 = int_to_ptr.vmem [resolvable:$true] %s431_s20 }
  0x92   : > { %v301_v6 = vmul.f32 %v300_v5, %v300_v5  ;;  %v1278_v15 = vrot.slane %v300_v5, %v343_v13  ;;  %v1314_v36 = vld [vmem:[%s1266_s15 + $0x78] sm:$0xff]  ;;  %v309_v42 = vld [vmem:[%s1258_s9] sm:$0xff]  ;;  %v310_v44 = vld [vmem:[%s1258_s9 + $0x8] sm:$0xff]  ;;  %s1379_s29 = scalar_lea.hbm %s1463_s3, %s593_s19  ;;  %s415_s8 = scalar_lea.sflag [#allocation4], %s1251_s24 }
  0x93   : > { %v311_v48 = vld [vmem:[%s1258_s9 + $0x10] sm:$0xff]  ;;  %v312_v49 = vld [vmem:[%s1258_s9 + $0x18] sm:$0xff]  ;;  %v313_v50 = vld [vmem:[%s1258_s9 + $0x20] sm:$0xff]  ;;  %s810_s28 = scalar_lea.vmem %s1381_s20, 2048  ;;  %p1507_p5 = scmp.ne.s32.totalorder %s1486_s4, 0 }
  0x94   : > { %v303_v7 = vrot.slane %v301_v6, 7  ;;  %v345_v26 = vsub.f32 %v325_v14, %v1278_v15  ;;  %v346_v30 = vsub.f32 %v326_v16, %v1278_v15  ;;  %v347_v31 = vsub.f32 %v327_v17, %v1278_v15  ;;  %v314_v59 = vld [vmem:[%s1258_s9 + $0x28] sm:$0xff]  ;;  %v315_v60 = vld [vmem:[%s1258_s9 + $0x30] sm:$0xff]  ;;  %v316_v61 = vld [vmem:[%s1258_s9 + $0x38] sm:$0xff]  ;;  %p811_p3 = scmp.ne.s32.totalorder %s1381_s20, %s810_s28  ;;  %s949_s25 = smov [#allocation8]  }
  0x95   : > { %v348_v32 = vsub.f32 %v328_v18, %v1278_v15  ;;  %v349_v33 = vsub.f32 %v329_v19, %v1278_v15  ;;  %v350_v38 = vsub.f32 %v330_v20, %v1278_v15  ;;  %v351_v39 = vsub.f32 %v331_v21, %v1278_v15  ;;  %v317_v6 = vld [vmem:[%s1258_s9 + $0x40] sm:$0xff]  ;;  %v320_v13 = vld [vmem:[%s1258_s9 + $0x58] sm:$0xff]  ;;  %v322_v19 = vld [vmem:[%s1258_s9 + $0x68] sm:$0xff] }
  0x96   : > { %v305_v9 = vsub.f32 %v300_v5, %v303_v7  ;;  %v352_v40 = vsub.f32 %v332_v23, %v1278_v15  ;;  %v353_v41 = vsub.f32 %v1288_v24, %v1278_v15  ;;  %v354_v45 = vsub.f32 %v1291_v25, %v1278_v15  ;;  %v318_v7 = vld [vmem:[%s1258_s9 + $0x48] sm:$0xff]  ;;  %v321_v14 = vld [vmem:[%s1258_s9 + $0x60] sm:$0xff]  ;;  %v323_v20 = vld [vmem:[%s1258_s9 + $0x70] sm:$0xff]  ;;  %p812_p6 = pnand %p811_p3, %p1507_p5 }
  0x97   : > { %v355_v46 = vsub.f32 %v1295_v27, %v1278_v15  ;;  %v356_v47 = vsub.f32 %v1298_v28, %v1278_v15  ;;  %v357_v51 = vsub.f32 %v1301_v29, %v1278_v15  ;;  %v358_v52 = vsub.f32 %v1308_v34, %v1278_v15  ;;  %v324_v21 = vld [vmem:[%s1258_s9 + $0x78] sm:$0xff] }
  0x98   : > { %v306_v10 = vmax.f32 %v305_v9, 0.0  ;;  %v359_v53 = vsub.f32 %v1311_v35, %v1278_v15  ;;  %v360_v54 = vsub.f32 %v1314_v36, %v1278_v15  ;;  %p813_p0 = pneg %p812_p6 }
  0x9a   : > { %v307_v12 = vadd.f32 1e-05, %v306_v10 }
  0x9c   : > { %718 = vrsqrt.f32 %v307_v12  ;;  %v319_v12 = vld [vmem:[%s1258_s9 + $0x50] sm:$0xff]  ;;  %s814_s9 = sshll.u32 %s949_s25, 4  ;;  %s815_s9 = int_to_ptr.vmem [resolvable:$false] %s814_s9 }
  0x9d   : > { %s816_s10 = scalar_lea.vmem %s815_s9, 4096  ;;  %p817_p2 = scmp.lt.s32.totalorder %s1381_s20, %s815_s9 }
  0x9e   : > { %p818_p9 = scmp.lt.s32.totalorder %s816_s10, %s810_s28 }
  0xa0   : > { %p819_p1 = por %p818_p9, %p817_p2 }
  0xa2   : > { %p820_p4 = pnand %p819_p1, %p813_p0 }
  0xa6   : > { %v719_v37 = vpop.eup %718 }
  0xa7   : > { %v364_v43 = vrot.slane %v719_v37, %v363_v22 }
  0xa9   : > { %v365_v55 = vmul.f32 %v364_v43, %v345_v26  ;;  %v366_v56 = vmul.f32 %v364_v43, %v346_v30  ;;  %v367_v57 = vmul.f32 %v364_v43, %v347_v31  ;;  %v368_v58 = vmul.f32 %v364_v43, %v348_v32 }
  0xaa   : > { %v369_v62 = vmul.f32 %v364_v43, %v349_v33  ;;  %v370_v63 = vmul.f32 %v364_v43, %v350_v38  ;;  %v371_v0 = vmul.f32 %v364_v43, %v351_v39  ;;  %v372_v1 = vmul.f32 %v364_v43, %v352_v40 }
  0xab   : > { %v381_v2 = vadd.f32 %v365_v55, %v309_v42  ;;  %v382_v3 = vadd.f32 %v366_v56, %v310_v44  ;;  %v383_v4 = vadd.f32 %v367_v57, %v311_v48  ;;  %v384_v5 = vadd.f32 %v368_v58, %v312_v49 }
  0xac   : > { %v385_v8 = vadd.f32 %v369_v62, %v313_v50  ;;  %v386_v9 = vadd.f32 %v370_v63, %v314_v59  ;;  %v387_v10 = vadd.f32 %v371_v0, %v315_v60  ;;  %v388_v11 = vadd.f32 %v372_v1, %v316_v61 }
  0xad   : > { %398 = vst.msk [vmem:[%s1354_s1] sm:$0xff] %vm397_vm1, %v381_v2  ;;  %399 = vst.msk [vmem:[%s1354_s1 + $0x8] sm:$0xff] %vm397_vm1, %v382_v3  ;;  %v373_v15 = vmul.f32 %v364_v43, %v353_v41  ;;  %v374_v16 = vmul.f32 %v364_v43, %v354_v45  ;;  %v375_v17 = vmul.f32 %v364_v43, %v355_v46 }
  0xae   : > { %400 = vst.msk [vmem:[%s1354_s1 + $0x10] sm:$0xff] %vm397_vm1, %v383_v4  ;;  %401 = vst.msk [vmem:[%s1354_s1 + $0x18] sm:$0xff] %vm397_vm1, %v384_v5  ;;  %v376_v18 = vmul.f32 %v364_v43, %v356_v47  ;;  %v377_v22 = vmul.f32 %v364_v43, %v357_v51  ;;  %v378_v23 = vmul.f32 %v364_v43, %v358_v52 }
  0xaf   : > { %402 = vst.msk [vmem:[%s1354_s1 + $0x20] sm:$0xff] %vm397_vm1, %v385_v8  ;;  %403 = vst.msk [vmem:[%s1354_s1 + $0x28] sm:$0xff] %vm397_vm1, %v386_v9  ;;  %v379_v24 = vmul.f32 %v364_v43, %v359_v53  ;;  %v380_v25 = vmul.f32 %v364_v43, %v360_v54  ;;  %v389_v26 = vadd.f32 %v373_v15, %v317_v6 }
  0xb0   : > { %404 = vst.msk [vmem:[%s1354_s1 + $0x30] sm:$0xff] %vm397_vm1, %v387_v10  ;;  %405 = vst.msk [vmem:[%s1354_s1 + $0x38] sm:$0xff] %vm397_vm1, %v388_v11  ;;  %v390_v27 = vadd.f32 %v374_v16, %v318_v7  ;;  %v391_v28 = vadd.f32 %v375_v17, %v319_v12  ;;  %v392_v29 = vadd.f32 %v376_v18, %v320_v13 }
  0xb1   : > { %v393_v30 = vadd.f32 %v377_v22, %v321_v14  ;;  %v394_v31 = vadd.f32 %v378_v23, %v322_v19  ;;  %v395_v32 = vadd.f32 %v379_v24, %v323_v20  ;;  %v396_v33 = vadd.f32 %v380_v25, %v324_v21  ;;  %406 = vst.msk [vmem:[%s1354_s1 + $0x40] sm:$0xff] %vm397_vm1, %v389_v26 }
  0xb2   : > { %407 = vst.msk [vmem:[%s1354_s1 + $0x48] sm:$0xff] %vm397_vm1, %v390_v27  ;;  %408 = vst.msk [vmem:[%s1354_s1 + $0x50] sm:$0xff] %vm397_vm1, %v391_v28 }
  0xb3   : > { %409 = vst.msk [vmem:[%s1354_s1 + $0x58] sm:$0xff] %vm397_vm1, %v392_v29  ;;  %410 = vst.msk [vmem:[%s1354_s1 + $0x60] sm:$0xff] %vm397_vm1, %v393_v30 }
  0xb4   : > { %411 = vst.msk [vmem:[%s1354_s1 + $0x68] sm:$0xff] %vm397_vm1, %v394_v31  ;;  %412 = vst.msk [vmem:[%s1354_s1 + $0x70] sm:$0xff] %vm397_vm1, %v395_v32 }
  0xb5   : > { %413 = vst.msk [vmem:[%s1354_s1 + $0x78] sm:$0xff] %vm397_vm1, %v396_v33 }
  0xb6   : > { %823 = shalt.err (!%p820_p4)
}
  0xb7   : > { %s824_s26 = scalar_lea.hbm %s1379_s29, 2048  ;;  %s828_s12 = scalar_lea.hbm %s1463_s3, 8192 }
  0xb8   : > { %p825_p10 = scmp.ne.s32.totalorder %s1379_s29, %s824_s26  ;;  %p829_p12 = scmp.lt.u32.totalorder %s1379_s29, %s1463_s3 }
  0xb9   : > { %p830_p11 = scmp.lt.u32.totalorder %s828_s12, %s824_s26  ;;  %p832_p3 = scmp.lt.u32.totalorder %s824_s26, %s1379_s29 }
  0xba   : > { %p826_p8 = pnand %p825_p10, %p1507_p5 }
  0xbb   : > { %p831_p13 = por %p830_p11, %p829_p12 }
  0xbc   : > { %p827_p7 = pneg %p826_p8 }
  0xbd   : > { %p833_p6 = por %p832_p3, %p831_p13 }
  0xbf   : > { %p834_p0 = pnand %p833_p6, %p827_p7 }
  0xc1   : > { %837 = shalt.err (!%p834_p0)
}
  0xc2   : > { %s950_s30 = smov 128   ;;  %s951_s18 = smov 8  }
  0xc3   : > { %606 = dma.vmem_to_hbm [thread:$0]  (%p1507_p5), %s1381_s20, 2048, %s1379_s29, %s415_s8, %s950_s30, %s950_s30, %s951_s18  }
  0xc4 PF: > { %s1508_s19 = sld [smem:[#allocation13_spill]]  ;;  %s1509_s1 = sld [smem:[#allocation17_spill]] }
  0xc5   : > { %p623_p2 = scmp.ge.s32.totalorder %s940_s22, 2 }
  0xca   : > { %s446_s27 = sand.u32 1, %s1508_s19   ;;  %p1510_p9 = scmp.ne.s32.totalorder %s1509_s1, 0 }
  0xcb   : > { %s447_s5 = scalar_lea.sflag [#allocation4], %s446_s27 }
  0xcc   : > { %p619_p1 = pnand %p623_p2, %p1510_p9 }
  0xce   : > { %895 = dma.done.wait (!%p619_p1), %s447_s5, 2048  }
  0xcf   : > { %897 = vsyncadd (!%p619_p1), %s447_s5, 4294965248  ;;  %s22_s22 = sadd.s32 1, %s940_s22   ;;  %s1511_s4 = sld [smem:[#allocation18_spill]] }
  0xd0   : > { %p19_p4 = scmp.ge.s32.totalorder %s22_s22, 6   ;;  %s1512_s18 = sld [smem:[#allocation14_spill]] }
  0xd1   : > { %s1513_s20 = sld [smem:[#allocation15_spill]]  ;;  %s1514_s24 = sld [smem:[#allocation16_spill]] }
  0xd2   : > { %s1515_s12 = smov %s904_s13  ;;  %s1516_s13 = smov %s908_s14 }
  0xd3   : > { %s1517_s14 = smov %s1195_s6  ;;  %s1518_s15 = smov %s916_s16 }
  0xd4   : > { %s1519_s16 = smov %s920_s17  ;;  %s1521_s19 = smov %s936_s21 }
  0xd5   : > { %s1520_s17 = smov %s1511_s4  ;;  %21 = sbr.rel (!%p19_p4) target bundleno = 13 (0xd), region = 101 }
  0xd7   : > { %s1522_s21 = smov %s1514_s24 }
  0xdc   :  { %452 = vsyncpa [#allocation3], 1 }
  0xdd   :  { %454 = vsyncpa [#allocation3 + $0x1], 1 }
  0xde   :  { %455 = vsyncpa [#allocation6], 1 }
  0xdf   :  { %457 = vsyncpa [#allocation6 + $0x1], 1 }
  0xe0   :  { %458 = vsyncpa [#allocation4], 1 }
  0xe1   :  { %460 = vsyncpa [#allocation4 + $0x1], 1 }

// kernel: resnet_block_forward.2
= control target key start
LH: loop header
LB: loop body
LE: loop exit
PB: predicated region body
PF: predicated region fallthrough
CT: control target
= control target key end

     0   :  { %s5304_s0 = inlined_call_operand.hbm [shape: bf16[2,24,16,4], index: 0, kind: input, shape index: {}, may-alias: {0,1}]   ;;  %s5305_s1 = inlined_call_operand.hbm [shape: bf16[2,24,16,4], index: 1, kind: input, shape index: {}, may-alias: {0,1}]   ;;  %s5306_s2 = inlined_call_operand.hbm [shape: bf16[3,4,12], index: 2, kind: input, shape index: {}]   ;;  %s5307_s3 = inlined_call_operand.hbm [shape: f32[1,4], index: 3, kind: input, shape index: {}]   ;;  %s5308_s4 = inlined_call_operand.hbm [shape: bf16[3,4,12], index: 4, kind: input, shape index: {}]   ;;  %s5309_s5 = inlined_call_operand.hbm [shape: f32[1,4], index: 5, kind: input, shape index: {}]   ;;  %s5310_s6 = inlined_call_operand.hbm [shape: f32[2,16,16,4], index: 6, kind: output, shape index: {0}]   ;;  %s5311_s7 = inlined_call_operand.hbm [shape: f32[2,2,2,4], index: 7, kind: output, shape index: {1}]  }
   0x1   :  { %5331 = sst [smem:[#allocation29_spill]] %s5304_s0 }
   0x2   :  { %5332 = sst [smem:[#allocation30_spill]] %s5306_s2 }
   0x3   :  { %5333 = sst [smem:[#allocation31_spill]] %s5307_s3 }
   0x4   :  { %5334 = sst [smem:[#allocation32_spill]] %s5308_s4 }
   0x5   :  { %5335 = sst [smem:[#allocation33_spill]] %s5309_s5 }
   0x6   :  { %5336 = sst [smem:[#allocation34_spill]] %s5310_s6 }
   0x7   :  { %5337 = sst [smem:[#allocation35_spill]] %s5311_s7 }
   0x8   :  { %13 = vsyncpa [#allocation4], 0 }
   0x9   :  { %15 = vsyncpa [#allocation4 + $0x1], 0 }
   0xa   :  { %16 = vsyncpa [#allocation7], 0 }
   0xb   :  { %18 = vsyncpa [#allocation7 + $0x1], 0 }
   0xc   :  { %19 = vsyncpa [#allocation10], 0 }
   0xd   :  { %20 = vsyncpa [#allocation13], 0 }
   0xe   :  { %21 = vsyncpa [#allocation5], 0 }
   0xf   :  { %23 = vsyncpa [#allocation5 + $0x1], 0 }
  0x10   :  { %24 = vsyncpa [#allocation16], 0 }
  0x11   :  { %26 = vsyncpa [#allocation16 + $0x1], 0  ;;  %s3763_s24 = smov 0   ;;  %s3765_s25 = smov 0  }
  0x12   :  { %s3767_s26 = smov 0   ;;  %s3769_s27 = smov 0  }
  0x13   :  { %s3771_s28 = smov 0   ;;  %s3773_s29 = smov 0  }
  0x14   :  { %s3775_s30 = smov 0   ;;  %s3777_s8 = smov 0  }
  0x15   :  { %s3779_s9 = smov 0   ;;  %s3781_s10 = smov 0  }
  0x16   :  { %s3783_s11 = smov 0  }
  0x17 LB: > { %5338 = sst [smem:[#allocation24_spill]] %s3689_s30  ;;  %s3817_s12 = sadd.s32 4294967295, %s3705_s11   ;;  %s3705_s11 = sphi %s3783_s11, %s32_s11   ;;  %s3701_s10 = sphi %s3781_s10, %s5394_s10   ;;  %s3697_s9 = sphi %s3779_s9, %s5393_s9   ;;  %s3693_s8 = sphi %s3777_s8, %s5392_s8   ;;  %s3689_s30 = sphi %s3775_s30, %s5391_s30   ;;  %s3685_s29 = sphi %s3773_s29, %s5390_s29   ;;  %s3681_s28 = sphi %s3771_s28, %s5389_s28   ;;  %s3677_s27 = sphi %s3769_s27, %s5388_s27   ;;  %s3673_s26 = sphi %s3767_s26, %s5387_s26   ;;  %s3669_s25 = sphi %s3765_s25, %s5386_s25   ;;  %s3665_s24 = sphi %s3763_s24, %s5385_s24  }
  0x18   : > { %5339 = sst [smem:[#allocation25_spill]] %s3693_s8  ;;  %p96_p0 = scmp.ne.s32.totalorder %s3669_s25, %s3665_s24 }
  0x19   : > { %p5313_p1 = scmp.eq.s32.totalorder %s3817_s12, 0  ;;  %p2773_p2 = scmp.ge.s32.totalorder %s3705_s11, 1 }
  0x1a   : > { %p247_p3 = scmp.lt.s32.totalorder %s3705_s11, 5  ;;  %s3707_s15 = smov [#allocation8]  }
  0x1b   : > { %p3825_p4 = por %p96_p0, %p5313_p1  ;;  %s259_s16 = sshll.u32 %s3707_s15, 4  ;;  %s260_s16 = int_to_ptr.vmem [resolvable:$true] %s259_s16 }
  0x1c   : > { %p3829_p5 = pnand %p2773_p2, %p247_p3  ;;  %s3708_s18 = smov [#allocation9]  }
  0x1d   : > { %s5340_s13 = scalar_select %p3825_p4, 1, 0 }
  0x1e   : > { %s5342_s14 = scalar_select %p3829_p5, 1, 0 }
  0x1f   : > { %5341 = sst [smem:[#allocation26_spill]] %s5340_s13  ;;  %p3173_p6 = pneg %p3829_p5 }
  0x20   : > { %s273_s19 = sshll.u32 %s3708_s18, 4  ;;  %s5344_s2 = sld [smem:[#allocation30_spill]]  ;;  %s3841_s19 = int_to_ptr.vmem [resolvable:$true] %s273_s19 }
  0x21   : > { %p3837_p7 = pnand %p3173_p6, %p5313_p1 }
  0x23   : > { %p3851_p9 = pneg %p3837_p7 }
  0x26   : > { %s3362_s22 = scalar_lea.hbm %s5344_s2, 96 }
  0x27   : > { %p3363_p8 = scmp.ne.s32.totalorder %s5344_s2, %s3362_s22  ;;  %p3369_p12 = scmp.lt.u32.totalorder %s3362_s22, %s5344_s2 }
  0x29   : > { %p3365_p10 = pnand %p3851_p9, %p3363_p8 }
  0x2b   : > { %p3366_p11 = pneg %p3365_p10 }
  0x2d   : > { %p3371_p13 = pnand %p3369_p12, %p3366_p11 }
  0x2f   : > { %3374 = shalt.err (!%p3371_p13)
}
  0x30   : > { %s3375_s20 = scalar_lea.vmem %s260_s16, 96  ;;  %p3383_p6 = scmp.lt.s32.totalorder %s260_s16, %s260_s16 }
  0x31   : > { %p3376_p0 = scmp.ne.s32.totalorder %s260_s16, %s3375_s20  ;;  %p3384_p1 = scmp.lt.s32.totalorder %s3375_s20, %s3375_s20 }
  0x33   : > { %p3378_p2 = pnand %p3376_p0, %p3851_p9  ;;  %p3385_p4 = por %p3384_p1, %p3383_p6 }
  0x35   : > { %p3379_p3 = pneg %p3378_p2 }
  0x37   : > { %p3386_p5 = pnand %p3385_p4, %p3379_p3 }
  0x39   : > { %3389 = shalt.err (!%p3386_p5)
}
  0x3a   : > { %s5321_s21 = smov 32   ;;  %s5322_s23 = smov 2  }
  0x3b   : > { %3176 = dma.hbm_to_vmem [thread:$0]  (!%p3837_p7), %s5344_s2, 96, %s260_s16, [#allocation7], %s5321_s21, %s5321_s21, %s5322_s23  }
  0x3c   : > { %s5346_s3 = sld [smem:[#allocation31_spill]] }
  0x42   : > { %s3390_s6 = scalar_lea.hbm %s5346_s3, 16 }
  0x43   : > { %p3391_p1 = scmp.ne.s32.totalorder %s5346_s3, %s3390_s6  ;;  %p3397_p8 = scmp.lt.u32.totalorder %s3390_s6, %s5346_s3 }
  0x45   : > { %p3393_p4 = pnand %p3391_p1, %p3851_p9 }
  0x47   : > { %p3394_p5 = pneg %p3393_p4 }
  0x49   : > { %p3399_p10 = pnand %p3397_p8, %p3394_p5 }
  0x4b   : > { %3402 = shalt.err (!%p3399_p10)
}
  0x4c   : > { %s3403_s16 = scalar_lea.vmem %s3841_s19, 16  ;;  %s3410_s8 = scalar_lea.vmem %s3841_s19, 32 }
  0x4d   : > { %p3404_p11 = scmp.ne.s32.totalorder %s3841_s19, %s3403_s16  ;;  %p3411_p0 = scmp.lt.s32.totalorder %s3841_s19, %s3841_s19 }
  0x4e   : > { %p3412_p2 = scmp.lt.s32.totalorder %s3410_s8, %s3403_s16 }
  0x4f   : > { %p3406_p12 = pnand %p3404_p11, %p3851_p9 }
  0x50   : > { %p3413_p3 = por %p3412_p2, %p3411_p0 }
  0x51   : > { %p3407_p13 = pneg %p3406_p12 }
  0x53   : > { %p3414_p6 = pnand %p3413_p3, %p3407_p13 }
  0x55   : > { %3417 = shalt.err (!%p3414_p6)
}
  0x56   : > { %3179 = dma.hbm_to_vmem [thread:$0]  (!%p3837_p7), %s5346_s3, 16, %s3841_s19, [#allocation10]  }
  0x57   : > { %s3711_s13 = smov [#allocation11]   ;;  %s3712_s22 = smov [#allocation12]  }
  0x58   : > { %s283_s7 = sshll.u32 %s3711_s13, 4  ;;  %s297_s24 = sshll.u32 %s3712_s22, 4  ;;  %s284_s7 = int_to_ptr.vmem [resolvable:$true] %s283_s7  ;;  %s298_s24 = int_to_ptr.vmem [resolvable:$true] %s297_s24 }
  0x59   : > { %s5347_s4 = sld [smem:[#allocation32_spill]] }
  0x5f   : > { %s3418_s16 = scalar_lea.hbm %s5347_s4, 96 }
  0x60   : > { %p3419_p1 = scmp.ne.s32.totalorder %s5347_s4, %s3418_s16  ;;  %p3425_p8 = scmp.lt.u32.totalorder %s3418_s16, %s5347_s4 }
  0x62   : > { %p3421_p4 = pnand %p3419_p1, %p3851_p9 }
  0x64   : > { %p3422_p5 = pneg %p3421_p4 }
  0x66   : > { %p3427_p10 = pnand %p3425_p8, %p3422_p5 }
  0x68   : > { %3430 = shalt.err (!%p3427_p10)
}
  0x69   : > { %s3431_s19 = scalar_lea.vmem %s284_s7, 96  ;;  %p3439_p0 = scmp.lt.s32.totalorder %s284_s7, %s284_s7 }
  0x6a   : > { %p3432_p11 = scmp.ne.s32.totalorder %s284_s7, %s3431_s19  ;;  %p3440_p2 = scmp.lt.s32.totalorder %s3431_s19, %s3431_s19 }
  0x6c   : > { %p3434_p12 = pnand %p3432_p11, %p3851_p9  ;;  %p3441_p3 = por %p3440_p2, %p3439_p0 }
  0x6e   : > { %p3435_p13 = pneg %p3434_p12 }
  0x70   : > { %p3442_p6 = pnand %p3441_p3, %p3435_p13 }
  0x72   : > { %3445 = shalt.err (!%p3442_p6)
}
  0x73   : > { %s5348_s21 = smov 2   ;;  %s5349_s30 = smov 32  }
  0x74   : > { %3182 = dma.hbm_to_vmem [thread:$0]  (!%p3837_p7), %s5347_s4, 96, %s284_s7, [#allocation10], %s5349_s30, %s5349_s30, %s5348_s21  }
  0x75   : > { %s5350_s5 = sld [smem:[#allocation33_spill]] }
  0x7b   : > { %s3446_s20 = scalar_lea.hbm %s5350_s5, 16 }
  0x7c   : > { %p3447_p1 = scmp.ne.s32.totalorder %s5350_s5, %s3446_s20  ;;  %p3453_p8 = scmp.lt.u32.totalorder %s3446_s20, %s5350_s5 }
  0x7e   : > { %p3449_p4 = pnand %p3447_p1, %p3851_p9 }
  0x80   : > { %p3450_p5 = pneg %p3449_p4 }
  0x82   : > { %p3455_p10 = pnand %p3453_p8, %p3450_p5 }
  0x84   : > { %3458 = shalt.err (!%p3455_p10)
}
  0x85   : > { %s3459_s23 = scalar_lea.vmem %s298_s24, 16  ;;  %s3466_s7 = scalar_lea.vmem %s298_s24, 32 }
  0x86   : > { %p3460_p11 = scmp.ne.s32.totalorder %s298_s24, %s3459_s23  ;;  %p3467_p0 = scmp.lt.s32.totalorder %s298_s24, %s298_s24 }
  0x87   : > { %p3468_p2 = scmp.lt.s32.totalorder %s3466_s7, %s3459_s23 }
  0x88   : > { %p3462_p12 = pnand %p3460_p11, %p3851_p9 }
  0x89   : > { %p3469_p3 = por %p3468_p2, %p3467_p0 }
  0x8a   : > { %p3463_p13 = pneg %p3462_p12 }
  0x8c   : > { %p3470_p6 = pnand %p3469_p3, %p3463_p13 }
  0x8e   : > { %3473 = shalt.err (!%p3470_p6)
}
  0x8f   : > { %3185 = dma.hbm_to_vmem [thread:$0]  (!%p3837_p7), %s5350_s5, 16, %s298_s24, [#allocation13]  }
  0x90   : > { %p206_p9 = scmp.eq.s32.totalorder %s3817_s12, 3  ;;  %s2772_s17 = sadd.s32 4294967294, %s3705_s11  }
  0x91   : > { %s41_s15 = sadd.s32 1, %s3697_s9  ;;  %s44_s13 = sadd.s32 1, %s3701_s10 }
  0x92   : > { %p42_p1 = scmp.ge.s32.totalorder %s41_s15, 2  ;;  %s53_s22 = sadd.s32 1, %s3685_s29 }
  0x93   : > { %p60_p4 = scmp.ne.s32.totalorder %s3685_s29, %s3681_s28  ;;  %p5326_p7 = scmp.eq.s32.totalorder %s3705_s11, 0 }
  0x94   : > { %s3940_s18 = scalar_select %p42_p1, 0, %s41_s15  }
  0x95   : > { %s5396_s13 = smov (!%p42_p1, %s44_s13), %s3701_s10  ;;  %p66_p8 = scmp.ne.s32.totalorder %s3681_s28, %s3677_s27 }
  0x96   : > { %5351 = sst [smem:[#allocation27_spill]] %s3940_s18  ;;  %s49_s20 = ssub.s32 %s3697_s9, %s3940_s18 }
  0x97   : > { %p46_p5 = scmp.ge.s32.totalorder %s5396_s13, 2  ;;  %s77_s24 = sadd.s32 1, %s3940_s18 }
  0x98   : > { %p3954_p10 = por %p206_p9, %p60_p4  ;;  %p5354_p11 = scmp.eq.s32.totalorder %s3817_s12, 0 }
  0x99   : > { %s5398_s13 = smov (%p46_p5, %s5396_s13), 0  ;;  %s79_s6 = ssub.s32 %s41_s15, %s77_s24 }
  0x9a   : > { %s5352_s16 = scalar_select %p3954_p10, 1, 0 }
  0x9b   : > { %5353 = sst [smem:[#allocation28_spill]] %s5398_s13  ;;  %p3962_p12 = por %p5354_p11, %p66_p8 }
  0x9c   : > { %s48_s19 = ssub.s32 %s3701_s10, %s5398_s13  ;;  %p212_p13 = scmp.eq.s32.totalorder %s2772_s17, 3 }
  0x9d   : > { %s5355_s8 = scalar_select %p3962_p12, 1, 0 }
  0x9e   : > { %s50_s23 = sor.u32 %s49_s20, %s48_s19  ;;  %p62_p0 = por %p5326_p7, %p60_p4 }
  0x9f   : > { %p51_p2 = scmp.eq.s32.totalorder %s50_s23, 0  ;;  %s80_s7 = sor.u32 %s79_s6, %s48_s19 }
  0xa0   : > { %p3973_p3 = por %p212_p13, %p66_p8  ;;  %p5325_p6 = scmp.lt.s32.totalorder %s3705_s11, 4 }
  0xa1   : > { %s3979_s30 = scalar_select %p51_p2, %s3685_s29, %s53_s22  }
  0xa2   : > { %s5356_s21 = scalar_select %p3973_p3, 1, 0 }
  0xa3   : > { %s308_s2 = sand.u32 1, %s3685_s29   ;;  %s2885_s3 = sshll.u32 %s3697_s9, 4 }
  0xa4   : > { %s2779_s4 = sshll.u32 %s308_s2, 6  ;;  %s3148_s15 = smul.u32 48, %s3701_s10 }
  0xa5   : > { %s312_s24 = scalar_lea.vmem [#allocation3], %s2779_s4  ;;  %p3986_p9 = pnand %p5325_p6, %p62_p0 }
  0xa6   : > { %s322_s5 = sshll.u32 %s312_s24, 4  ;;  %s3990_s20 = sadd.s32 %s3148_s15, %s2885_s3  ;;  %s3992_s5 = int_to_ptr.vmem [resolvable:$true] %s322_s5 }
  0xa7   : > { %s5323_s22 = sshll.u32 %s3990_s20, 6  ;;  %s5358_s0 = sld [smem:[#allocation29_spill]] }
  0xa8   : > { %p4002_p1 = scmp.eq.s32.totalorder %s80_s7, 0  ;;  %s4006_s3 = scalar_lea.sflag [#allocation4], %s308_s2 }
  0xa9   : > { %p3476_p5 = pneg %p3986_p9 }
  0xad   : > { %s4000_s4 = scalar_lea.hbm %s5358_s0, %s5323_s22  ;;  %s3479_s19 = scalar_lea.hbm %s5358_s0, 6144 }
  0xae   : > { %s3474_s15 = scalar_lea.hbm %s4000_s4, 1024  ;;  %p3480_p13 = scmp.lt.u32.totalorder %s4000_s4, %s5358_s0 }
  0xaf   : > { %p3475_p4 = scmp.ne.s32.totalorder %s4000_s4, %s3474_s15  ;;  %p3481_p0 = scmp.lt.u32.totalorder %s3479_s19, %s3474_s15 }
  0xb0   : > { %p3483_p6 = scmp.lt.u32.totalorder %s3474_s15, %s4000_s4 }
  0xb1   : > { %p3477_p8 = pnand %p3476_p5, %p3475_p4  ;;  %p3482_p2 = por %p3481_p0, %p3480_p13 }
  0xb3   : > { %p3478_p11 = pneg %p3477_p8  ;;  %p3484_p7 = por %p3483_p6, %p3482_p2 }
  0xb5   : > { %p3485_p3 = pnand %p3484_p7, %p3478_p11 }
  0xb7   : > { %3488 = shalt.err (!%p3485_p3)
}
  0xb8   : > { %s3489_s2 = scalar_lea.vmem %s3992_s5, 1024  ;;  %s3713_s7 = smov [#allocation3]  }
  0xb9   : > { %p3490_p4 = scmp.ne.s32.totalorder %s3992_s5, %s3489_s2  ;;  %s3494_s24 = sshll.u32 %s3713_s7, 4  ;;  %s3495_s24 = int_to_ptr.vmem [resolvable:$false] %s3494_s24 }
  0xba   : > { %s3496_s13 = scalar_lea.vmem %s3495_s24, 2048  ;;  %p3497_p12 = scmp.lt.s32.totalorder %s3992_s5, %s3495_s24 }
  0xbb   : > { %p3492_p8 = pnand %p3490_p4, %p3476_p5  ;;  %p3498_p13 = scmp.lt.s32.totalorder %s3496_s13, %s3489_s2 }
  0xbd   : > { %p3493_p10 = pneg %p3492_p8  ;;  %p3499_p0 = por %p3498_p13, %p3497_p12 }
  0xbf   : > { %p3500_p6 = pnand %p3499_p0, %p3493_p10 }
  0xc1   : > { %3503 = shalt.err (!%p3500_p6)
}
  0xc2   : > { %s5330_s22 = smov 64   ;;  %s3715_s15 = smov 4  }
  0xc3   : > { %3189 = dma.hbm_to_vmem [thread:$0]  (!%p3986_p9), %s4000_s4, 1024, %s3992_s5, %s4006_s3, %s5330_s22, %s5330_s22, %s3715_s15  }
  0xc4   : > { %s5360_s6 = sshll.u32 %s3990_s20, 6  ;;  %s83_s24 = sadd.s32 1, %s3673_s26 }
  0xc5   : > { %s2641_s7 = scalar_lea.hbm %s5305_s1, %s5360_s6  ;;  %p90_p7 = scmp.ne.s32.totalorder %s3673_s26, %s3669_s25 }
  0xc6   : > { %s4048_s13 = scalar_select %p4002_p1, %s3673_s26, %s83_s24  }
  0xc7   : > { %p5361_p10 = scmp.eq.s32.totalorder %s3705_s11, 0  ;;  %s332_s0 = sand.u32 1, %s3705_s11  }
  0xc8   : > { %s4053_s18 = scalar_lea.hbm %s2641_s7, 1024  ;;  %s334_s17 = sand.u32 1, %s3673_s26  }
  0xc9   : > { %p92_p12 = por %p90_p7, %p5361_p10  ;;  %s2783_s5 = sshll.u32 %s334_s17, 6 }
  0xca   : > { %p5362_p3 = scmp.lt.s32.totalorder %s3705_s11, 4  ;;  %s336_s4 = scalar_lea.vmem [#allocation6], %s2783_s5 }
  0xcb   : > { %s347_s23 = sshll.u32 %s336_s4, 4  ;;  %s4064_s3 = scalar_lea.sflag [#allocation7], %s332_s0  ;;  %s4062_s23 = int_to_ptr.vmem [resolvable:$true] %s347_s23 }
  0xcc   : > { %p4058_p9 = pnand %p5362_p3, %p92_p12  ;;  %s3534_s6 = scalar_lea.hbm %s2641_s7, 2048 }
  0xcd   : > { %p3505_p1 = scmp.ne.s32.totalorder %s4053_s18, %s3534_s6  ;;  %s3509_s24 = scalar_lea.hbm %s5305_s1, 6144 }
  0xce   : > { %p3506_p5 = pneg %p4058_p9  ;;  %p3510_p4 = scmp.lt.u32.totalorder %s4053_s18, %s5305_s1 }
  0xcf   : > { %p3511_p8 = scmp.lt.u32.totalorder %s3509_s24, %s3534_s6  ;;  %p3513_p0 = scmp.lt.u32.totalorder %s3534_s6, %s4053_s18 }
  0xd0   : > { %p3507_p11 = pnand %p3506_p5, %p3505_p1 }
  0xd1   : > { %p3512_p13 = por %p3511_p8, %p3510_p4 }
  0xd2   : > { %p3508_p2 = pneg %p3507_p11 }
  0xd3   : > { %p3514_p6 = por %p3513_p0, %p3512_p13 }
  0xd5   : > { %p3515_p7 = pnand %p3514_p6, %p3508_p2 }
  0xd7   : > { %3518 = shalt.err (!%p3515_p7)
}
  0xd8   : > { %s3519_s0 = scalar_lea.vmem %s4062_s23, 1024  ;;  %s3716_s7 = smov [#allocation6]  }
  0xd9   : > { %p3520_p10 = scmp.ne.s32.totalorder %s4062_s23, %s3519_s0  ;;  %s3524_s5 = sshll.u32 %s3716_s7, 4  ;;  %s3525_s5 = int_to_ptr.vmem [resolvable:$false] %s3524_s5 }
  0xda   : > { %s3526_s22 = scalar_lea.vmem %s3525_s5, 2048  ;;  %p3527_p1 = scmp.lt.s32.totalorder %s4062_s23, %s3525_s5 }
  0xdb   : > { %p3522_p12 = pnand %p3520_p10, %p3506_p5  ;;  %p3528_p11 = scmp.lt.s32.totalorder %s3526_s22, %s3519_s0 }
  0xdd   : > { %p3523_p3 = pneg %p3522_p12  ;;  %p3529_p4 = por %p3528_p11, %p3527_p1 }
  0xdf   : > { %p3530_p8 = pnand %p3529_p4, %p3523_p3 }
  0xe1   : > { %3533 = shalt.err (!%p3530_p8)
}
  0xe2   : > { %s5364_s4 = smov 64   ;;  %p5365_p5 = scmp.ne.s32.totalorder %s5342_s14, 0 }
  0xe3   : > { %3192 = dma.hbm_to_vmem [thread:$0]  (!%p4058_p9), %s4053_s18, 1024, %s4062_s23, %s4064_s3, %s5364_s4, %s5364_s4, %s3715_s15  }
  0xe4   : > { %359 = sbr.rel (%p5365_p5) target bundleno = 1732 (0x6c4), region = 44  ;;  %s4097_s6 = sand.u32 (!%p5365_p5), 1, %s3681_s28  }
  0xe5   : > { %s2787_s19 = sshll.u32 (!%p5365_p5), %s4097_s6, 6  ;;  %s362_s2 = scalar_lea.sflag (!%p5365_p5), [#allocation4], %s4097_s6 }
  0xe6   : > { %s4101_s24 = scalar_lea.vmem (!%p5365_p5), [#allocation3], %s2787_s19  ;;  %p5366_p2 = scmp.ne.s32.totalorder (!%p5365_p5), %s5355_s8, 0 }
  0xeb   : > { %3636 = dma.done.wait (%p5366_p2), %s362_s2, 1024  }
  0xec   : > { %3638 = vsyncadd (%p5366_p2), %s362_s2, 4294966272  ;;  %s5367_s18 = sld [smem:[#allocation26_spill]]  ;;  %s370_s14 = sand.u32 1, %s3817_s12  }
  0xed   : > { %s372_s15 = sand.u32 1, %s3669_s25   ;;  %s371_s23 = scalar_lea.sflag [#allocation7], %s370_s14 }
  0xee   : > { %s2788_s20 = sshll.u32 %s372_s15, 6 }
  0xef   : > { %s4109_s3 = scalar_lea.vmem [#allocation6], %s2788_s20 }
  0xf2   : > { %p5368_p9 = scmp.ne.s32.totalorder %s5367_s18, 0 }
  0xf4   : > { %3640 = dma.done.wait (%p5368_p9), %s371_s23, 1024  }
  0xf5   : > { %3642 = vsyncadd (%p5368_p9), %s371_s23, 4294966272  ;;  %p5369_p13 = scmp.eq.s32.totalorder %s3817_s12, 0 }
  0xf7   : > { %3644 = dma.done.wait (%p5369_p13), [#allocation7], 96   ;;  %p5370_p0 = pmov %p5369_p13 }
  0xf9   : > { %3646 = vsyncadd (%p5370_p0), [#allocation7], 4294967200  ;;  %p5371_p6 = pmov %p5370_p0 }
  0xfa   : > { %p5372_p7 = pmov %p5370_p0 }
  0xfb   : > { %3648 = dma.done.wait (%p5371_p6), [#allocation10], 112  }
  0xfc   : > { %3650 = vsyncadd (%p5372_p7), [#allocation10], 4294967184  ;;  %p5373_p10 = pmov %p5370_p0 }
  0xfd   : > { %p5374_p12 = pmov %p5370_p0 }
  0xfe   : > { %3652 = dma.done.wait (%p5373_p10), [#allocation13], 16  }
  0xff   : > { %3654 = vsyncadd (%p5374_p12), [#allocation13], 4294967280  ;;  %s2793_s8 = sshll.u32 %s4097_s6, 7  ;;  %s2794_s17 = sshll.u32 %s4097_s6, 1  ;;  %vm547_vm0 = vcmask 1041408   ;;  %vm516_vm1 = vcmask 31744   ;;  %v952_v23 = vlaneseq }
 0x100   : > { %v4129_v0 = vld [vmem:[#allocation12] ss:$0 sm:$0xff]  ;;  %v464_v1 = vld [vmem:[#allocation8 + $0x2] sm:$0x3]  ;;  %v3311_v4 = vld [vmem:[%s4101_s24 + $0x10] sm:$0xff]   ;;  %s3717_s12 = smov 120  }
 0x101   : > { %3141 = vmatprep.subr.msk.bf16.mxu0 %vm547_vm0, %v464_v1  ;;  %v549_v2 = vsel %vm547_vm0, %v464_v1, 0  ;;  %v3310_v3 = vld [vmem:[%s4101_s24 + $0x8] sm:$0xff]   ;;  %3142 = vmatprep.subr.msk.bf16.mxu1 %vm547_vm0, %v464_v1  ;;  %v463_v5 = vld [vmem:[#allocation8] sm:$0x3]  ;;  %v3312_v7 = vld [vmem:[%s4101_s24 + $0x18] sm:$0xff]   ;;  %v4188_v24 = vshrl.u32 %v952_v23, 7 }
 0x102   : > { %2948 = vmatpush3.bf16.msra.mxu0 %v549_v2  ;;  %3068 = vmatpush3.bf16.msra.mxu1 %v549_v2  ;;  %v673_v6 = vsel %vm547_vm0, %v463_v5, 0  ;;  %v3313_v8 = vld [vmem:[%s4101_s24 + $0x20] sm:$0xff]   ;;  %v3314_v9 = vld [vmem:[%s4101_s24 + $0x28] sm:$0xff]   ;;  %v3320_v12 = vld [vmem:[%s4109_s3 + $0x10] sm:$0xff]   ;;  %s3718_s0 = smov 124   ;;  %s3719_s7 = smov 8  }
 0x103   : > { %2949 = vmatprep.mubr.msk.bf16.mxu0 %vm516_vm1, %v3310_v3  ;;  %3143 = vmatprep.subr.msk.bf16.mxu0 %vm547_vm0, %v463_v5  ;;  %v465_v10 = vld [vmem:[#allocation8 + $0x4] sm:$0x3]  ;;  %v3319_v11 = vld [vmem:[%s4109_s3 + $0x8] sm:$0xff]   ;;  %v3315_v13 = vld [vmem:[%s4101_s24 + $0x30] sm:$0xff]   ;;  %v4193_v26 = vsub.s32 1, %v4188_v24  ;;  %vm954_vm2 = vcmp.lt.s32.totalorder %v4188_v24, 1 }
 0x104   : > { %2965 = vmatprep.mubr.msk.bf16.mxu1 %vm516_vm1, %v3319_v11  ;;  %v3316_v14 = vld [vmem:[%s4101_s24 + $0x38] sm:$0xff]   ;;  %v3317_v15 = vld [vmem:[%s4109_s3] sm:$0xff]   ;;  %v797_v17 = vsel %vm547_vm0, %v465_v10, 0  ;;  %vm1097_vm3 = vcmp.eq.s32.totalorder %v4188_v24, 0  ;;  %vm1075_vm4 = vcmp.lt.s32.totalorder %v4188_v24, 7  ;;  %s4725_s5 = scalar_lea.vmem [#allocation14], %s2793_s8 }
 0x105   : > { %2950 = vmatmul.mubr.msk.bf16.vlgmr.msra.gmra.mrb[0].mxu0 %vm516_vm1, %v3311_v4  ;;  %2966 = vmatmul.mubr.msk.bf16.vlgmr.msra.gmra.mrb[0].mxu1 %vm516_vm1, %v3320_v12  ;;  %v3318_v16 = vld [vmem:[%s4101_s24] sm:$0xff]   ;;  %v3321_v18 = vld [vmem:[%s4109_s3 + $0x18] sm:$0xff]   ;;  %s4729_s22 = scalar_lea.vmem [#allocation15], %s2794_s17  ;;  %s5375_s4 = sld [smem:[#allocation24_spill]] }
 0x106   : > { %2970 = vmatpush3.bf16.msra.mxu0 %v673_v6  ;;  %2953 = vmatprep.mubr.msk.bf16.mxu0 %vm516_vm1, %v3312_v7 }
 0x107   : > { %3144 = vmatprep.subr.msk.bf16.mxu0 %vm547_vm0, %v465_v10 }
 0x10b   : > { %p2848_p3 = scmp.ne.s32.totalorder %s5375_s4, 0 }
 0x10d   : > { %2954 = vmatmul.mubr.msk.bf16.gmra.mrb[4].mxu0 %vm516_vm1, %v3313_v8 }
 0x10e   : > { %2957 = vmatprep.mubr.msk.bf16.mxu0 %vm516_vm1, %v3314_v9 }
 0x115   : > { %2958 = vmatmul.mubr.msk.bf16.gmra.mrb[8].mxu0 %vm516_vm1, %v3315_v13 }
 0x116   : > { %2961 = vmatprep.mubr.msk.bf16.mxu0 %vm516_vm1, %v3316_v14 }
 0x11d   : > { %2962 = vmatmul.mubr.msk.bf16.gmra.mrb[12].mxu0 %vm516_vm1, %v3317_v15 }
 0x11e   : > { %2971 = vmatprep.mubr.msk.bf16.mxu0 %vm516_vm1, %v3318_v16 }
 0x125   : > { %2972 = vmatmul.mubr.msk.bf16.vlgmr.msra.gmra.mrb[0].mxu0 %vm516_vm1, %v3310_v3 }
 0x126   : > { %2992 = vmatpush3.bf16.msra.mxu0 %v797_v17  ;;  %2975 = vmatprep.mubr.msk.bf16.mxu0 %vm516_vm1, %v3311_v4 }
 0x12d   : > { %2976 = vmatmul.mubr.msk.bf16.gmra.mrb[4].mxu0 %vm516_vm1, %v3312_v7 }
 0x12e   : > { %2979 = vmatprep.mubr.msk.bf16.mxu0 %vm516_vm1, %v3313_v8 }
 0x135   : > { %2980 = vmatmul.mubr.msk.bf16.gmra.mrb[8].mxu0 %vm516_vm1, %v3314_v9 }
 0x136   : > { %2983 = vmatprep.mubr.msk.bf16.mxu0 %vm516_vm1, %v3315_v13 }
 0x13d   : > { %2984 = vmatmul.mubr.msk.bf16.gmra.mrb[12].mxu0 %vm516_vm1, %v3316_v14 }
 0x13e   : > { %2987 = vmatprep.mubr.msk.bf16.mxu0 %vm516_vm1, %v3317_v15 }
 0x145   : > { %2988 = vmatmul.mubr.msk.bf16.gmra.mrb[16].mxu0 %vm516_vm1, %v3319_v11 }
 0x146   : > { %2993 = vmatprep.mubr.msk.bf16.mxu0 %vm516_vm1, %v3311_v4 }
 0x14d   : > { %2994 = vmatmul.mubr.msk.bf16.vlgmr.msra.gmra.mrb[0].mxu0 %vm516_vm1, %v3312_v7 }
 0x14e   : > { %2997 = vmatprep.mubr.msk.bf16.mxu0 %vm516_vm1, %v3313_v8 }
 0x155   : > { %2998 = vmatmul.mubr.msk.bf16.gmra.mrb[4].mxu0 %vm516_vm1, %v3314_v9 }
 0x156   : > { %3001 = vmatprep.mubr.msk.bf16.mxu0 %vm516_vm1, %v3315_v13 }
 0x15d   : > { %3002 = vmatmul.mubr.msk.bf16.gmra.mrb[8].mxu0 %vm516_vm1, %v3316_v14 }
 0x15e   : > { %3005 = vmatprep.mubr.msk.bf16.mxu0 %vm516_vm1, %v3317_v15 }
 0x165   : > { %3006 = vmatmul.mubr.msk.bf16.gmra.mrb[12].mxu0 %vm516_vm1, %v3319_v11 }
 0x166   : > { %3009 = vmatprep.mubr.msk.bf16.mxu0 %vm516_vm1, %v3320_v12 }
 0x16d   : > { %3010 = vmatmul.mubr.msk.bf16.gmra.mrb[16].mxu0 %vm516_vm1, %v3321_v18 }
 0x1d8   : > { %v4180_v19 = vpop.f32.mrb[0].mxu1 }
 0x1d9   : > { %v4182_v20 = vpop.f32.mrb[1].mxu1 }
 0x1da   : > { %v4184_v21 = vpop.f32.mrb[2].mxu1 }
 0x1db   : > { %v4186_v22 = vpop.f32.mrb[3].mxu1 }
 0x220   : > { %v4190_v25 = vpop.f32.mrb[0].mxu0 }
 0x221   : > { %999 = vrot.lane.b32.xlu1 %v4190_v25, %s3717_s12  ;;  %v4197_v27 = vpop.f32.mrb[1].mxu0  ;;  %v934_v29 = vrot.slane %v4190_v25, 7  ;;  %v1106_v34 = vrot.slane %v4190_v25, %v4193_v26 }
 0x222   : > { %995 = vrot.lane.b32.xlu0 %v4197_v27, %s3717_s12  ;;  %v4201_v28 = vpop.f32.mrb[2].mxu0  ;;  %v932_v32 = vrot.slane %v4197_v27, 7 }
 0x223   : > { %v935_v30 = vrot.slane %v4201_v28, 7  ;;  %v4206_v31 = vpop.f32.mrb[3].mxu0 }
 0x224   : > { %v933_v33 = vrot.slane %v4206_v31, 7 }
 0x225   : > { %1001 = vrot.lane.b32.xlu1 %v4201_v28, %s3717_s12  ;;  %v4217_v35 = vsel %vm954_vm2, %v934_v29, %v935_v30 }
 0x226   : > { %997 = vrot.lane.b32.xlu0 %v4206_v31, %s3717_s12  ;;  %v4225_v36 = vsel %vm954_vm2, %v932_v32, %v933_v33  ;;  %v972_v37 = vsel %vm954_vm2, %v933_v33, %v934_v29 }
 0x227   : > { %v4231_v38 = vsel %vm1097_vm3, %v1106_v34, %v972_v37 }
 0x228   : > { %v4233_v39 = vpop.f32.mrb[4].mxu0 }
 0x229   : > { %v4235_v40 = vpop.f32.mrb[5].mxu0  ;;  %v938_v44 = vrot.slane %v4233_v39, 7  ;;  %v1114_v49 = vrot.slane %v4233_v39, %v4193_v26 }
 0x22a   : > { %v936_v41 = vrot.slane %v4235_v40, 7  ;;  %v1110_v42 = vrot.slane %v4235_v40, %v4193_v26  ;;  %1007 = vrot.lane.b32.xlu0 %v4233_v39, %s3717_s12  ;;  %v4242_v43 = vpop.f32.mrb[6].mxu0 }
 0x22b   : > { %v939_v45 = vrot.slane %v4242_v43, 7  ;;  %1009 = vrot.lane.b32.xlu1 %v4242_v43, %s3717_s12  ;;  %v4248_v46 = vpop.f32.mrb[7].mxu0 }
 0x22c   : > { %v937_v47 = vrot.slane %v4248_v46, 7  ;;  %v970_v48 = vsel %vm954_vm2, %v935_v30, %v936_v41 }
 0x22d   : > { %v4257_v50 = vsel %vm1097_vm3, %v1110_v42, %v970_v48  ;;  %v4261_v51 = vsel %vm954_vm2, %v938_v44, %v939_v45 }
 0x22e   : > { %1003 = vrot.lane.b32.xlu0 %v4235_v40, %s3717_s12  ;;  %v4267_v52 = vsel %vm954_vm2, %v936_v41, %v937_v47  ;;  %v968_v53 = vsel %vm954_vm2, %v937_v47, %v938_v44 }
 0x22f   : > { %1005 = vrot.lane.b32.xlu1 %v4248_v46, %s3717_s12  ;;  %v4275_v54 = vsel %vm1097_vm3, %v1114_v49, %v968_v53 }
 0x230   : > { %v4277_v55 = vpop.f32.mrb[8].mxu0 }
 0x231   : > { %v865_v56 = vpop.f32.mrb[9].mxu0  ;;  %v942_v60 = vrot.slane %v4277_v55, 7  ;;  %v1122_v2 = vrot.slane %v4277_v55, %v4193_v26 }
 0x232   : > { %v940_v57 = vrot.slane %v865_v56, 7  ;;  %v1118_v58 = vrot.slane %v865_v56, %v4193_v26  ;;  %1015 = vrot.lane.b32.xlu0 %v4277_v55, %s3717_s12  ;;  %v4282_v59 = vpop.f32.mrb[10].mxu0 }
 0x233   : > { %v943_v61 = vrot.slane %v4282_v59, 7  ;;  %1017 = vrot.lane.b32.xlu1 %v4282_v59, %s3717_s12  ;;  %v4288_v62 = vpop.f32.mrb[11].mxu0 }
 0x234   : > { %v941_v63 = vrot.slane %v4288_v62, 7  ;;  %v966_v1 = vsel %vm954_vm2, %v939_v45, %v940_v57 }
 0x235   : > { %v4297_v3 = vsel %vm1097_vm3, %v1118_v58, %v966_v1  ;;  %v4301_v4 = vsel %vm954_vm2, %v942_v60, %v943_v61 }
 0x236   : > { %1011 = vrot.lane.b32.xlu0 %v865_v56, %s3717_s12  ;;  %v4306_v5 = vsel %vm954_vm2, %v940_v57, %v941_v63  ;;  %v964_v6 = vsel %vm954_vm2, %v941_v63, %v942_v60 }
 0x237   : > { %1013 = vrot.lane.b32.xlu1 %v4288_v62, %s3717_s12  ;;  %v4314_v7 = vsel %vm1097_vm3, %v1122_v2, %v964_v6 }
 0x238   : > { %v4316_v8 = vpop.f32.mrb[12].mxu0 }
 0x239   : > { %v4318_v9 = vpop.f32.mrb[13].mxu0  ;;  %v946_v13 = vrot.slane %v4316_v8, 7  ;;  %v1130_v18 = vrot.slane %v4316_v8, %v4193_v26 }
 0x23a   : > { %v944_v10 = vrot.slane %v4318_v9, 7  ;;  %v1126_v11 = vrot.slane %v4318_v9, %v4193_v26  ;;  %1023 = vrot.lane.b32.xlu0 %v4316_v8, %s3717_s12  ;;  %v4325_v12 = vpop.f32.mrb[14].mxu0 }
 0x23b   : > { %v947_v14 = vrot.slane %v4325_v12, 7  ;;  %1025 = vrot.lane.b32.xlu1 %v4325_v12, %s3717_s12  ;;  %v4331_v15 = vpop.f32.mrb[15].mxu0 }
 0x23c   : > { %v945_v16 = vrot.slane %v4331_v15, 7  ;;  %v962_v17 = vsel %vm954_vm2, %v943_v61, %v944_v10 }
 0x23d   : > { %v4340_v23 = vsel %vm1097_vm3, %v1126_v11, %v962_v17  ;;  %v4346_v29 = vsel %vm954_vm2, %v946_v13, %v947_v14 }
 0x23e   : > { %1019 = vrot.lane.b32.xlu0 %v4318_v9, %s3717_s12  ;;  %v4352_v30 = vsel %vm954_vm2, %v944_v10, %v945_v16  ;;  %v960_v33 = vsel %vm954_vm2, %v945_v16, %v946_v13 }
 0x23f   : > { %1021 = vrot.lane.b32.xlu1 %v4331_v15, %s3717_s12  ;;  %v4360_v34 = vsel %vm1097_vm3, %v1130_v18, %v960_v33 }
 0x240   : > { %v3011_v37 = vpop.f32.mrb[16].mxu0 }
 0x241   : > { %v4363_v41 = vadd.f32 %v3011_v37, %v4180_v19  ;;  %v897_v42 = vpop.f32.mrb[17].mxu0 }
 0x242   : > { %v4366_v44 = vadd.f32 %v897_v42, %v4182_v20  ;;  %v3012_v45 = vpop.f32.mrb[18].mxu0 }
 0x243   : > { %v4369_v47 = vadd.f32 %v3012_v45, %v4184_v21  ;;  %1031 = vrot.lane.b32.xlu0 %v4363_v41, %s3717_s12  ;;  %v900_v48 = vpop.f32.mrb[19].mxu0 }
 0x244   : > { %v4374_v49 = vadd.f32 %v900_v48, %v4186_v22 }
 0x245   : > { %1033 = vrot.lane.b32.xlu1 %v4369_v47, %s3717_s12 }
 0x247   : > { %1027 = vrot.lane.b32.xlu0 %v4366_v44, %s3717_s12 }
 0x249   : > { %1029 = vrot.lane.b32.xlu1 %v4374_v49, %s3717_s12 }
 0x24b   : > { %1301 = vrot.lane.b32.xlu0 %v4197_v27, %s3718_s0 }
 0x24d   : > { %1303 = vrot.lane.b32.xlu1 %v4206_v31, %s3718_s0 }
 0x24f   : > { %1305 = vrot.lane.b32.xlu0 %v4190_v25, %s3718_s0 }
 0x251   : > { %1307 = vrot.lane.b32.xlu1 %v4201_v28, %s3718_s0 }
 0x253   : > { %1309 = vrot.lane.b32.xlu0 %v4235_v40, %s3718_s0 }
 0x255   : > { %1311 = vrot.lane.b32.xlu1 %v4248_v46, %s3718_s0 }
 0x257   : > { %1313 = vrot.lane.b32.xlu0 %v4233_v39, %s3718_s0 }
 0x259   : > { %1315 = vrot.lane.b32.xlu1 %v4242_v43, %s3718_s0 }
 0x25b   : > { %1317 = vrot.lane.b32.xlu0 %v865_v56, %s3718_s0 }
 0x25d   : > { %1319 = vrot.lane.b32.xlu1 %v4288_v62, %s3718_s0 }
 0x293   : > { %v1000_v19 = vpop.permute.xlu1 %999 }
 0x294   : > { %v4401_v20 = vpop.permute.xlu0 %995  ;;  %v1057_v22 = vrot.slane %v1000_v19, 1 }
 0x295   : > { %v1055_v58 = vrot.slane %v4401_v20, 1 }
 0x297   : > { %v1002_v21 = vpop.permute.xlu1 %1001 }
 0x298   : > { %v1058_v25 = vrot.slane %v1002_v21, 1  ;;  %v998_v40 = vpop.permute.xlu0 %997 }
 0x299   : > { %v1056_v53 = vrot.slane %v998_v40, 1 }
 0x29a   : > { %v1092_v39 = vsel %vm1075_vm4, %v1057_v22, %v1058_v25 }
 0x29b   : > { %1225 = vrot.lane.b32.xlu1 %v1092_v39, %s3719_s7  ;;  %v1093_v56 = vsel %vm1075_vm4, %v1056_v53, %v1057_v22  ;;  %v1094_v61 = vsel %vm1075_vm4, %v1055_v58, %v1056_v53 }
 0x29c   : > { %v1008_v57 = vpop.permute.xlu0 %1007  ;;  %1223 = vrot.lane.b32.xlu0 %v1093_v56, %s3719_s7 }
 0x29d   : > { %v1010_v60 = vpop.permute.xlu1 %1009  ;;  %v1061_v6 = vrot.slane %v1008_v57, 1 }
 0x29e   : > { %v1062_v11 = vrot.slane %v1010_v60, 1 }
 0x2a0   : > { %v1004_v63 = vpop.permute.xlu0 %1003  ;;  %1221 = vrot.lane.b32.xlu0 %v1094_v61, %s3719_s7  ;;  %v1088_v33 = vsel %vm1075_vm4, %v1061_v6, %v1062_v11 }
 0x2a1   : > { %v1059_v1 = vrot.slane %v1004_v63, 1  ;;  %v1006_v2 = vpop.permute.xlu1 %1005 }
 0x2a2   : > { %v1060_v10 = vrot.slane %v1006_v2, 1 }
 0x2a3   : > { %v1091_v13 = vsel %vm1075_vm4, %v1058_v25, %v1059_v1 }
 0x2a4   : > { %v1016_v16 = vpop.permute.xlu0 %1015  ;;  %1227 = vrot.lane.b32.xlu1 %v1091_v13, %s3719_s7  ;;  %v1089_v17 = vsel %vm1075_vm4, %v1060_v10, %v1061_v6  ;;  %v1090_v42 = vsel %vm1075_vm4, %v1059_v1, %v1060_v10 }
 0x2a5   : > { %v1018_v18 = vpop.permute.xlu1 %1017  ;;  %1231 = vrot.lane.b32.xlu0 %v1089_v17, %s3719_s7  ;;  %v1065_v19 = vrot.slane %v1016_v16, 1  ;;  %v951_v16 = vrot.slane %v4369_v47, 7 }
 0x2a6   : > { %v1066_v22 = vrot.slane %v1018_v18, 1 }
 0x2a8   : > { %v1012_v37 = vpop.permute.xlu0 %1011  ;;  %1233 = vrot.lane.b32.xlu1 %v1088_v33, %s3719_s7  ;;  %v1084_v56 = vsel %vm1075_vm4, %v1065_v19, %v1066_v22 }
 0x2a9   : > { %v1063_v45 = vrot.slane %v1012_v37, 1  ;;  %v1014_v48 = vpop.permute.xlu1 %1013  ;;  %1229 = vrot.lane.b32.xlu0 %v1090_v42, %s3719_s7 }
 0x2aa   : > { %v1064_v21 = vrot.slane %v1014_v48, 1  ;;  %v1102_v48 = vrot.slane %v4197_v27, %v4193_v26 }
 0x2ab   : > { %v1087_v25 = vsel %vm1075_vm4, %v1062_v11, %v1063_v45 }
 0x2ac   : > { %v1024_v40 = vpop.permute.xlu0 %1023  ;;  %1235 = vrot.lane.b32.xlu1 %v1087_v25, %s3719_s7  ;;  %v1085_v53 = vsel %vm1075_vm4, %v1064_v21, %v1065_v19  ;;  %v1086_v60 = vsel %vm1075_vm4, %v1063_v45, %v1064_v21  ;;  %v974_v45 = vsel %vm954_vm2, %v951_v16, %v932_v32 }
 0x2ad   : > { %v1026_v39 = vpop.permute.xlu1 %1025  ;;  %1239 = vrot.lane.b32.xlu0 %v1085_v53, %s3719_s7  ;;  %v1069_v1 = vrot.slane %v1024_v40, 1 }
 0x2ae   : > { %v1070_v6 = vrot.slane %v1026_v39, 1  ;;  %v1139_v39 = vsel %vm1097_vm3, %v1102_v48, %v974_v45 }
 0x2b0   : > { %v1020_v57 = vpop.permute.xlu0 %1019  ;;  %1241 = vrot.lane.b32.xlu1 %v1084_v56, %s3719_s7  ;;  %v1080_v18 = vsel %vm1075_vm4, %v1069_v1, %v1070_v6 }
 0x2b1   : > { %v1067_v61 = vrot.slane %v1020_v57, 1  ;;  %v1022_v63 = vpop.permute.xlu1 %1021  ;;  %1237 = vrot.lane.b32.xlu0 %v1086_v60, %s3719_s7 }
 0x2b2   : > { %v1068_v2 = vrot.slane %v1022_v63, 1 }
 0x2b3   : > { %v1083_v10 = vsel %vm1075_vm4, %v1066_v22, %v1067_v61 }
 0x2b4   : > { %1243 = vrot.lane.b32.xlu1 %v1083_v10, %s3719_s7  ;;  %v1081_v11 = vsel %vm1075_vm4, %v1068_v2, %v1069_v1  ;;  %v1082_v33 = vsel %vm1075_vm4, %v1067_v61, %v1068_v2 }
 0x2b5   : > { %v1032_v13 = vpop.permute.xlu0 %1031  ;;  %1247 = vrot.lane.b32.xlu0 %v1081_v11, %s3719_s7 }
 0x2b6   : > { %v1073_v21 = vrot.slane %v1032_v13, 1 }
 0x2b7   : > { %v1034_v17 = vpop.permute.xlu1 %1033 }
 0x2b8   : > { %1249 = vrot.lane.b32.xlu1 %v1080_v18, %s3719_s7  ;;  %v1074_v22 = vrot.slane %v1034_v17, 1 }
 0x2b9   : > { %1245 = vrot.lane.b32.xlu0 %v1082_v33, %s3719_s7  ;;  %v1028_v37 = vpop.permute.xlu0 %1027 }
 0x2ba   : > { %v1071_v42 = vrot.slane %v1028_v37, 1  ;;  %v1095_v60 = vsel %vm1075_vm4, %v1074_v22, %v1055_v58  ;;  %v1076_v20 = vsel %vm1075_vm4, %v1073_v21, %v1074_v22 }
 0x2bb   : > { %v1030_v19 = vpop.permute.xlu1 %1029 }
 0x2bc   : > { %v1072_v25 = vrot.slane %v1030_v19, 1  ;;  %v1079_v40 = vsel %vm1075_vm4, %v1070_v6, %v1071_v42 }
 0x2bd   : > { %v1302_v53 = vpop.permute.xlu0 %1301  ;;  %1251 = vrot.lane.b32.xlu1 %v1079_v40, %s3719_s7 }
 0x2be   : > { %v4466_v56 = vadd.f32 %v1302_v53, %v1139_v39  ;;  %v1077_v32 = vsel %vm1075_vm4, %v1072_v25, %v1073_v21  ;;  %v1078_v1 = vsel %vm1075_vm4, %v1071_v42, %v1072_v25 }
 0x2bf   : > { %1255 = vrot.lane.b32.xlu0 %v1077_v32, %s3719_s7  ;;  %v1304_v27 = vpop.permute.xlu1 %1303 }
 0x2c0   : > { %v4472_v57 = vadd.f32 %v1304_v27, %v4225_v36 }
 0x2c1   : > { %v1306_v61 = vpop.permute.xlu0 %1305  ;;  %1259 = vrot.lane.b32.xlu1 %v1095_v60, %s3719_s7 }
 0x2c2   : > { %v4480_v63 = vadd.f32 %v1306_v61, %v4231_v38 }
 0x2c3   : > { %1253 = vrot.lane.b32.xlu0 %v1078_v1, %s3719_s7  ;;  %v1308_v2 = vpop.permute.xlu1 %1307 }
 0x2c4   : > { %v4486_v36 = vadd.f32 %v1308_v2, %v4217_v35 }
 0x2c5   : > { %v1310_v6 = vpop.permute.xlu0 %1309  ;;  %1257 = vrot.lane.b32.xlu1 %v1076_v20, %s3719_s7 }
 0x2c6   : > { %v4492_v58 = vadd.f32 %v1310_v6, %v4257_v50 }
 0x2c7   : > { %1321 = vrot.lane.b32.xlu0 %v4277_v55, %s3718_s0  ;;  %v1312_v38 = vpop.permute.xlu1 %1311 }
 0x2c8   : > { %v4497_v10 = vadd.f32 %v1312_v38, %v4267_v52 }
 0x2c9   : > { %v1314_v11 = vpop.permute.xlu0 %1313  ;;  %1323 = vrot.lane.b32.xlu1 %v4282_v59, %s3718_s0 }
 0x2ca   : > { %v4502_v35 = vadd.f32 %v1314_v11, %v4275_v54 }
 0x2cb   : > { %1325 = vrot.lane.b32.xlu0 %v4318_v9, %s3718_s0  ;;  %v1316_v13 = vpop.permute.xlu1 %1315 }
 0x2cc   : > { %v4507_v50 = vadd.f32 %v1316_v13, %v4261_v51  ;;  %v4530_v51 = vadd.s32 8, %v4188_v24 }
 0x2cd   : > { %v1318_v17 = vpop.permute.xlu0 %1317  ;;  %1327 = vrot.lane.b32.xlu1 %v4331_v15, %s3718_s0 }
 0x2ce   : > { %v4512_v52 = vadd.f32 %v1318_v17, %v4297_v3  ;;  %v4533_v3 = vsub.s32 6, %v4188_v24  ;;  %vm1160_vm5 = vcmp.eq.s32.totalorder %v4530_v51, 15 }
 0x2cf   : > { %1329 = vrot.lane.b32.xlu0 %v4316_v8, %s3718_s0  ;;  %v1320_v55 = vpop.permute.xlu1 %1319 }
 0x2d0   : > { %v4517_v54 = vadd.f32 %v1320_v55, %v4306_v5  ;;  %v1164_v5 = vrot.slane %v4206_v31, %v4533_v3  ;;  %v1168_v37 = vrot.slane %v4201_v28, %v4533_v3  ;;  %v1172_v48 = vrot.slane %v4248_v46, %v4533_v3 }
 0x2d1   : > { %1331 = vrot.lane.b32.xlu1 %v4325_v12, %s3718_s0  ;;  %v1176_v28 = vrot.slane %v4242_v43, %v4533_v3  ;;  %v1180_v46 = vrot.slane %v4288_v62, %v4533_v3  ;;  %v1184_v43 = vrot.slane %v4282_v59, %v4533_v3  ;;  %v1188_v62 = vrot.slane %v4331_v15, %v4533_v3 }
 0x2d2   : > { %v1192_v6 = vrot.slane %v4325_v12, %v4533_v3  ;;  %v1196_v15 = vrot.slane %v4374_v49, %v4533_v3 }
 0x2d3   : > { %1333 = vrot.lane.b32.xlu0 %v4366_v44, %s3718_s0 }
 0x2d5   : > { %1335 = vrot.lane.b32.xlu1 %v4374_v49, %s3718_s0 }
 0x2d7   : > { %1337 = vrot.lane.b32.xlu0 %v4363_v41, %s3718_s0 }
 0x2d9   : > { %1339 = vrot.lane.b32.xlu1 %v4369_v47, %s3718_s0 }
 0x30d   : > { %v1226_v8 = vpop.permute.xlu1 %1225 }
 0x30e   : > { %v1224_v9 = vpop.permute.xlu0 %1223  ;;  %1405 = vrot.lane.b32.xlu0 %v1226_v8, %s3717_s12  ;;  %v1200_v8 = vrot.slane %v4369_v47, %v4533_v3 }
 0x30f   : > { %v1282_v18 = vsel %vm1160_vm5, %v1164_v5, %v1224_v9 }
 0x310   : > { %1403 = vrot.lane.b32.xlu1 %v1282_v18, %s3717_s12 }
 0x312   : > { %v1222_v33 = vpop.permute.xlu0 %1221 }
 0x313   : > { %1401 = vrot.lane.b32.xlu0 %v1222_v33, %s3717_s12 }
 0x316   : > { %v1228_v42 = vpop.permute.xlu1 %1227 }
 0x317   : > { %v1232_v45 = vpop.permute.xlu0 %1231  ;;  %v1284_v31 = vsel %vm1160_vm5, %v1168_v37, %v1228_v42 }
 0x318   : > { %1407 = vrot.lane.b32.xlu1 %v1284_v31, %s3717_s12  ;;  %v1286_v22 = vsel %vm1160_vm5, %v1172_v48, %v1232_v45 }
 0x31a   : > { %v1234_v19 = vpop.permute.xlu1 %1233 }
 0x31b   : > { %v1230_v21 = vpop.permute.xlu0 %1229  ;;  %1413 = vrot.lane.b32.xlu0 %v1234_v19, %s3717_s12 }
 0x31c   : > { %1411 = vrot.lane.b32.xlu1 %v1286_v22, %s3717_s12 }
 0x31e   : > { %v1236_v25 = vpop.permute.xlu1 %1235 }
 0x31f   : > { %v1240_v40 = vpop.permute.xlu0 %1239  ;;  %1409 = vrot.lane.b32.xlu0 %v1230_v21, %s3717_s12  ;;  %v1288_v53 = vsel %vm1160_vm5, %v1176_v28, %v1236_v25 }
 0x320   : > { %1415 = vrot.lane.b32.xlu1 %v1288_v53, %s3717_s12  ;;  %v1290_v27 = vsel %vm1160_vm5, %v1180_v46, %v1240_v40 }
 0x322   : > { %v1242_v39 = vpop.permute.xlu1 %1241 }
 0x323   : > { %v1238_v32 = vpop.permute.xlu0 %1237  ;;  %1421 = vrot.lane.b32.xlu0 %v1242_v39, %s3717_s12 }
 0x324   : > { %1419 = vrot.lane.b32.xlu1 %v1290_v27, %s3717_s12 }
 0x326   : > { %v1244_v60 = vpop.permute.xlu1 %1243 }
 0x327   : > { %v1248_v61 = vpop.permute.xlu0 %1247  ;;  %1417 = vrot.lane.b32.xlu0 %v1238_v32, %s3717_s12  ;;  %v1292_v1 = vsel %vm1160_vm5, %v1184_v43, %v1244_v60  ;;  %v4614_v32 = vld [vmem:[#allocation9] ss:$0 sm:$0xff] }
 0x328   : > { %1423 = vrot.lane.b32.xlu1 %v1292_v1, %s3717_s12  ;;  %v1294_v20 = vsel %vm1160_vm5, %v1188_v62, %v1248_v61 }
 0x32a   : > { %v1250_v2 = vpop.permute.xlu1 %1249 }
 0x32b   : > { %1429 = vrot.lane.b32.xlu0 %v1250_v2, %s3717_s12  ;;  %v1246_v59 = vpop.permute.xlu0 %1245 }
 0x32c   : > { %1427 = vrot.lane.b32.xlu1 %v1294_v20, %s3717_s12 }
 0x32f   : > { %1425 = vrot.lane.b32.xlu0 %v1246_v59, %s3717_s12  ;;  %v1252_v38 = vpop.permute.xlu1 %1251 }
 0x330   : > { %v1296_v11 = vsel %vm1160_vm5, %v1192_v6, %v1252_v38 }
 0x331   : > { %v1256_v13 = vpop.permute.xlu0 %1255  ;;  %1431 = vrot.lane.b32.xlu1 %v1296_v11, %s3717_s12 }
 0x332   : > { %v1298_v55 = vsel %vm1160_vm5, %v1196_v15, %v1256_v13 }
 0x333   : > { %v1260_v17 = vpop.permute.xlu1 %1259 }
 0x334   : > { %v1300_v9 = vsel %vm1160_vm5, %v1200_v8, %v1260_v17 }
 0x335   : > { %v1254_v5 = vpop.permute.xlu0 %1253  ;;  %1435 = vrot.lane.b32.xlu1 %v1298_v55, %s3717_s12 }
 0x336   : > { %1433 = vrot.lane.b32.xlu0 %v1254_v5, %s3717_s12 }
 0x337   : > { %v1258_v18 = vpop.permute.xlu1 %1257 }
 0x339   : > { %1439 = vrot.lane.b32.xlu1 %v1300_v9, %s3717_s12  ;;  %v1322_v33 = vpop.permute.xlu0 %1321 }
 0x33a   : > { %1437 = vrot.lane.b32.xlu0 %v1258_v18, %s3717_s12 }
 0x33b   : > { %v1324_v37 = vpop.permute.xlu1 %1323 }
 0x33d   : > { %v4596_v42 = vpop.permute.xlu0 %1325 }
 0x33f   : > { %v4598_v45 = vpop.permute.xlu1 %1327 }
 0x341   : > { %v4600_v31 = vpop.permute.xlu0 %1329 }
 0x343   : > { %v4602_v48 = vpop.permute.xlu1 %1331 }
 0x345   : > { %v4604_v19 = vpop.permute.xlu0 %1333 }
 0x347   : > { %v4606_v21 = vpop.permute.xlu1 %1335 }
 0x349   : > { %v4608_v22 = vpop.permute.xlu0 %1337 }
 0x34b   : > { %v4610_v28 = vpop.permute.xlu1 %1339 }
 0x380   : > { %v1406_v25 = vpop.permute.xlu0 %1405 }
 0x381   : > { %v1463_v60 = vadd.f32 %v1406_v25, %v4480_v63 }
 0x382   : > { %v1404_v40 = vpop.permute.xlu1 %1403 }
 0x383   : > { %v1462_v53 = vadd.f32 %v1404_v40, %v4472_v57  ;;  %v1489_v57 = vadd.f32 %v4614_v32, %v1463_v60 }
 0x385   : > { %v1402_v46 = vpop.permute.xlu0 %1401  ;;  %v1488_v27 = vadd.f32 %v4614_v32, %v1462_v53 }
 0x386   : > { %v1461_v39 = vadd.f32 %v1402_v46, %v4466_v56  ;;  %v1372_v46 = vadd.f32 %v1324_v37, %v4301_v4 }
 0x388   : > { %v1487_v43 = vadd.f32 %v4614_v32, %v1461_v39 }
 0x38a   : > { %v4619_v61 = vpack.c.bf16 %v1488_v27, %v1487_v43  ;;  %v1408_v1 = vpop.permute.xlu1 %1407 }
 0x38b   : > { %v1464_v62 = vadd.f32 %v1408_v1, %v4486_v36 }
 0x38c   : > { %v2838_v2 = vmul.bf16 3216621497, %v4619_v61 }
 0x38d   : > { %v1490_v20 = vadd.f32 %v4614_v32, %v1464_v62  ;;  %v1414_v56 = vpop.permute.xlu0 %1413 }
 0x38e   : > { %3322 = vpow.bf16 %v2838_v2  ;;  %v1412_v59 = vpop.permute.xlu1 %1411  ;;  %v1467_v11 = vadd.f32 %v1414_v56, %v4502_v35  ;;  %v1371_v35 = vadd.f32 %v1322_v33, %v4314_v7  ;;  %v1374_v56 = vadd.f32 %v4598_v45, %v4352_v30 }
 0x38f   : > { %v4625_v6 = vpack.c.bf16 %v1490_v20, %v1489_v57  ;;  %v1466_v38 = vadd.f32 %v1412_v59, %v4497_v10  ;;  %v949_v45 = vrot.slane %v4374_v49, 7 }
 0x390   : > { %v1493_v8 = vadd.f32 %v4614_v32, %v1467_v11 }
 0x391   : > { %v2839_v63 = vmul.bf16 3216621497, %v4625_v6  ;;  %v1410_v13 = vpop.permute.xlu0 %1409  ;;  %v1492_v55 = vadd.f32 %v4614_v32, %v1466_v38  ;;  %v1134_v38 = vrot.slane %v4366_v44, %v4193_v26 }
 0x392   : > { %v1465_v36 = vadd.f32 %v1410_v13, %v4492_v58  ;;  %v1416_v15 = vpop.permute.xlu1 %1415  ;;  %v1373_v13 = vadd.f32 %v4596_v42, %v4340_v23  ;;  %v1376_v23 = vadd.f32 %v4602_v48, %v4346_v29  ;;  %v1138_v29 = vrot.slane %v4363_v41, %v4193_v26 }
 0x393   : > { %3324 = vpow.bf16 %v2839_v63  ;;  %v1468_v17 = vadd.f32 %v1416_v15, %v4507_v50 }
 0x394   : > { %v1491_v5 = vadd.f32 %v4614_v32, %v1465_v36  ;;  %v1375_v36 = vadd.f32 %v4600_v31, %v4360_v34  ;;  %v950_v31 = vrot.slane %v4363_v41, 7 }
 0x395   : > { %v1494_v9 = vadd.f32 %v4614_v32, %v1468_v17  ;;  %v1422_v10 = vpop.permute.xlu0 %1421 }
 0x396   : > { %v4636_v18 = vpack.c.bf16 %v1492_v55, %v1491_v5  ;;  %v1420_v25 = vpop.permute.xlu1 %1419  ;;  %v1471_v27 = vadd.f32 %v1422_v10, %v1371_v35  ;;  %v956_v48 = vsel %vm954_vm2, %v949_v45, %v950_v31  ;;  %v955_v41 = vsel %vm954_vm2, %v950_v31, %v951_v16 }
 0x397   : > { %v4639_v40 = vpack.c.bf16 %v1494_v9, %v1493_v8  ;;  %v1470_v50 = vadd.f32 %v1420_v25, %v4517_v54  ;;  %v948_v54 = vrot.slane %v4366_v44, 7  ;;  %v1380_v47 = vadd.f32 %v4610_v28, %v955_v41 }
 0x398   : > { %v2840_v58 = vmul.bf16 3216621497, %v4636_v18  ;;  %v1497_v4 = vadd.f32 %v4614_v32, %v1471_v27 }
 0x399   : > { %v3323_v53 = vpop.eup %3322  ;;  %v2841_v39 = vmul.bf16 3216621497, %v4639_v40  ;;  %v1418_v43 = vpop.permute.xlu0 %1417  ;;  %v1496_v33 = vadd.f32 %v4614_v32, %v1470_v50  ;;  %v958_v30 = vsel %vm954_vm2, %v947_v14, %v948_v54  ;;  %v957_v10 = vsel %vm954_vm2, %v948_v54, %v949_v45 }
 0x39a   : > { %v1557_v60 = vadd.bf16 1065369472, %v3323_v53  ;;  %3326 = vpow.bf16 %v2840_v58  ;;  %v1469_v1 = vadd.f32 %v1418_v43, %v4512_v52  ;;  %v1424_v62 = vpop.permute.xlu1 %1423  ;;  %v1155_v9 = vsel %vm1097_vm3, %v1134_v38, %v958_v30 }
 0x39b   : > { %3328 = vpow.bf16 %v2841_v39  ;;  %v1472_v7 = vadd.f32 %v1424_v62, %v1372_v46  ;;  %v1377_v39 = vadd.f32 %v4604_v19, %v1155_v9  ;;  %v1378_v27 = vadd.f32 %v4606_v21, %v957_v10 }
 0x39c   : > { %3330 = vrcp.bf16 %v1557_v60  ;;  %v1495_v2 = vadd.f32 %v4614_v32, %v1469_v1 }
 0x39d   : > { %v1498_v37 = vadd.f32 %v4614_v32, %v1472_v7  ;;  %v1430_v57 = vpop.permute.xlu0 %1429 }
 0x39e   : > { %v3325_v20 = vpop.eup %3324  ;;  %v4653_v52 = vpack.c.bf16 %v1496_v33, %v1495_v2  ;;  %v1428_v59 = vpop.permute.xlu1 %1427  ;;  %v1475_v42 = vadd.f32 %v1430_v57, %v1375_v36  ;;  %v1157_v2 = vsel %vm1097_vm3, %v1138_v29, %v956_v48 }
 0x39f   : > { %v1558_v63 = vadd.bf16 1065369472, %v3325_v20  ;;  %v4657_v11 = vpack.c.bf16 %v1498_v37, %v1497_v4  ;;  %v1474_v17 = vadd.f32 %v1428_v59, %v1374_v56  ;;  %v1379_v4 = vadd.f32 %v4608_v22, %v1157_v2 }
 0x3a0   : > { %v2842_v15 = vmul.bf16 3216621497, %v4653_v52  ;;  %v1501_v58 = vadd.f32 %v4614_v32, %v1475_v42 }
 0x3a1   : > { %3332 = vrcp.bf16 %v1558_v63  ;;  %v2843_v44 = vmul.bf16 3216621497, %v4657_v11  ;;  %v1426_v55 = vpop.permute.xlu0 %1425  ;;  %v1500_v12 = vadd.f32 %v4614_v32, %v1474_v17 }
 0x3a2   : > { %3334 = vpow.bf16 %v2842_v15  ;;  %v1473_v34 = vadd.f32 %v1426_v55, %v1373_v13 }
 0x3a3   : > { %3336 = vpow.bf16 %v2843_v44  ;;  %v1432_v5 = vpop.permute.xlu1 %1431 }
 0x3a4   : > { %v1499_v14 = vadd.f32 %v4614_v32, %v1473_v34  ;;  %v1476_v8 = vadd.f32 %v1432_v5, %v1376_v23 }
 0x3a5   : > { %v3327_v49 = vpop.eup %3326 }
 0x3a6   : > { %v3329_v25 = vpop.eup %3328  ;;  %v1559_v35 = vadd.bf16 1065369472, %v3327_v49  ;;  %v4684_v50 = vpack.c.bf16 %v1500_v12, %v1499_v14  ;;  %v1502_v53 = vadd.f32 %v4614_v32, %v1476_v8 }
 0x3a7   : > { %v3331_v46 = vpop.eup %3330  ;;  %v1560_v43 = vadd.bf16 1065369472, %v3329_v25  ;;  %v1436_v60 = vpop.permute.xlu1 %1435 }
 0x3a8   : > { %v1568_v1 = vmul.bf16 1065369472, %v3331_v46  ;;  %3338 = vrcp.bf16 %v1559_v35  ;;  %v2844_v62 = vmul.bf16 3216621497, %v4684_v50  ;;  %v4694_v7 = vpack.c.bf16 %v1502_v53, %v1501_v58  ;;  %v1434_v33 = vpop.permute.xlu0 %1433 }
 0x3a9   : > { %3340 = vrcp.bf16 %v1560_v43  ;;  %v1478_v19 = vadd.f32 %v1436_v60, %v1378_v27  ;;  %v1477_v21 = vadd.f32 %v1434_v33, %v1377_v39 }
 0x3aa   : > { %v1587_v54 = vmul.bf16 %v1568_v1, %v4619_v61  ;;  %3342 = vpow.bf16 %v2844_v62  ;;  %v2845_v16 = vmul.bf16 3216621497, %v4694_v7 }
 0x3ab   : > { %v1504_v37 = vadd.f32 %v4614_v32, %v1478_v19  ;;  %v1503_v57 = vadd.f32 %v4614_v32, %v1477_v21  ;;  %v1440_v20 = vpop.permute.xlu1 %1439 }
 0x3ac   : > { %v3333_v56 = vpop.eup %3332  ;;  %1597 = vst.msk [vmem:[#allocation2] sm:$0xff] %vm516_vm1, %v1587_v54  ;;  %3344 = vpow.bf16 %v2845_v16  ;;  %v1480_v59 = vadd.f32 %v1440_v20, %v1380_v47  ;;  %v1438_v38 = vpop.permute.xlu0 %1437 }
 0x3ad   : > { %v3335_v63 = vpop.eup %3334  ;;  %v1570_v28 = vmul.bf16 1065369472, %v3333_v56  ;;  %v1515_v13 = vpack.c.bf16 %v1504_v37, %v1503_v57  ;;  %v1479_v61 = vadd.f32 %v1438_v38, %v1379_v4 }
 0x3ae   : > { %v3337_v36 = vpop.eup %3336  ;;  %v1561_v15 = vadd.bf16 1065369472, %v3335_v63  ;;  %v1506_v17 = vadd.f32 %v4614_v32, %v1480_v59 }
 0x3af   : > { %v1588_v22 = vmul.bf16 %v1570_v28, %v4625_v6  ;;  %v1562_v30 = vadd.bf16 1065369472, %v3337_v36  ;;  %v2846_v45 = vmul.bf16 3216621497, %v1515_v13  ;;  %v1505_v44 = vadd.f32 %v4614_v32, %v1479_v61 }
 0x3b0   : > { %3346 = vrcp.bf16 %v1561_v15 }
 0x3b1   : > { %1598 = vst.msk [vmem:[#allocation2 + $0x8] sm:$0xff] %vm516_vm1, %v1588_v22  ;;  %3348 = vrcp.bf16 %v1562_v30  ;;  %v1516_v55 = vpack.c.bf16 %v1506_v17, %v1505_v44 }
 0x3b2   : > { %3350 = vpow.bf16 %v2846_v45 }
 0x3b3   : > { %v3339_v23 = vpop.eup %3338  ;;  %v2847_v42 = vmul.bf16 3216621497, %v1516_v55 }
 0x3b4   : > { %v3341_v34 = vpop.eup %3340  ;;  %v1572_v31 = vmul.bf16 1065369472, %v3339_v23 }
 0x3b5   : > { %v3343_v5 = vpop.eup %3342  ;;  %v1574_v12 = vmul.bf16 1065369472, %v3341_v34  ;;  %3352 = vpow.bf16 %v2847_v42 }
 0x3b6   : > { %v1589_v14 = vmul.bf16 %v1572_v31, %v4636_v18  ;;  %v1563_v6 = vadd.bf16 1065369472, %v3343_v5 }
 0x3b7   : > { %v3345_v8 = vpop.eup %3344  ;;  %v1590_v49 = vmul.bf16 %v1574_v12, %v4639_v40 }
 0x3b8   : > { %1599 = vst.msk [vmem:[#allocation2 + $0x10] sm:$0xff] %vm516_vm1, %v1589_v14  ;;  %3354 = vrcp.bf16 %v1563_v6  ;;  %v1564_v32 = vadd.bf16 1065369472, %v3345_v8 }
 0x3b9   : > { %1600 = vst.msk [vmem:[#allocation2 + $0x18] sm:$0xff] %vm516_vm1, %v1590_v49 }
 0x3ba   : > { %3356 = vrcp.bf16 %v1564_v32 }
 0x3bb   : > { %v3347_v9 = vpop.eup %3346 }
 0x3bc   : > { %v3349_v10 = vpop.eup %3348  ;;  %v1576_v29 = vmul.bf16 1065369472, %v3347_v9 }
 0x3bd   : > { %v3351_v48 = vpop.eup %3350  ;;  %v1578_v25 = vmul.bf16 1065369472, %v3349_v10 }
 0x3be   : > { %v1591_v35 = vmul.bf16 %v1576_v29, %v4653_v52  ;;  %v1565_v58 = vadd.bf16 1065369472, %v3351_v48 }
 0x3bf   : > { %v1592_v18 = vmul.bf16 %v1578_v25, %v4657_v11 }
 0x3c0   : > { %v3353_v53 = vpop.eup %3352  ;;  %1601 = vst.msk [vmem:[#allocation2 + $0x20] sm:$0xff] %vm516_vm1, %v1591_v35  ;;  %3358 = vrcp.bf16 %v1565_v58 }
 0x3c1   : > { %1602 = vst.msk [vmem:[#allocation2 + $0x28] sm:$0xff] %vm516_vm1, %v1592_v18  ;;  %v1566_v40 = vadd.bf16 1065369472, %v3353_v53 }
 0x3c3   : > { %v3355_v46 = vpop.eup %3354  ;;  %3360 = vrcp.bf16 %v1566_v40 }
 0x3c4   : > { %v1580_v39 = vmul.bf16 1065369472, %v3355_v46 }
 0x3c5   : > { %v3357_v27 = vpop.eup %3356 }
 0x3c6   : > { %v1593_v41 = vmul.bf16 %v1580_v39, %v4684_v50  ;;  %v1582_v43 = vmul.bf16 1065369472, %v3357_v27  ;;  %v1612_v50 = vld [vmem:[#allocation2 + $0x10] sm:$0xff] (!%p2848_p3) }
 0x3c7   : > { %1613 = vst.msk [vmem:[#allocation2] sm:$0xff] (!%p2848_p3), %vm516_vm1, %v1612_v50 }
 0x3c8   : > { %1603 = vst.msk [vmem:[#allocation2 + $0x30] sm:$0xff] %vm516_vm1, %v1593_v41  ;;  %v1594_v52 = vmul.bf16 %v1582_v43, %v4694_v7 }
 0x3ca   : > { %1604 = vst.msk [vmem:[#allocation2 + $0x38] sm:$0xff] %vm516_vm1, %v1594_v52 }
 0x3cb   : > { %v3359_v11 = vpop.eup %3358 }
 0x3cc   : > { %v1584_v60 = vmul.bf16 1065369472, %v3359_v11 }
 0x3cd   : > { %1610 = sbr.rel (%p2848_p3) target bundleno = 980 (0x3d4), region = 72 }
 0x3ce   : > { %v3361_v1 = vpop.eup %3360  ;;  %v1595_v62 = vmul.bf16 %v1584_v60, %v1515_v13 }
 0x3cf   : > { %v1586_v33 = vmul.bf16 1065369472, %v3361_v1 }
 0x3d0   : > { %1605 = vst.msk [vmem:[#allocation2 + $0x40] sm:$0xff] %vm516_vm1, %v1595_v62 }
 0x3d1   : > { %v1596_v2 = vmul.bf16 %v1586_v33, %v1516_v55 }
 0x3d3   : > { %1606 = vst.msk [vmem:[#allocation2 + $0x48] sm:$0xff] %vm516_vm1, %v1596_v2 }
 0x3d4 PF: > { %s5376_s19 = sld [smem:[#allocation24_spill]] }
 0x3da   : > { %p2849_p1 = scmp.ne.s32.totalorder %s5376_s19, 1 }
 0x3db   : > { %v1619_v7 = vld [vmem:[#allocation2 + $0x38] sm:$0xff] (!%p2849_p1) }
 0x3dc   : > { %1617 = sbr.rel (%p2849_p1) target bundleno = 995 (0x3e3), region = 76  ;;  %1621 = vst.msk [vmem:[#allocation2 + $0x48] sm:$0xff] (!%p2849_p1), %vm516_vm1, %v1619_v7 }
 0x3e3 PF: > { %v1633_v19 = vld [vmem:[#allocation11 + $0x2] sm:$0x3]  ;;  %v1623_v21 = vld [vmem:[#allocation2 + $0x8] sm:$0xff]  ;;  %v1632_v54 = vld [vmem:[#allocation11] sm:$0x3]  ;;  %s5377_s2 = sld [smem:[#allocation24_spill]] }
 0x3e4   : > { %3145 = vmatprep.subr.msk.bf16.mxu1 %vm547_vm0, %v1633_v19  ;;  %v1660_v47 = vsel %vm547_vm0, %v1633_v19, 0  ;;  %3015 = vmatprep.mubr.msk.bf16.mxu1 %vm516_vm1, %v1623_v21  ;;  %v1624_v16 = vld [vmem:[#allocation2 + $0x10] sm:$0xff]  ;;  %v1763_v4 = vsel %vm547_vm0, %v1632_v54, 0  ;;  %v1625_v37 = vld [vmem:[#allocation2 + $0x18] sm:$0xff]  ;;  %v1626_v20 = vld [vmem:[#allocation2 + $0x20] sm:$0xff]  ;;  %s5378_s24 = sld [smem:[#allocation25_spill]] }
 0x3e5   : > { %3014 = vmatpush3.bf16.msra.mxu1 %v1660_v47  ;;  %v1634_v57 = vld [vmem:[#allocation11 + $0x4] sm:$0x3]  ;;  %v1627_v56 = vld [vmem:[#allocation2 + $0x28] sm:$0xff]  ;;  %v1628_v59 = vld [vmem:[#allocation2 + $0x30] sm:$0xff]  ;;  %s2567_s20 = sshll.u32 %s4725_s5, 4  ;;  %s5379_s17 = sld [smem:[#allocation34_spill]]  ;;  %s5191_s20 = int_to_ptr.vmem [resolvable:$true] %s2567_s20 }
 0x3e6   : > { %3146 = vmatprep.subr.msk.bf16.mxu1 %vm547_vm0, %v1632_v54  ;;  %v1629_v38 = vld [vmem:[#allocation2 + $0x38] sm:$0xff]  ;;  %v1630_v63 = vld [vmem:[#allocation2 + $0x40] sm:$0xff]  ;;  %v1866_v13 = vsel %vm547_vm0, %v1634_v57, 0  ;;  %v1631_v61 = vld [vmem:[#allocation2 + $0x48] sm:$0xff]  ;;  %s3535_s4 = scalar_lea.vmem %s5191_s20, 2048  ;;  %p5380_p4 = scmp.ne.s32.totalorder %s5352_s16, 0 }
 0x3e7   : > { %v1622_v28 = vld [vmem:[#allocation2] sm:$0xff]  ;;  %p3536_p11 = scmp.ne.s32.totalorder %s5191_s20, %s3535_s4  ;;  %s3720_s19 = smov [#allocation14]  }
 0x3e8   : > { %3016 = vmatmul.mubr.msk.bf16.vlgmr.msra.gmra.mrb[4].mxu1 %vm516_vm1, %v1624_v16 }
 0x3e9   : > { %3032 = vmatpush3.bf16.msra.mxu1 %v1763_v4  ;;  %3019 = vmatprep.mubr.msk.bf16.mxu1 %vm516_vm1, %v1625_v37  ;;  %s2886_s18 = sshll.u32 %s5377_s2, 4  ;;  %p3537_p8 = pnand %p3536_p11, %p5380_p4 }
 0x3ea   : > { %3147 = vmatprep.subr.msk.bf16.mxu1 %vm547_vm0, %v1634_v57  ;;  %s2879_s14 = sshll.u32 %s5378_s24, 5 }
 0x3eb   : > { %s2564_s15 = sadd.s32 %s2886_s18, %s2879_s14  ;;  %p3538_p5 = pneg %p3537_p8 }
 0x3ec   : > { %s2880_s23 = sshll.u32 %s2564_s15, 7  ;;  %s3539_s18 = sshll.u32 %s3720_s19, 4  ;;  %s3540_s18 = int_to_ptr.vmem [resolvable:$false] %s3539_s18 }
 0x3ed   : > { %s3541_s14 = scalar_lea.vmem %s3540_s18, 4096  ;;  %p3542_p2 = scmp.lt.s32.totalorder %s5191_s20, %s3540_s18 }
 0x3ee   : > { %p3543_p9 = scmp.lt.s32.totalorder %s3541_s14, %s3535_s4 }
 0x3f0   : > { %3020 = vmatmul.mubr.msk.bf16.gmra.mrb[8].mxu1 %vm516_vm1, %v1626_v20  ;;  %p3544_p13 = por %p3543_p9, %p3542_p2 }
 0x3f1   : > { %3023 = vmatprep.mubr.msk.bf16.mxu1 %vm516_vm1, %v1627_v56 }
 0x3f2   : > { %p3545_p0 = pnand %p3544_p13, %p3538_p5 }
 0x3f8   : > { %3024 = vmatmul.mubr.msk.bf16.gmra.mrb[12].mxu1 %vm516_vm1, %v1628_v59 }
 0x3f9   : > { %3027 = vmatprep.mubr.msk.bf16.mxu1 %vm516_vm1, %v1629_v38 }
 0x400   : > { %3028 = vmatmul.mubr.msk.bf16.gmra.mrb[16].mxu1 %vm516_vm1, %v1630_v63 }
 0x401   : > { %3033 = vmatprep.mubr.msk.bf16.mxu1 %vm516_vm1, %v1622_v28 }
 0x408   : > { %3034 = vmatmul.mubr.msk.bf16.vlgmr.msra.gmra.mrb[4].mxu1 %vm516_vm1, %v1623_v21 }
 0x409   : > { %3050 = vmatpush3.bf16.msra.mxu1 %v1866_v13  ;;  %3037 = vmatprep.mubr.msk.bf16.mxu1 %vm516_vm1, %v1624_v16 }
 0x410   : > { %3038 = vmatmul.mubr.msk.bf16.gmra.mrb[8].mxu1 %vm516_vm1, %v1625_v37 }
 0x411   : > { %3041 = vmatprep.mubr.msk.bf16.mxu1 %vm516_vm1, %v1626_v20 }
 0x418   : > { %3042 = vmatmul.mubr.msk.bf16.gmra.mrb[12].mxu1 %vm516_vm1, %v1627_v56 }
 0x419   : > { %3045 = vmatprep.mubr.msk.bf16.mxu1 %vm516_vm1, %v1628_v59 }
 0x420   : > { %3046 = vmatmul.mubr.msk.bf16.gmra.mrb[16].mxu1 %vm516_vm1, %v1629_v38 }
 0x421   : > { %3051 = vmatprep.mubr.msk.bf16.mxu1 %vm516_vm1, %v1624_v16 }
 0x428   : > { %3052 = vmatmul.mubr.msk.bf16.vlgmr.msra.gmra.mrb[4].mxu1 %vm516_vm1, %v1625_v37 }
 0x429   : > { %3055 = vmatprep.mubr.msk.bf16.mxu1 %vm516_vm1, %v1626_v20 }
 0x430   : > { %3056 = vmatmul.mubr.msk.bf16.gmra.mrb[8].mxu1 %vm516_vm1, %v1627_v56 }
 0x431   : > { %3059 = vmatprep.mubr.msk.bf16.mxu1 %vm516_vm1, %v1628_v59 }
 0x438   : > { %3060 = vmatmul.mubr.msk.bf16.gmra.mrb[12].mxu1 %vm516_vm1, %v1629_v38 }
 0x439   : > { %3063 = vmatprep.mubr.msk.bf16.mxu1 %vm516_vm1, %v1630_v63 }
 0x440   : > { %3064 = vmatmul.mubr.msk.bf16.gmra.mrb[16].mxu1 %vm516_vm1, %v1631_v61 }
 0x4fb   : > { %v4765_v36 = vpop.f32.mrb[4].mxu1 }
 0x4fc   : > { %2033 = vrot.lane.b32.xlu0 %v4765_v36, %s3717_s12  ;;  %v4769_v15 = vpop.f32.mrb[5].mxu1  ;;  %v1983_v30 = vrot.slane %v4765_v36, 7  ;;  %v2116_v23 = vrot.slane %v4765_v36, %v4193_v26 }
 0x4fd   : > { %2029 = vrot.lane.b32.xlu1 %v4769_v15, %s3717_s12  ;;  %v4773_v17 = vpop.f32.mrb[6].mxu1  ;;  %v1981_v44 = vrot.slane %v4769_v15, 7  ;;  %v2112_v59 = vrot.slane %v4769_v15, %v4193_v26 }
 0x4fe   : > { %v4775_v22 = vpop.f32.mrb[7].mxu1  ;;  %v1984_v45 = vrot.slane %v4773_v17, 7 }
 0x4ff   : > { %v1982_v55 = vrot.slane %v4775_v22, 7 }
 0x500   : > { %2031 = vrot.lane.b32.xlu0 %v4775_v22, %s3717_s12  ;;  %v4787_v42 = vsel %vm954_vm2, %v1983_v30, %v1984_v45 }
 0x501   : > { %2035 = vrot.lane.b32.xlu1 %v4773_v17, %s3717_s12  ;;  %v4795_v34 = vsel %vm954_vm2, %v1981_v44, %v1982_v55  ;;  %v2010_v31 = vsel %vm954_vm2, %v1982_v55, %v1983_v30 }
 0x502   : > { %v4801_v5 = vsel %vm1097_vm3, %v2116_v23, %v2010_v31 }
 0x503   : > { %v4803_v12 = vpop.f32.mrb[8].mxu1 }
 0x504   : > { %v4805_v14 = vpop.f32.mrb[9].mxu1  ;;  %v1987_v9 = vrot.slane %v4803_v12, 7  ;;  %v2124_v35 = vrot.slane %v4803_v12, %v4193_v26 }
 0x505   : > { %2037 = vrot.lane.b32.xlu0 %v4805_v14, %s3717_s12  ;;  %v4809_v6 = vpop.f32.mrb[10].mxu1  ;;  %v1985_v8 = vrot.slane %v4805_v14, 7  ;;  %v2120_v49 = vrot.slane %v4805_v14, %v4193_v26 }
 0x506   : > { %v4814_v32 = vpop.f32.mrb[11].mxu1  ;;  %v1988_v10 = vrot.slane %v4809_v6, 7 }
 0x507   : > { %2039 = vrot.lane.b32.xlu1 %v4814_v32, %s3717_s12  ;;  %v2008_v29 = vsel %vm954_vm2, %v1984_v45, %v1985_v8  ;;  %v1986_v48 = vrot.slane %v4814_v32, 7 }
 0x508   : > { %v4825_v25 = vsel %vm1097_vm3, %v2120_v49, %v2008_v29  ;;  %v4831_v58 = vsel %vm954_vm2, %v1987_v9, %v1988_v10 }
 0x509   : > { %2041 = vrot.lane.b32.xlu0 %v4803_v12, %s3717_s12  ;;  %v4837_v18 = vsel %vm954_vm2, %v1985_v8, %v1986_v48  ;;  %v2006_v53 = vsel %vm954_vm2, %v1986_v48, %v1987_v9 }
 0x50a   : > { %v4843_v40 = vsel %vm1097_vm3, %v2124_v35, %v2006_v53 }
 0x50b   : > { %2043 = vrot.lane.b32.xlu1 %v4809_v6, %s3717_s12  ;;  %v4847_v46 = vpop.f32.mrb[12].mxu1 }
 0x50c   : > { %v4849_v39 = vpop.f32.mrb[13].mxu1  ;;  %v1991_v11 = vrot.slane %v4847_v46, 7  ;;  %v2132_v2 = vrot.slane %v4847_v46, %v4193_v26 }
 0x50d   : > { %2045 = vrot.lane.b32.xlu0 %v4849_v39, %s3717_s12  ;;  %v4853_v27 = vpop.f32.mrb[14].mxu1  ;;  %v1989_v41 = vrot.slane %v4849_v39, 7  ;;  %v2128_v43 = vrot.slane %v4849_v39, %v4193_v26 }
 0x50e   : > { %v4858_v52 = vpop.f32.mrb[15].mxu1  ;;  %v1992_v60 = vrot.slane %v4853_v27, 7 }
 0x50f   : > { %2047 = vrot.lane.b32.xlu1 %v4858_v52, %s3717_s12  ;;  %v2004_v1 = vsel %vm954_vm2, %v1988_v10, %v1989_v41  ;;  %v1990_v62 = vrot.slane %v4858_v52, 7 }
 0x510   : > { %v4869_v33 = vsel %vm1097_vm3, %v2128_v43, %v2004_v1  ;;  %v4875_v50 = vsel %vm954_vm2, %v1991_v11, %v1992_v60 }
 0x511   : > { %2049 = vrot.lane.b32.xlu0 %v4847_v46, %s3717_s12  ;;  %v4881_v7 = vsel %vm954_vm2, %v1989_v41, %v1990_v62  ;;  %v2002_v19 = vsel %vm954_vm2, %v1990_v62, %v1991_v11 }
 0x512   : > { %v4887_v21 = vsel %vm1097_vm3, %v2132_v2, %v2002_v19 }
 0x513   : > { %2051 = vrot.lane.b32.xlu1 %v4853_v27, %s3717_s12  ;;  %v4891_v47 = vpop.f32.mrb[16].mxu1 }
 0x514   : > { %v4893_v54 = vpop.f32.mrb[17].mxu1  ;;  %v1995_v56 = vrot.slane %v4891_v47, 7  ;;  %v2140_v61 = vrot.slane %v4891_v47, %v4193_v26 }
 0x515   : > { %2053 = vrot.lane.b32.xlu0 %v4893_v54, %s3717_s12  ;;  %v4897_v16 = vpop.f32.mrb[18].mxu1  ;;  %v1993_v4 = vrot.slane %v4893_v54, 7  ;;  %v2136_v37 = vrot.slane %v4893_v54, %v4193_v26 }
 0x516   : > { %v4902_v57 = vpop.f32.mrb[19].mxu1  ;;  %v1996_v20 = vrot.slane %v4897_v16, 7 }
 0x517   : > { %2055 = vrot.lane.b32.xlu1 %v4902_v57, %s3717_s12  ;;  %v2000_v38 = vsel %vm954_vm2, %v1992_v60, %v1993_v4  ;;  %v1994_v63 = vrot.slane %v4902_v57, 7 }
 0x518   : > { %v2012_v28 = vsel %vm954_vm2, %v1996_v20, %v1981_v44  ;;  %v4919_v13 = vsel %vm1097_vm3, %v2136_v37, %v2000_v38  ;;  %v4925_v30 = vsel %vm954_vm2, %v1995_v56, %v1996_v20 }
 0x519   : > { %2057 = vrot.lane.b32.xlu0 %v4891_v47, %s3717_s12  ;;  %v4931_v45 = vsel %vm1097_vm3, %v2112_v59, %v2012_v28  ;;  %v4935_v44 = vsel %vm954_vm2, %v1993_v4, %v1994_v63  ;;  %v1998_v55 = vsel %vm954_vm2, %v1994_v63, %v1995_v56 }
 0x51a   : > { %v4941_v26 = vsel %vm1097_vm3, %v2140_v61, %v1998_v55 }
 0x51b   : > { %2059 = vrot.lane.b32.xlu1 %v4897_v16, %s3717_s12 }
 0x56e   : > { %v2034_v23 = vpop.permute.xlu0 %2033 }
 0x56f   : > { %v2030_v31 = vpop.permute.xlu1 %2029  ;;  %v2079_v29 = vrot.slane %v2034_v23, 1 }
 0x570   : > { %v2077_v49 = vrot.slane %v2030_v31, 1 }
 0x572   : > { %v2032_v8 = vpop.permute.xlu0 %2031 }
 0x573   : > { %v2078_v9 = vrot.slane %v2032_v8, 1  ;;  %v2036_v10 = vpop.permute.xlu1 %2035 }
 0x574   : > { %v2080_v48 = vrot.slane %v2036_v10, 1 }
 0x575   : > { %v2107_v35 = vsel %vm1075_vm4, %v2077_v49, %v2078_v9  ;;  %v2106_v60 = vsel %vm1075_vm4, %v2078_v9, %v2079_v29 }
 0x576   : > { %2205 = vrot.lane.b32.xlu1 %v2107_v35, %s3719_s7  ;;  %v2105_v53 = vsel %vm1075_vm4, %v2079_v29, %v2080_v48 }
 0x577   : > { %v2038_v41 = vpop.permute.xlu0 %2037  ;;  %2209 = vrot.lane.b32.xlu0 %v2105_v53, %s3719_s7 }
 0x578   : > { %v2081_v43 = vrot.slane %v2038_v41, 1 }
 0x579   : > { %v2040_v11 = vpop.permute.xlu1 %2039 }
 0x57a   : > { %v2104_v1 = vsel %vm1075_vm4, %v2080_v48, %v2081_v43  ;;  %v2082_v2 = vrot.slane %v2040_v11, 1 }
 0x57b   : > { %v2042_v62 = vpop.permute.xlu0 %2041  ;;  %2207 = vrot.lane.b32.xlu0 %v2106_v60, %s3719_s7  ;;  %2211 = vrot.lane.b32.xlu1 %v2104_v1, %s3719_s7 }
 0x57c   : > { %v2083_v19 = vrot.slane %v2042_v62, 1  ;;  %v2103_v31 = vsel %vm1075_vm4, %v2081_v43, %v2082_v2 }
 0x57d   : > { %v2044_v4 = vpop.permute.xlu1 %2043 }
 0x57e   : > { %v2084_v37 = vrot.slane %v2044_v4, 1  ;;  %v2102_v20 = vsel %vm1075_vm4, %v2082_v2, %v2083_v19 }
 0x57f   : > { %v2046_v56 = vpop.permute.xlu0 %2045  ;;  %2215 = vrot.lane.b32.xlu1 %v2102_v20, %s3719_s7 }
 0x580   : > { %v2085_v59 = vrot.slane %v2046_v56, 1  ;;  %v2101_v38 = vsel %vm1075_vm4, %v2083_v19, %v2084_v37 }
 0x581   : > { %v2048_v63 = vpop.permute.xlu1 %2047  ;;  %2217 = vrot.lane.b32.xlu0 %v2101_v38, %s3719_s7 }
 0x582   : > { %v2100_v28 = vsel %vm1075_vm4, %v2084_v37, %v2085_v59  ;;  %v2086_v55 = vrot.slane %v2048_v63, 1  ;;  %v2168_v63 = vrot.slane %v4814_v32, %v4533_v3 }
 0x583   : > { %v2050_v61 = vpop.permute.xlu0 %2049  ;;  %2219 = vrot.lane.b32.xlu1 %v2100_v28, %s3719_s7 }
 0x584   : > { %v2087_v23 = vrot.slane %v2050_v61, 1  ;;  %v2099_v11 = vsel %vm1075_vm4, %v2085_v59, %v2086_v55  ;;  %v2172_v61 = vrot.slane %v4809_v6, %v4533_v3 }
 0x585   : > { %v2052_v8 = vpop.permute.xlu1 %2051  ;;  %2213 = vrot.lane.b32.xlu0 %v2103_v31, %s3719_s7 }
 0x586   : > { %v2088_v9 = vrot.slane %v2052_v8, 1  ;;  %v2098_v10 = vsel %vm1075_vm4, %v2086_v55, %v2087_v23  ;;  %v2176_v8 = vrot.slane %v4858_v52, %v4533_v3 }
 0x587   : > { %v2054_v29 = vpop.permute.xlu0 %2053  ;;  %2223 = vrot.lane.b32.xlu1 %v2098_v10, %s3719_s7  ;;  %v2180_v10 = vrot.slane %v4853_v27, %v4533_v3 }
 0x588   : > { %v2089_v48 = vrot.slane %v2054_v29, 1  ;;  %v2097_v35 = vsel %vm1075_vm4, %v2087_v23, %v2088_v9 }
 0x589   : > { %2225 = vrot.lane.b32.xlu0 %v2097_v35, %s3719_s7  ;;  %v2056_v53 = vpop.permute.xlu1 %2055 }
 0x58a   : > { %v2096_v41 = vsel %vm1075_vm4, %v2088_v9, %v2089_v48  ;;  %v2090_v2 = vrot.slane %v2056_v53, 1 }
 0x58b   : > { %v2058_v43 = vpop.permute.xlu0 %2057  ;;  %2227 = vrot.lane.b32.xlu1 %v2096_v41, %s3719_s7 }
 0x58c   : > { %v2091_v1 = vrot.slane %v2058_v43, 1  ;;  %v2095_v20 = vsel %vm1075_vm4, %v2089_v48, %v2090_v2 }
 0x58d   : > { %2221 = vrot.lane.b32.xlu0 %v2099_v11, %s3719_s7  ;;  %v2060_v60 = vpop.permute.xlu1 %2059 }
 0x58e   : > { %v2092_v62 = vrot.slane %v2060_v60, 1  ;;  %v2094_v37 = vsel %vm1075_vm4, %v2090_v2, %v2091_v1 }
 0x590   : > { %v2108_v19 = vsel %vm1075_vm4, %v2092_v62, %v2077_v49  ;;  %v2093_v4 = vsel %vm1075_vm4, %v2091_v1, %v2092_v62  ;;  %v2164_v49 = vrot.slane %v4773_v17, %v4533_v3 }
 0x591   : > { %2235 = vrot.lane.b32.xlu1 %v2108_v19, %s3719_s7  ;;  %2233 = vrot.lane.b32.xlu0 %v2093_v4, %s3719_s7 }
 0x595   : > { %2231 = vrot.lane.b32.xlu1 %v2094_v37, %s3719_s7  ;;  %2229 = vrot.lane.b32.xlu0 %v2095_v20, %s3719_s7 }
 0x599   : > { %2271 = vrot.lane.b32.xlu1 %v4775_v22, %s3718_s0  ;;  %2269 = vrot.lane.b32.xlu0 %v4769_v15, %s3718_s0  ;;  %v2160_v15 = vrot.slane %v4775_v22, %v4533_v3 }
 0x59d   : > { %2275 = vrot.lane.b32.xlu1 %v4773_v17, %s3718_s0  ;;  %2273 = vrot.lane.b32.xlu0 %v4765_v36, %s3718_s0 }
 0x5a1   : > { %2277 = vrot.lane.b32.xlu1 %v4805_v14, %s3718_s0 }
 0x5a5   : > { %2279 = vrot.lane.b32.xlu1 %v4814_v32, %s3718_s0  ;;  %v2188_v32 = vrot.slane %v4897_v16, %v4533_v3 }
 0x5a9   : > { %2281 = vrot.lane.b32.xlu1 %v4803_v12, %s3718_s0 }
 0x5ad   : > { %2283 = vrot.lane.b32.xlu1 %v4809_v6, %s3718_s0 }
 0x5b1   : > { %2285 = vrot.lane.b32.xlu1 %v4849_v39, %s3718_s0 }
 0x5b5   : > { %2287 = vrot.lane.b32.xlu1 %v4858_v52, %s3718_s0  ;;  %v2184_v52 = vrot.slane %v4902_v57, %v4533_v3 }
 0x5e8   : > { %v2206_v24 = vpop.permute.xlu1 %2205 }
 0x5e9   : > { %v2210_v36 = vpop.permute.xlu0 %2209  ;;  %2349 = vrot.lane.b32.xlu1 %v2206_v24, %s3717_s12 }
 0x5ea   : > { %2353 = vrot.lane.b32.xlu0 %v2210_v36, %s3717_s12 }
 0x5ed   : > { %v2208_v14 = vpop.permute.xlu0 %2207  ;;  %2289 = vrot.lane.b32.xlu1 %v4847_v46, %s3718_s0  ;;  %v2212_v12 = vpop.permute.xlu1 %2211 }
 0x5ee   : > { %v2254_v39 = vsel %vm1160_vm5, %v2160_v15, %v2208_v14  ;;  %v2256_v22 = vsel %vm1160_vm5, %v2164_v49, %v2212_v12 }
 0x5ef   : > { %2351 = vrot.lane.b32.xlu0 %v2254_v39, %s3717_s12 }
 0x5f1   : > { %2291 = vrot.lane.b32.xlu1 %v4853_v27, %s3718_s0  ;;  %v2216_v56 = vpop.permute.xlu1 %2215 }
 0x5f2   : > { %v2258_v28 = vsel %vm1160_vm5, %v2168_v63, %v2216_v56 }
 0x5f3   : > { %2355 = vrot.lane.b32.xlu0 %v2256_v22, %s3717_s12  ;;  %v2218_v59 = vpop.permute.xlu0 %2217 }
 0x5f5   : > { %2293 = vrot.lane.b32.xlu1 %v4893_v54, %s3718_s0  ;;  %v2220_v46 = vpop.permute.xlu1 %2219 }
 0x5f6   : > { %v2260_v55 = vsel %vm1160_vm5, %v2172_v61, %v2220_v46 }
 0x5f7   : > { %2361 = vrot.lane.b32.xlu0 %v2218_v59, %s3717_s12  ;;  %v2214_v38 = vpop.permute.xlu0 %2213 }
 0x5f9   : > { %2295 = vrot.lane.b32.xlu1 %v4902_v57, %s3718_s0  ;;  %v2224_v17 = vpop.permute.xlu1 %2223 }
 0x5fb   : > { %2357 = vrot.lane.b32.xlu0 %v2214_v38, %s3717_s12  ;;  %v2226_v23 = vpop.permute.xlu0 %2225 }
 0x5fd   : > { %2297 = vrot.lane.b32.xlu1 %v4891_v47, %s3718_s0  ;;  %v2228_v54 = vpop.permute.xlu1 %2227 }
 0x5fe   : > { %v2264_v29 = vsel %vm1160_vm5, %v2180_v10, %v2228_v54 }
 0x5ff   : > { %2359 = vrot.lane.b32.xlu0 %v2258_v28, %s3717_s12  ;;  %v2222_v6 = vpop.permute.xlu0 %2221 }
 0x601   : > { %2299 = vrot.lane.b32.xlu1 %v4897_v16, %s3718_s0  ;;  %v2262_v16 = vsel %vm1160_vm5, %v2176_v8, %v2224_v17  ;;  %s2546_s0 = scalar_lea.sflag [#allocation5], %s4097_s6 }
 0x603   : > { %2363 = vrot.lane.b32.xlu0 %v2260_v55, %s3717_s12  ;;  %v2236_v47 = vpop.permute.xlu1 %2235  ;;  %v2234_v9 = vpop.permute.xlu0 %2233 }
 0x604   : > { %v2268_v31 = vsel %vm1160_vm5, %v2188_v32, %v2236_v47 }
 0x605   : > { %2379 = vrot.lane.b32.xlu1 %v2268_v31, %s3717_s12 }
 0x607   : > { %2369 = vrot.lane.b32.xlu0 %v2226_v23, %s3717_s12  ;;  %v2230_v48 = vpop.permute.xlu0 %2229  ;;  %v2232_v35 = vpop.permute.xlu1 %2231 }
 0x608   : > { %v2266_v53 = vsel %vm1160_vm5, %v2184_v52, %v2232_v35 }
 0x60b   : > { %2365 = vrot.lane.b32.xlu0 %v2222_v6, %s3717_s12  ;;  %v2272_v27 = vpop.permute.xlu1 %2271  ;;  %v2270_v2 = vpop.permute.xlu0 %2269 }
 0x60c   : > { %v2317_v57 = vadd.f32 %v2270_v2, %v4931_v45  ;;  %v2318_v12 = vadd.f32 %v2272_v27, %v4795_v34 }
 0x60f   : > { %2367 = vrot.lane.b32.xlu0 %v2262_v16, %s3717_s12  ;;  %v2276_v41 = vpop.permute.xlu1 %2275  ;;  %v2274_v51 = vpop.permute.xlu0 %2273 }
 0x610   : > { %v2319_v19 = vadd.f32 %v2274_v51, %v4801_v5  ;;  %v2320_v49 = vadd.f32 %v2276_v41, %v4787_v42 }
 0x613   : > { %2371 = vrot.lane.b32.xlu0 %v2264_v29, %s3717_s12  ;;  %v2278_v43 = vpop.permute.xlu1 %2277 }
 0x614   : > { %v2321_v35 = vadd.f32 %v2278_v43, %v4825_v25 }
 0x617   : > { %2373 = vrot.lane.b32.xlu0 %v2230_v48, %s3717_s12  ;;  %v2280_v11 = vpop.permute.xlu1 %2279 }
 0x618   : > { %v2322_v51 = vadd.f32 %v2280_v11, %v4837_v18 }
 0x61b   : > { %2375 = vrot.lane.b32.xlu0 %v2266_v53, %s3717_s12  ;;  %v2282_v60 = vpop.permute.xlu1 %2281 }
 0x61c   : > { %v2323_v28 = vadd.f32 %v2282_v60, %v4843_v40 }
 0x61f   : > { %2377 = vrot.lane.b32.xlu0 %v2234_v9, %s3717_s12  ;;  %v5073_v1 = vpop.permute.xlu1 %2283  ;;  %s5198_s12 = scalar_lea.hbm %s5379_s17, %s2880_s23 }
 0x623   : > { %v5075_v62 = vpop.permute.xlu1 %2285 }
 0x627   : > { %v5077_v3 = vpop.permute.xlu1 %2287 }
 0x65b   : > { %v2350_v4 = vpop.permute.xlu1 %2349 }
 0x65c   : > { %v2397_v37 = vadd.f32 %v2350_v4, %v2317_v57  ;;  %v2354_v20 = vpop.permute.xlu0 %2353 }
 0x65d   : > { %v2399_v24 = vadd.f32 %v2354_v20, %v2319_v19 }
 0x65e   : > { %v2419_v36 = vadd.f32 %v4129_v0, %v2397_v37 }
 0x65f   : > { %v2421_v15 = vadd.f32 %v4129_v0, %v2399_v24  ;;  %v5083_v14 = vpop.permute.xlu1 %2289  ;;  %v2324_v24 = vadd.f32 %v5073_v1, %v4831_v58 }
 0x660   : > { %2435 = vst.msk [vmem:[%s4725_s5] sm:$0xff] %vm516_vm1, %v2419_v36  ;;  %v2488_v56 = vmul.f32 %v2419_v36, %v2419_v36  ;;  %v2451_v59 = vsel %vm516_vm1, %v2419_v36, 0.0 }
 0x661   : > { %2437 = vst.msk [vmem:[%s4725_s5 + $0x10] sm:$0xff] %vm516_vm1, %v2421_v15  ;;  %v2352_v45 = vpop.permute.xlu0 %2351  ;;  %v2490_v17 = vmul.f32 %v2421_v15, %v2421_v15  ;;  %v2454_v55 = vsel %vm516_vm1, %v2421_v15, 0.0 }
 0x662   : > { %v2398_v39 = vadd.f32 %v2352_v45, %v2318_v12  ;;  %v2504_v42 = vsel %vm516_vm1, %v2488_v56, 0.0 }
 0x663   : > { %v5090_v5 = vpop.permute.xlu1 %2291  ;;  %v2507_v8 = vsel %vm516_vm1, %v2490_v17, 0.0 }
 0x664   : > { %v2420_v22 = vadd.f32 %v4129_v0, %v2398_v39 }
 0x665   : > { %v2356_v46 = vpop.permute.xlu0 %2355 }
 0x666   : > { %2436 = vst.msk [vmem:[%s4725_s5 + $0x8] sm:$0xff] %vm516_vm1, %v2420_v22  ;;  %v2452_v34 = vsel %vm516_vm1, %v2420_v22, 0.0  ;;  %v2489_v38 = vmul.f32 %v2420_v22, %v2420_v22  ;;  %v2400_v63 = vadd.f32 %v2356_v46, %v2320_v49  ;;  %v2327_v22 = vadd.f32 %v5083_v14, %v4887_v21 }
 0x667   : > { %v2453_v54 = vadd.f32 %v2452_v34, %v2451_v59  ;;  %v5099_v61 = vpop.permute.xlu1 %2293 }
 0x668   : > { %v2505_v32 = vsel %vm516_vm1, %v2489_v38, 0.0  ;;  %v2422_v47 = vadd.f32 %v4129_v0, %v2400_v63 }
 0x669   : > { %v2506_v23 = vadd.f32 %v2505_v32, %v2504_v42  ;;  %v2455_v31 = vadd.f32 %v2454_v55, %v2453_v54  ;;  %v2362_v6 = vpop.permute.xlu0 %2361 }
 0x66a   : > { %2438 = vst.msk [vmem:[%s4725_s5 + $0x18] sm:$0xff] %vm516_vm1, %v2422_v47  ;;  %v2456_v40 = vsel %vm516_vm1, %v2422_v47, 0.0  ;;  %v2491_v16 = vmul.f32 %v2422_v47, %v2422_v47  ;;  %v2403_v9 = vadd.f32 %v2362_v6, %v2323_v28  ;;  %v2325_v47 = vadd.f32 %v5075_v62, %v4869_v33 }
 0x66b   : > { %v2457_v10 = vadd.f32 %v2456_v40, %v2455_v31  ;;  %v2508_v29 = vadd.f32 %v2507_v8, %v2506_v23  ;;  %v5109_v48 = vpop.permute.xlu1 %2295 }
 0x66c   : > { %v2509_v52 = vsel %vm516_vm1, %v2491_v16, 0.0  ;;  %v2425_v53 = vadd.f32 %v4129_v0, %v2403_v9  ;;  %v2326_v16 = vadd.f32 %v5077_v3, %v4881_v7 }
 0x66d   : > { %v2510_v27 = vadd.f32 %v2509_v52, %v2508_v29  ;;  %v2358_v41 = vpop.permute.xlu0 %2357  ;;  %v2328_v52 = vadd.f32 %v5090_v5, %v4875_v50  ;;  %v2329_v50 = vadd.f32 %v5099_v61, %v4919_v13  ;;  %v2330_v61 = vadd.f32 %v5109_v48, %v4935_v44 }
 0x66e   : > { %2441 = vst.msk [vmem:[%s4725_s5 + $0x30] sm:$0xff] %vm516_vm1, %v2425_v53  ;;  %v2401_v60 = vadd.f32 %v2358_v41, %v2321_v35  ;;  %v2494_v12 = vmul.f32 %v2425_v53, %v2425_v53  ;;  %v2462_v59 = vsel %vm516_vm1, %v2425_v53, 0.0 }
 0x66f   : > { %v5116_v2 = vpop.permute.xlu1 %2297 }
 0x670   : > { %v2423_v57 = vadd.f32 %v4129_v0, %v2401_v60  ;;  %v2515_v38 = vsel %vm516_vm1, %v2494_v12, 0.0 }
 0x671   : > { %v2360_v19 = vpop.permute.xlu0 %2359 }
 0x672   : > { %2439 = vst.msk [vmem:[%s4725_s5 + $0x20] sm:$0xff] %vm516_vm1, %v2423_v57  ;;  %v2458_v25 = vsel %vm516_vm1, %v2423_v57, 0.0  ;;  %v2492_v43 = vmul.f32 %v2423_v57, %v2423_v57  ;;  %v2402_v4 = vadd.f32 %v2360_v19, %v2322_v51 }
 0x673   : > { %v2459_v37 = vadd.f32 %v2458_v25, %v2457_v10  ;;  %v2300_v20 = vpop.permute.xlu1 %2299 }
 0x674   : > { %v2511_v36 = vsel %vm516_vm1, %v2492_v43, 0.0  ;;  %v2424_v15 = vadd.f32 %v4129_v0, %v2402_v4  ;;  %v2332_v49 = vadd.f32 %v2300_v20, %v4925_v30 }
 0x675   : > { %v2512_v18 = vadd.f32 %v2511_v36, %v2510_v27  ;;  %v2364_v11 = vpop.permute.xlu0 %2363 }
 0x676   : > { %2440 = vst.msk [vmem:[%s4725_s5 + $0x28] sm:$0xff] %vm516_vm1, %v2424_v15  ;;  %v2460_v45 = vsel %vm516_vm1, %v2424_v15, 0.0  ;;  %v2493_v39 = vmul.f32 %v2424_v15, %v2424_v15  ;;  %v2404_v56 = vadd.f32 %v2364_v11, %v2324_v24 }
 0x677   : > { %v2461_v58 = vadd.f32 %v2460_v45, %v2459_v37  ;;  %v2380_v1 = vpop.permute.xlu1 %2379 }
 0x678   : > { %v2513_v46 = vsel %vm516_vm1, %v2493_v39, 0.0  ;;  %v2426_v17 = vadd.f32 %v4129_v0, %v2404_v56  ;;  %v2412_v34 = vadd.f32 %v2380_v1, %v2332_v49 }
 0x679   : > { %v2514_v63 = vadd.f32 %v2513_v46, %v2512_v18  ;;  %v2463_v28 = vadd.f32 %v2462_v59, %v2461_v58  ;;  %v2370_v30 = vpop.permute.xlu0 %2369  ;;  %v2331_v59 = vadd.f32 %v5116_v2, %v4941_v26 }
 0x67a   : > { %2442 = vst.msk [vmem:[%s4725_s5 + $0x38] sm:$0xff] %vm516_vm1, %v2426_v17  ;;  %v2464_v21 = vsel %vm516_vm1, %v2426_v17, 0.0  ;;  %v2495_v14 = vmul.f32 %v2426_v17, %v2426_v17  ;;  %v5141_v54 = vadd.f32 %v4129_v0, %v2412_v34  ;;  %v2407_v42 = vadd.f32 %v2370_v30, %v2327_v22 }
 0x67b   : > { %v2465_v55 = vadd.f32 %v2464_v21, %v2463_v28  ;;  %v2516_v32 = vadd.f32 %v2515_v38, %v2514_v63 }
 0x67c   : > { %v2517_v23 = vsel %vm516_vm1, %v2495_v14, 0.0  ;;  %2450 = vst.msk [vmem:[%s4725_s5 + $0x78] sm:$0xff] %vm516_vm1, %v5141_v54  ;;  %v2429_v31 = vadd.f32 %v4129_v0, %v2407_v42  ;;  %v2503_v21 = vmul.f32 %v5141_v54, %v5141_v54 }
 0x67d   : > { %v2518_v6 = vadd.f32 %v2517_v23, %v2516_v32  ;;  %v2366_v8 = vpop.permute.xlu0 %2365 }
 0x67e   : > { %2445 = vst.msk [vmem:[%s4725_s5 + $0x50] sm:$0xff] %vm516_vm1, %v2429_v31  ;;  %v2405_v40 = vadd.f32 %v2366_v8, %v2325_v47  ;;  %v2498_v3 = vmul.f32 %v2429_v31, %v2429_v31  ;;  %v2470_v5 = vsel %vm516_vm1, %v2429_v31, 0.0 }
 0x680   : > { %v2427_v9 = vadd.f32 %v4129_v0, %v2405_v40  ;;  %v2523_v24 = vsel %vm516_vm1, %v2498_v3, 0.0 }
 0x681   : > { %v2368_v10 = vpop.permute.xlu0 %2367 }
 0x682   : > { %2443 = vst.msk [vmem:[%s4725_s5 + $0x40] sm:$0xff] %vm516_vm1, %v2427_v9  ;;  %v2466_v33 = vsel %vm516_vm1, %v2427_v9, 0.0  ;;  %v2496_v62 = vmul.f32 %v2427_v9, %v2427_v9  ;;  %v2406_v29 = vadd.f32 %v2368_v10, %v2326_v16 }
 0x683   : > { %v2467_v35 = vadd.f32 %v2466_v33, %v2465_v55 }
 0x684   : > { %v2519_v53 = vsel %vm516_vm1, %v2496_v62, 0.0  ;;  %v2428_v27 = vadd.f32 %v4129_v0, %v2406_v29 }
 0x685   : > { %v2520_v41 = vadd.f32 %v2519_v53, %v2518_v6  ;;  %v2372_v7 = vpop.permute.xlu0 %2371 }
 0x686   : > { %2444 = vst.msk [vmem:[%s4725_s5 + $0x48] sm:$0xff] %vm516_vm1, %v2428_v27  ;;  %v2468_v60 = vsel %vm516_vm1, %v2428_v27, 0.0  ;;  %v2497_v51 = vmul.f32 %v2428_v27, %v2428_v27  ;;  %v2408_v57 = vadd.f32 %v2372_v7, %v2328_v52 }
 0x687   : > { %v2469_v19 = vadd.f32 %v2468_v60, %v2467_v35 }
 0x688   : > { %v2521_v25 = vsel %vm516_vm1, %v2497_v51, 0.0  ;;  %v2430_v43 = vadd.f32 %v4129_v0, %v2408_v57 }
 0x689   : > { %v2522_v4 = vadd.f32 %v2521_v25, %v2520_v41  ;;  %v2471_v37 = vadd.f32 %v2470_v5, %v2469_v19  ;;  %v2374_v20 = vpop.permute.xlu0 %2373 }
 0x68a   : > { %2446 = vst.msk [vmem:[%s4725_s5 + $0x58] sm:$0xff] %vm516_vm1, %v2430_v43  ;;  %v2472_v36 = vsel %vm516_vm1, %v2430_v43, 0.0  ;;  %v2499_v15 = vmul.f32 %v2430_v43, %v2430_v43  ;;  %v2409_v12 = vadd.f32 %v2374_v20, %v2329_v50 }
 0x68b   : > { %v2473_v18 = vadd.f32 %v2472_v36, %v2471_v37  ;;  %v2524_v13 = vadd.f32 %v2523_v24, %v2522_v4 }
 0x68c   : > { %v2525_v11 = vsel %vm516_vm1, %v2499_v15, 0.0  ;;  %v2431_v45 = vadd.f32 %v4129_v0, %v2409_v12 }
 0x68d   : > { %v2526_v39 = vadd.f32 %v2525_v11, %v2524_v13  ;;  %v2376_v49 = vpop.permute.xlu0 %2375 }
 0x68e   : > { %2447 = vst.msk [vmem:[%s4725_s5 + $0x60] sm:$0xff] %vm516_vm1, %v2431_v45  ;;  %v2474_v56 = vsel %vm516_vm1, %v2431_v45, 0.0  ;;  %v2500_v22 = vmul.f32 %v2431_v45, %v2431_v45  ;;  %v2410_v58 = vadd.f32 %v2376_v49, %v2330_v61 }
 0x68f   : > { %v2475_v1 = vadd.f32 %v2474_v56, %v2473_v18 }
 0x690   : > { %v2527_v44 = vsel %vm516_vm1, %v2500_v22, 0.0  ;;  %v2432_v48 = vadd.f32 %v4129_v0, %v2410_v58 }
 0x691   : > { %v2528_v46 = vadd.f32 %v2527_v44, %v2526_v39  ;;  %v2378_v17 = vpop.permute.xlu0 %2377 }
 0x692   : > { %2448 = vst.msk [vmem:[%s4725_s5 + $0x68] sm:$0xff] %vm516_vm1, %v2432_v48  ;;  %v2476_v34 = vsel %vm516_vm1, %v2432_v48, 0.0  ;;  %v2501_v38 = vmul.f32 %v2432_v48, %v2432_v48  ;;  %v2411_v63 = vadd.f32 %v2378_v17, %v2331_v59 }
 0x693   : > { %v2477_v28 = vadd.f32 %v2476_v34, %v2475_v1 }
 0x694   : > { %v2529_v26 = vsel %vm516_vm1, %v2501_v38, 0.0  ;;  %v2433_v2 = vadd.f32 %v4129_v0, %v2411_v63 }
 0x695   : > { %v2530_v30 = vadd.f32 %v2529_v26, %v2528_v46 }
 0x696   : > { %2449 = vst.msk [vmem:[%s4725_s5 + $0x70] sm:$0xff] %vm516_vm1, %v2433_v2  ;;  %v2478_v14 = vsel %vm516_vm1, %v2433_v2, 0.0  ;;  %v2502_v42 = vmul.f32 %v2433_v2, %v2433_v2 }
 0x697   : > { %v2479_v55 = vadd.f32 %v2478_v14, %v2477_v28 }
 0x698   : > { %3548 = shalt.err (!%p3545_p0)
}
 0x699   : > { %s3549_s5 = scalar_lea.hbm %s5198_s12, 2048  ;;  %s3553_s3 = scalar_lea.hbm %s5379_s17, 8192 }
 0x69a   : > { %p3550_p6 = scmp.ne.s32.totalorder %s5198_s12, %s3549_s5  ;;  %p3554_p12 = scmp.lt.u32.totalorder %s5198_s12, %s5379_s17 }
 0x69b   : > { %p3555_p3 = scmp.lt.u32.totalorder %s3553_s3, %s3549_s5  ;;  %p3557_p11 = scmp.lt.u32.totalorder %s3549_s5, %s5198_s12 }
 0x69c   : > { %p3551_p7 = pnand %p3550_p6, %p5380_p4 }
 0x69d   : > { %p3556_p1 = por %p3555_p3, %p3554_p12 }
 0x69e   : > { %p3552_p10 = pneg %p3551_p7 }
 0x69f   : > { %p3558_p8 = por %p3557_p11, %p3556_p1 }
 0x6a1   : > { %p3559_p5 = pnand %p3558_p8, %p3552_p10 }
 0x6a3   : > { %3562 = shalt.err (!%p3559_p5)
}
 0x6a4   : > { %s3721_s4 = smov 128   ;;  %v2480_v0 = vsel %vm516_vm1, %v5141_v54, 0.0  ;;  %v2531_v32 = vsel %vm516_vm1, %v2502_v42, 0.0  ;;  %v2533_v31 = vsel %vm516_vm1, %v2503_v21, 0.0  ;;  %s2881_s18 = sshll.u32 %s5378_s24, 1  ;;  %vm2541_vm6 = vcmask 1040384  }
 0x6a5   : > { %3169 = dma.vmem_to_hbm [thread:$0]  (%p5380_p4), %s5191_s20, 2048, %s5198_s12, %s2546_s0, %s3721_s4, %s3721_s4, %s3719_s7   ;;  %v2481_v47 = vadd.f32 %v2480_v0, %v2479_v55  ;;  %v2532_v23 = vadd.f32 %v2531_v32, %v2530_v30  ;;  %vm2543_vm7 = vcmask 25600  }
 0x6a6   : > { %s2581_s7 = sadd.s32 %s5377_s2, %s2881_s18  ;;  %s2585_s12 = sshll.u32 %s4729_s22, 4  ;;  %s5242_s12 = int_to_ptr.vmem [resolvable:$true] %s2585_s12 }
 0x6a7   : > { %v2482_v6 = vrot.slane %v2481_v47, 4  ;;  %v2534_v8 = vadd.f32 %v2533_v31, %v2532_v23  ;;  %s2882_s20 = sshll.u32 %s2581_s7, 5  ;;  %s5381_s5 = sld [smem:[#allocation35_spill]] }
 0x6a8   : > { %s2551_s2 = scalar_lea.sflag [#allocation16], %s4097_s6  ;;  %s3563_s24 = scalar_lea.vmem %s5242_s12, 32 }
 0x6a9   : > { %v2483_v40 = vadd.f32 %v2482_v6, %v2481_v47  ;;  %v2535_v16 = vrot.slane %v2534_v8, 4  ;;  %p3564_p2 = scmp.ne.s32.totalorder %s5242_s12, %s3563_s24  ;;  %s3722_s23 = smov [#allocation15]  }
 0x6aa   : > { %s3567_s3 = sshll.u32 %s3722_s23, 4  ;;  %s3568_s3 = int_to_ptr.vmem [resolvable:$false] %s3567_s3 }
 0x6ab   : > { %v2484_v9 = vrot.slane %v2483_v40, 2  ;;  %v2536_v10 = vadd.f32 %v2535_v16, %v2534_v8  ;;  %p3565_p9 = pnand %p3564_p2, %p5380_p4  ;;  %s3569_s8 = scalar_lea.vmem %s3568_s3, 64 }
 0x6ac   : > { %p3570_p0 = scmp.lt.s32.totalorder %s5242_s12, %s3568_s3  ;;  %p3571_p6 = scmp.lt.s32.totalorder %s3569_s8, %s3563_s24 }
 0x6ad   : > { %v2485_v33 = vadd.f32 %v2484_v9, %v2483_v40  ;;  %v2537_v62 = vrot.slane %v2536_v10, 2  ;;  %s5240_s15 = scalar_lea.hbm %s5381_s5, %s2882_s20  ;;  %p3566_p13 = pneg %p3565_p9 }
 0x6ae   : > { %p3572_p7 = por %p3571_p6, %p3570_p0 }
 0x6af   : > { %v2486_v54 = vrot.slane %v2485_v33, 1  ;;  %v2538_v29 = vadd.f32 %v2537_v62, %v2536_v10 }
 0x6b0   : > { %p3573_p10 = pnand %p3572_p7, %p3566_p13 }
 0x6b1   : > { %v2539_v35 = vrot.slane %v2538_v29, 1  ;;  %v2487_v52 = vadd.f32 %v2486_v54, %v2485_v33 }
 0x6b3   : > { %v2540_v53 = vadd.f32 %v2539_v35, %v2538_v29 }
 0x6b5   : > { %v2542_v27 = vsel %vm2541_vm6, %v2487_v52, %v2540_v53 }
 0x6b6   : > { %2544 = vst.msk [vmem:[%s4729_s22] sm:$0x3] %vm2543_vm7, %v2542_v27 }
 0x6b7   : > { %3576 = shalt.err (!%p3573_p10)
}
 0x6b8   : > { %s3577_s6 = scalar_lea.hbm %s5240_s15, 32  ;;  %s3581_s4 = scalar_lea.hbm %s5381_s5, 128 }
 0x6b9   : > { %p3578_p12 = scmp.ne.s32.totalorder %s5240_s15, %s3577_s6  ;;  %p3582_p11 = scmp.lt.u32.totalorder %s5240_s15, %s5381_s5 }
 0x6ba   : > { %p3583_p8 = scmp.lt.u32.totalorder %s3581_s4, %s3577_s6  ;;  %p3585_p2 = scmp.lt.u32.totalorder %s3577_s6, %s5240_s15 }
 0x6bb   : > { %p3579_p3 = pnand %p3578_p12, %p5380_p4 }
 0x6bc   : > { %p3584_p5 = por %p3583_p8, %p3582_p11 }
 0x6bd   : > { %p3580_p1 = pneg %p3579_p3 }
 0x6be   : > { %p3586_p9 = por %p3585_p2, %p3584_p5 }
 0x6c0   : > { %p3587_p13 = pnand %p3586_p9, %p3580_p1 }
 0x6c2   : > { %3590 = shalt.err (!%p3587_p13)
}
 0x6c3   : > { %3170 = dma.vmem_to_hbm [thread:$0]  (%p5380_p4), %s5242_s12, 32, %s5240_s15, %s2551_s2  }
 0x6c4 PF: > { %p3209_p0 = scmp.ge.s32.totalorder %s3705_s11, 2  ;;  %s2597_s20 = sand.u32 1, %s3677_s27  }
 0x6c5   : > { %p5382_p6 = scmp.ne.s32.totalorder %s5356_s21, 0  ;;  %s2598_s0 = scalar_lea.sflag [#allocation5], %s2597_s20 }
 0x6c7   : > { %p3194_p7 = pnand %p3209_p0, %p5382_p6 }
 0x6c9   : > { %3656 = dma.done.wait (!%p3194_p7), %s2598_s0, 2048  }
 0x6ca   : > { %3658 = vsyncadd (!%p3194_p7), %s2598_s0, 4294965248  ;;  %s2607_s14 = scalar_lea.sflag [#allocation16], %s2597_s20 }
 0x6cb   : > { %3660 = dma.done.wait (!%p3194_p7), %s2607_s14, 32  }
 0x6cc   : > { %3662 = vsyncadd (!%p3194_p7), %s2607_s14, 4294967264  ;;  %s32_s11 = sadd.s32 1, %s3705_s11   ;;  %s5383_s16 = sld [smem:[#allocation27_spill]] }
 0x6cd   : > { %p29_p10 = scmp.ge.s32.totalorder %s32_s11, 6   ;;  %s5384_s21 = sld [smem:[#allocation28_spill]] }
 0x6ce   : > { %s5385_s24 = smov %s3669_s25  ;;  %s5386_s25 = smov %s3673_s26 }
 0x6cf   : > { %s5387_s26 = smov %s4048_s13  ;;  %s5388_s27 = smov %s3681_s28 }
 0x6d0   : > { %s5389_s28 = smov %s3685_s29  ;;  %s5390_s29 = smov %s3979_s30 }
 0x6d1   : > { %s5391_s30 = smov %s3697_s9  ;;  %s5392_s8 = smov %s3701_s10 }
 0x6d2   : > { %s5393_s9 = smov %s5383_s16  ;;  %31 = sbr.rel (!%p29_p10) target bundleno = 23 (0x17), region = 146 }
 0x6d3   : > { %s5394_s10 = smov %s5384_s21 }
 0x6d9   :  { %2612 = vsyncpa [#allocation4], 1 }
 0x6da   :  { %2614 = vsyncpa [#allocation4 + $0x1], 1 }
 0x6db   :  { %2615 = vsyncpa [#allocation7], 1 }
 0x6dc   :  { %2617 = vsyncpa [#allocation7 + $0x1], 1 }
 0x6dd   :  { %2618 = vsyncpa [#allocation10], 1 }
 0x6de   :  { %2619 = vsyncpa [#allocation13], 1 }
 0x6df   :  { %2620 = vsyncpa [#allocation5], 1 }
 0x6e0   :  { %2622 = vsyncpa [#allocation5 + $0x1], 1 }
 0x6e1   :  { %2623 = vsyncpa [#allocation16], 1 }
 0x6e2   :  { %2625 = vsyncpa [#allocation16 + $0x1], 1 }

</bundles_post_ra>
